<compile_context>
chip_gen: v7x
topology: tpu7x:2x2x1
jax: 0.10.0
libtpu: 0.0.40
codegen_flags: <defaults>
</compile_context>

<pallas_src>
import jax
import jax.numpy as jnp
from jax.experimental import pallas as pl
from jax.experimental.pallas import tpu as pltpu

_LANES = 128                                  # f32 vreg lane width
_TILE_ROWS = 4096                             # (4096, 128) f32 = 2 MiB / buffer
_CHUNK = _TILE_ROWS * _LANES                  # elements per grid step (524288)
_MIN_PALLAS_N = 2 * _CHUNK                    # >= 2 grid steps before using Pallas


def _linear_kernel(wb_ref, x_ref, o_ref):
    # wb_ref: SMEM (2,) f32 = [weight, bias]; x_ref / o_ref: VMEM (4096, 128) f32.
    w = wb_ref[0]
    b = wb_ref[1]
    # y = x * W[0,0] + b[0]  ==  x @ W.T + b for a 1x1 weight: pure VPU FMA.
    o_ref[...] = x_ref[...] * w + b


def _linear_forward_pallas(x, weight, bias):
    """Pallas path for large N. x:(N,1) f32 -> (N,1) f32."""
    n = x.shape[0]
    x_flat = x.reshape(n).astype(jnp.float32)

    # Pad only to the next 128-element lane boundary (free bitcast-style
    # reshape when already aligned); the ragged *tile* boundary is handled by
    # Pallas' partial-last-block semantics via pl.cdiv below.
    rows = pl.cdiv(n, _LANES)
    n_pad = rows * _LANES
    if n_pad != n:
        x_flat = jnp.pad(x_flat, (0, n_pad - n))
    x_slab = x_flat.reshape(rows, _LANES)

    # Scalars packed for SMEM: [w, b].
    wb = jnp.stack([weight.reshape(()), bias.reshape(())]).astype(jnp.float32)

    out_slab = pl.pallas_call(
        _linear_kernel,
        out_shape=jax.ShapeDtypeStruct((rows, _LANES), jnp.float32),
        grid=(pl.cdiv(rows, _TILE_ROWS),),
        in_specs=[
            pl.BlockSpec(memory_space=pltpu.MemorySpace.SMEM),     # [w, b] scalars
            pl.BlockSpec((_TILE_ROWS, _LANES), lambda i: (i, 0)),  # x tile
        ],
        out_specs=pl.BlockSpec((_TILE_ROWS, _LANES), lambda i: (i, 0)),
        compiler_params=pltpu.CompilerParams(
            dimension_semantics=("parallel",)),
        cost_estimate=pl.CostEstimate(
            flops=2 * rows * _LANES,
            transcendentals=0,
            bytes_accessed=2 * rows * _LANES * 4),
    )(wb, x_slab)

    out_flat = out_slab.reshape(n_pad)
    if n_pad != n:
        out_flat = out_flat[:n]
    return out_flat.reshape(n, 1)


def linear_forward(x, weight, bias):
    """nn.Linear(1,1) forward: x:(N,1), weight:(1,1), bias:(1,) -> (N,1)."""
    n = x.shape[0]
    if n < _MIN_PALLAS_N:
        # Small/medium batch: fused XLA elementwise FMA is already at the HBM
        # roofline and avoids pallas_call launch + pad overhead.
        return x * weight[0, 0] + bias[0]
    return _linear_forward_pallas(x, weight, bias)


if __name__ == "__main__":
    key = jax.random.PRNGKey(0)
    kx, kw, kb, kx2, kx3 = jax.random.split(key, 5)

    # nn.Linear(1, 1) parameters: weight (out=1, in=1), bias (1,)
    # (PyTorch init range is uniform(-1/sqrt(in), 1/sqrt(in)) = (-1, 1).)
    weight = jax.random.uniform(kw, (1, 1), jnp.float32, minval=-1.0, maxval=1.0)
    bias = jax.random.uniform(kb, (1,), jnp.float32, minval=-1.0, maxval=1.0)

    # 1) Small demo batch implied by the module: (8, 1) -> fused XLA fast path.
    x_small = jax.random.normal(kx, (8, 1), jnp.float32)
    out_small = jax.block_until_ready(linear_forward(x_small, weight, bias))
    ref_small = x_small @ weight.T + bias
    assert out_small.shape == (8, 1)
    assert jnp.allclose(out_small, ref_small, atol=1e-6), "small-batch mismatch"

    # 2) Exercise the Pallas kernel directly with a ragged size: 2 grid steps,
    #    a partial last block, and a <128-element lane pad.
    n_ragged = _CHUNK + 513
    x_ragged = jax.random.normal(kx2, (n_ragged, 1), jnp.float32)
    out_ragged = jax.block_until_ready(_linear_forward_pallas(x_ragged, weight, bias))
    ref_ragged = x_ragged @ weight.T + bias
    assert out_ragged.shape == (n_ragged, 1)
    assert jnp.allclose(out_ragged, ref_ragged, atol=1e-5), "ragged pallas mismatch"

    # 3) Full routed path at the gate size: lane-aligned (no pad), even grid of
    #    2 parallel steps (v7x 2-TC sharding case).
    n_big = _MIN_PALLAS_N
    x_big = jax.random.normal(kx3, (n_big, 1), jnp.float32)
    out_big = jax.block_until_ready(linear_forward(x_big, weight, bias))
    ref_big = x_big @ weight.T + bias
    assert out_big.shape == (n_big, 1)
    assert jnp.allclose(out_big, ref_big, atol=1e-5), "pallas-path mismatch"

    print("KERNEL_OK")
</pallas_src>

<mosaic_0001>
module attributes {stable_mosaic.version = 11 : i64} {
  func.func @_linear_kernel(%arg0: i32, %arg1: memref<2xf32, #tpu.memory_space<smem>>, %arg2: memref<4096x128xf32, #tpu.memory_space<vmem>>, %arg3: memref<4096x128xf32, #tpu.memory_space<vmem>>) attributes {dimension_semantics = [#tpu.dimension_semantics<parallel>], iteration_bounds = array<i64: 2>, scalar_prefetch = 0 : i64, scratch_operands = 0 : i64, tpu.core_type = #tpu.core_type<tc>, window_params = [{transform_indices = @transform_0, window_bounds = array<i64: 2>}, {transform_indices = @transform_1, window_bounds = array<i64: 4096, 128>}, {transform_indices = @transform_2, window_bounds = array<i64: 4096, 128>}]} {
    %c0 = arith.constant 0 : index
    %0 = memref.load %arg1[%c0] : memref<2xf32, #tpu.memory_space<smem>>
    %c1 = arith.constant 1 : index
    %1 = memref.load %arg1[%c1] : memref<2xf32, #tpu.memory_space<smem>>
    %c0_0 = arith.constant 0 : index
    %c0_1 = arith.constant 0 : index
    %2 = vector.load %arg2[%c0_0, %c0_1] : memref<4096x128xf32, #tpu.memory_space<vmem>>, vector<4096x128xf32>
    %3 = vector.broadcast %0 : f32 to vector<4096x128xf32>
    %4 = arith.mulf %2, %3 : vector<4096x128xf32>
    %5 = vector.broadcast %1 : f32 to vector<4096x128xf32>
    %6 = arith.addf %4, %5 : vector<4096x128xf32>
    %c0_2 = arith.constant 0 : index
    %c0_3 = arith.constant 0 : index
    %7 = vector.load %arg3[%c0_2, %c0_3] : memref<4096x128xf32, #tpu.memory_space<vmem>>, vector<4096x128xf32>
    tpu.vector_store %arg3[%c0_2, %c0_3], %6 {strides = array<i32>} : memref<4096x128xf32, #tpu.memory_space<vmem>>, vector<4096x128xf32>,
    return
  }
  func.func @transform_0(%arg0: i32) -> i32 {
    %c0_i32 = arith.constant 0 : i32
    %c0_i32_0 = arith.constant 0 : i32
    return %c0_i32 : i32
  }
  func.func @transform_1(%arg0: i32) -> (i32, i32) {
    %c0_i32 = arith.constant 0 : i32
    %c0_i32_0 = arith.constant 0 : i32
    return %arg0, %c0_i32 : i32, i32
  }
  func.func @transform_2(%arg0: i32) -> (i32, i32) {
    %c0_i32 = arith.constant 0 : i32
    %c0_i32_0 = arith.constant 0 : i32
    return %arg0, %c0_i32 : i32, i32
  }
}

</mosaic_0001>

<bundles_post_ra>
// kernel: tpu_custom_call.1
= control target key start
LH: loop header
LB: loop body
LE: loop exit
PB: predicated region body
PF: predicated region fallthrough
CT: control target
= control target key end

     0   :  { %7 = vsyncpa [#allocation5], 0  ;;  %s4828_s0 = inlined_call_operand.hbm [shape: f32[2], index: 0, kind: input, shape index: {}]   ;;  %s4829_s1 = inlined_call_operand.hbm [shape: f32[4101,128], index: 1, kind: input, shape index: {}]   ;;  %s4830_s2 = inlined_call_operand.hbm [shape: f32[4101,128], index: 2, kind: output, shape index: {}]  }
   0x1   :  { %8 = vsyncpa [#allocation3], 0 }
   0x2   :  { %10 = vsyncpa [#allocation3 + $0x1], 0 }
   0x3   :  { %11 = vsyncpa [#allocation4], 0 }
   0x4   :  { %13 = vsyncpa [#allocation4 + $0x1], 0  ;;  %s2563_s9 = smov 0   ;;  %s2565_s10 = smov 0  }
   0x5   :  { %s2567_s11 = smov 0   ;;  %s2569_s12 = smov 0  }
   0x6 LB: > { %s2584_s13 = sadd.s32 4294967295, %s2539_s12   ;;  %s2347_s14 = sadd.s32 4294967294, %s2539_s12   ;;  %s2539_s12 = sphi %s2569_s12, %s4846_s12   ;;  %s2535_s11 = sphi %s2567_s11, %s4845_s11   ;;  %s2531_s10 = sphi %s2565_s10, %s4844_s10   ;;  %s2527_s9 = sphi %s2563_s9, %s4843_s9  }
   0x7   : > { %s2588_s15 = sadd.s32 1, %s2539_s12   ;;  %s47_s16 = sadd.s32 1, %s2535_s11 }
   0x8   : > { %s44_s17 = ssub.s32 %s2539_s12, %s2588_s15  ;;  %p54_p0 = scmp.ne.s32.totalorder %s2535_s11, %s2531_s10 }
   0x9   : > { %p45_p1 = scmp.eq.s32.totalorder %s44_s17, 0  ;;  %p55_p2 = scmp.eq.s32.totalorder %s2539_s12, 0 }
   0xa   : > { %p60_p3 = scmp.ne.s32.totalorder %s2531_s10, %s2527_s9  ;;  %p4832_p4 = scmp.eq.s32.totalorder %s2584_s13, 0 }
   0xb   : > { %s2600_s18 = scalar_select %p45_p1, %s2535_s11, %s47_s16  }
   0xc   : > { %p2602_p5 = por %p55_p2, %p54_p0  ;;  %p2608_p6 = por %p4832_p4, %p60_p3 }
   0xd   : > { %p84_p7 = scmp.eq.s32.totalorder %s2584_s13, 1  ;;  %p90_p8 = scmp.eq.s32.totalorder %s2347_s14, 1 }
   0xe   : > { %p2348_p9 = scmp.ge.s32.totalorder %s2539_s12, 1  ;;  %p97_p10 = scmp.lt.s32.totalorder %s2539_s12, 3 }
   0xf   : > { %p2615_p11 = por %p84_p7, %p54_p0  ;;  %p2619_p12 = por %p90_p8, %p60_p3 }
  0x10   : > { %p2623_p13 = pnand %p2348_p9, %p97_p10  ;;  %s2428_s26 = scalar_lea.hbm %s4828_s0, 16 }
  0x11   : > { %s4835_s21 = scalar_select %p2615_p11, 1, 0 }
  0x12   : > { %s4836_s22 = scalar_select %p2619_p12, 1, 0 }
  0x13   : > { %p2380_p1 = pneg %p2623_p13  ;;  %p2429_p0 = scmp.ne.s32.totalorder %s4828_s0, %s2428_s26 }
  0x14   : > { %p2435_p9 = scmp.lt.u32.totalorder %s2428_s26, %s4828_s0 }
  0x15   : > { %p2381_p2 = pnand %p2380_p1, %p4832_p4 }
  0x17   : > { %p2430_p3 = pneg %p2381_p2 }
  0x19   : > { %p2431_p7 = pnand %p2430_p3, %p2429_p0 }
  0x1b   : > { %p2432_p8 = pneg %p2431_p7 }
  0x1d   : > { %p2437_p10 = pnand %p2435_p9, %p2432_p8 }
  0x1f   : > { %2440 = shalt.err (!%p2437_p10)
}
  0x20   : > { %s2541_s3 = smov [#allocation2]   ;;  %p4831_p1 = scmp.ge.s32.totalorder %s2539_s12, 2 }
  0x21   : > { %2383 = dma.hbm_to_smem (!%p2381_p2), %s4828_s0, 16, %s2541_s3, [#allocation5]  }
  0x22   : > { %115 = sbr.rel (%p4831_p1) target bundleno = 76 (0x4c), region = 20 }
  0x29   : > { %118 = sbr.rel (!%p2602_p5) target bundleno = 76 (0x4c), region = 24  ;;  %s119_s6 = sand.u32 (%p2602_p5), 1, %s2535_s11  }
  0x2a   : > { %s2352_s7 = sshll.u32 (%p2602_p5), %s2539_s12, 9  ;;  %s2351_s8 = sshll.u32 (%p2602_p5), %s119_s6, 12 }
  0x2b   : > { %s125_s14 = ssub.s32 (%p2602_p5), 513, %s2352_s7  ;;  %s2653_s24 = scalar_lea.sflag (%p2602_p5), [#allocation3], %s119_s6 }
  0x2c   : > { %p126_p0 = scmp.lt.s32.totalorder (%p2602_p5), %s125_s14, 512  ;;  %s123_s25 = scalar_lea.vmem (%p2602_p5), [#allocation6], %s2351_s8 }
  0x30   : > { %s4848_s14 = smov (!%p126_p0, %s125_s14), 512 }
  0x31   : > { %s2650_s16 = sshll.u32 %s4848_s14, 7 }
  0x32   : > { %s130_s17 = ssub.s32 65536, %s2650_s16 }
  0x33   : > { %131 = vsyncadd %s2653_s24, %s130_s17  ;;  %p2354_p5 = scmp.ne.s32.totalorder %s2650_s16, 0  ;;  %s2372_s19 = sshll.u32 %s2539_s12, 16 }
  0x34   : > { %s2661_s28 = scalar_lea.hbm %s4829_s1, %s2372_s19  ;;  %s136_s29 = sshll.u32 %s123_s25, 4  ;;  %s2663_s29 = int_to_ptr.vmem [resolvable:$true] %s136_s29 }
  0x35   : > { %s2441_s30 = scalar_lea.hbm %s2661_s28, %s2650_s16  ;;  %s2445_s5 = scalar_lea.hbm %s4829_s1, 65664 }
  0x36   : > { %p2442_p2 = scmp.ne.s32.totalorder %s2661_s28, %s2441_s30  ;;  %p2446_p8 = scmp.lt.u32.totalorder %s2661_s28, %s4829_s1 }
  0x37   : > { %p2447_p9 = scmp.lt.u32.totalorder %s2445_s5, %s2441_s30  ;;  %p2449_p0 = scmp.lt.u32.totalorder %s2441_s30, %s2661_s28 }
  0x38   : > { %p2443_p3 = pnand %p2442_p2, %p2354_p5 }
  0x39   : > { %p2448_p10 = por %p2447_p9, %p2446_p8 }
  0x3a   : > { %p2444_p7 = pneg %p2443_p3 }
  0x3b   : > { %p2450_p1 = por %p2449_p0, %p2448_p10 }
  0x3d   : > { %p2451_p4 = pnand %p2450_p1, %p2444_p7 }
  0x3f   : > { %2454 = shalt.err (!%p2451_p4)
}
  0x40   : > { %s2455_s8 = scalar_lea.vmem %s2663_s29, %s2650_s16  ;;  %s2542_s14 = smov [#allocation6]  }
  0x41   : > { %p2456_p2 = scmp.ne.s32.totalorder %s2663_s29, %s2455_s8  ;;  %s2459_s17 = sshll.u32 %s2542_s14, 4  ;;  %s2460_s17 = int_to_ptr.vmem [resolvable:$false] %s2459_s17 }
  0x42   : > { %s2461_s25 = scalar_lea.vmem %s2460_s17, 131072  ;;  %p2462_p11 = scmp.lt.s32.totalorder %s2663_s29, %s2460_s17 }
  0x43   : > { %p2457_p3 = pnand %p2456_p2, %p2354_p5  ;;  %p2463_p8 = scmp.lt.s32.totalorder %s2461_s25, %s2455_s8 }
  0x45   : > { %p2458_p12 = pneg %p2457_p3  ;;  %p2464_p9 = por %p2463_p8, %p2462_p11 }
  0x47   : > { %p2465_p10 = pnand %p2464_p9, %p2458_p12 }
  0x49   : > { %2468 = shalt.err (!%p2465_p10)
}
  0x4a   : > { %s2543_s19 = smov 128   ;;  %s2544_s26 = smov 8  }
  0x4b   : > { %142 = dma.hbm_to_vmem [thread:$0]  (%p2354_p5), %s2661_s28, %s2650_s16, %s2663_s29, %s2653_s24, %s2543_s19, %s2543_s19, %s2544_s26  }
  0x4c PF: > { %148 = sbr.rel (%p2623_p13) target bundleno = 447 (0x1bf), region = 28  ;;  %p4838_p4 = scmp.eq.s32.totalorder (!%p2623_p13), %s2584_s13, 0 }
  0x53   : > { %2514 = dma.done.wait (%p4838_p4), [#allocation5], 16   ;;  %p4839_p11 = pmov %p4838_p4 }
  0x54   : > { %s2697_s27 = sand.u32 1, %s2531_s10  }
  0x55   : > { %2516 = vsyncadd (%p4839_p11), [#allocation5], 4294967280  ;;  %s2360_s30 = sshll.u32 %s2697_s27, 12  ;;  %s155_s16 = scalar_lea.sflag [#allocation3], %s2697_s27 }
  0x56   : > { %s2703_s24 = scalar_lea.vmem [#allocation6], %s2360_s30 }
  0x57   : > { %2518 = dma.done.wait (%p2608_p6), %s155_s16, 65536  }
  0x58   : > { %2520 = vsyncadd (%p2608_p6), %s155_s16, 4294901760 }
  0x59   : > { %163 = sfence }
  0x5a   : > { %s190_s23 = sld [smem:[#allocation2]]  ;;  %s2362_s28 = sld [smem:[#allocation2 + $0x1]]  ;;  %v192_v0 = vld [vmem:[%s2703_s24] sm:$0xff]  ;;  %v193_v1 = vld [vmem:[%s2703_s24 + $0x8] sm:$0xff]  ;;  %v194_v2 = vld [vmem:[%s2703_s24 + $0x10] sm:$0xff] }
  0x5b   : > { %v195_v3 = vld [vmem:[%s2703_s24 + $0x18] sm:$0xff]  ;;  %v196_v4 = vld [vmem:[%s2703_s24 + $0x20] sm:$0xff]  ;;  %v197_v5 = vld [vmem:[%s2703_s24 + $0x28] sm:$0xff]  ;;  %s2746_s20 = scalar_lea.vmem [#allocation7], %s2360_s30  ;;  %s2243_s29 = scalar_lea.sflag [#allocation4], %s2697_s27 }
  0x5c   : > { %v198_v6 = vld [vmem:[%s2703_s24 + $0x30] sm:$0xff]  ;;  %v199_v8 = vld [vmem:[%s2703_s24 + $0x38] sm:$0xff]  ;;  %v200_v13 = vld [vmem:[%s2703_s24 + $0x40] sm:$0xff]  ;;  %p4840_p6 = scmp.ne.s32.totalorder %s4835_s21, 0 }
  0x5d   : > { %v201_v18 = vld [vmem:[%s2703_s24 + $0x48] sm:$0xff]  ;;  %v202_v19 = vld [vmem:[%s2703_s24 + $0x50] sm:$0xff]  ;;  %v203_v20 = vld [vmem:[%s2703_s24 + $0x58] sm:$0xff]  ;;  %s2364_s3 = sshll.u32 (%p4840_p6), %s2584_s13, 9 }
  0x5e   : > { %v204_v25 = vld [vmem:[%s2703_s24 + $0x60] sm:$0xff]  ;;  %v205_v26 = vld [vmem:[%s2703_s24 + $0x68] sm:$0xff]  ;;  %v206_v27 = vld [vmem:[%s2703_s24 + $0x70] sm:$0xff]  ;;  %s2251_s4 = ssub.s32 (%p4840_p6), 513, %s2364_s3 }
  0x5f   : > { %v207_v32 = vld [vmem:[%s2703_s24 + $0x78] sm:$0xff]  ;;  %v208_v37 = vld [vmem:[%s2703_s24 + $0x80] sm:$0xff]  ;;  %v209_v42 = vld [vmem:[%s2703_s24 + $0x88] sm:$0xff]  ;;  %p2252_p12 = scmp.lt.s32.totalorder (%p4840_p6), %s2251_s4, 512 }
  0x60   : > { %v2716_v7 = vstv %s190_s23  ;;  %v2720_v10 = vstv %s2362_s28  ;;  %v210_v43 = vld [vmem:[%s2703_s24 + $0x90] sm:$0xff]  ;;  %v211_v44 = vld [vmem:[%s2703_s24 + $0x98] sm:$0xff] }
  0x61   : > { %v705_v9 = vmul.f32 %v2716_v7, %v192_v0  ;;  %v706_v11 = vmul.f32 %v2716_v7, %v193_v1  ;;  %v707_v12 = vmul.f32 %v2716_v7, %v194_v2  ;;  %v708_v14 = vmul.f32 %v2716_v7, %v195_v3  ;;  %v212_v49 = vld [vmem:[%s2703_s24 + $0xa0] sm:$0xff]  ;;  %v213_v50 = vld [vmem:[%s2703_s24 + $0xa8] sm:$0xff]  ;;  %v214_v51 = vld [vmem:[%s2703_s24 + $0xb0] sm:$0xff] }
  0x62   : > { %v709_v15 = vmul.f32 %v2716_v7, %v196_v4  ;;  %v710_v16 = vmul.f32 %v2716_v7, %v197_v5  ;;  %v711_v17 = vmul.f32 %v2716_v7, %v198_v6  ;;  %v712_v24 = vmul.f32 %v2716_v7, %v199_v8  ;;  %v215_v56 = vld [vmem:[%s2703_s24 + $0xb8] sm:$0xff]  ;;  %v216_v61 = vld [vmem:[%s2703_s24 + $0xc0] sm:$0xff]  ;;  %v217_v2 = vld [vmem:[%s2703_s24 + $0xc8] sm:$0xff] }
  0x63   : > { %v1218_v21 = vadd.f32 %v2720_v10, %v705_v9  ;;  %v1219_v22 = vadd.f32 %v2720_v10, %v706_v11  ;;  %v1220_v23 = vadd.f32 %v2720_v10, %v707_v12  ;;  %v1221_v28 = vadd.f32 %v2720_v10, %v708_v14  ;;  %v218_v3 = vld [vmem:[%s2703_s24 + $0xd0] sm:$0xff]  ;;  %v219_v4 = vld [vmem:[%s2703_s24 + $0xd8] sm:$0xff]  ;;  %v220_v11 = vld [vmem:[%s2703_s24 + $0xe0] sm:$0xff] }
  0x64   : > { %v1222_v29 = vadd.f32 %v2720_v10, %v709_v15  ;;  %v1223_v30 = vadd.f32 %v2720_v10, %v710_v16  ;;  %v1224_v31 = vadd.f32 %v2720_v10, %v711_v17  ;;  %v1225_v33 = vadd.f32 %v2720_v10, %v712_v24  ;;  %v221_v12 = vld [vmem:[%s2703_s24 + $0xe8] sm:$0xff] }
  0x65   : > { %1730 = vst [vmem:[%s2746_s20] sm:$0xff] %v1218_v21  ;;  %1731 = vst [vmem:[%s2746_s20 + $0x8] sm:$0xff] %v1219_v22  ;;  %v713_v34 = vmul.f32 %v2716_v7, %v200_v13  ;;  %v714_v35 = vmul.f32 %v2716_v7, %v201_v18  ;;  %v715_v36 = vmul.f32 %v2716_v7, %v202_v19  ;;  %v222_v13 = vld [vmem:[%s2703_s24 + $0xf0] sm:$0xff]  ;;  %v223_v18 = vld [vmem:[%s2703_s24 + $0xf8] sm:$0xff] }
  0x66   : > { %1732 = vst [vmem:[%s2746_s20 + $0x10] sm:$0xff] %v1220_v23  ;;  %1733 = vst [vmem:[%s2746_s20 + $0x18] sm:$0xff] %v1221_v28  ;;  %v716_v38 = vmul.f32 %v2716_v7, %v203_v20  ;;  %v717_v39 = vmul.f32 %v2716_v7, %v204_v25  ;;  %v718_v40 = vmul.f32 %v2716_v7, %v205_v26  ;;  %v224_v23 = vld [vmem:[%s2703_s24 + $0x100] sm:$0xff]  ;;  %v225_v28 = vld [vmem:[%s2703_s24 + $0x108] sm:$0xff] }
  0x67   : > { %1734 = vst [vmem:[%s2746_s20 + $0x20] sm:$0xff] %v1222_v29  ;;  %1735 = vst [vmem:[%s2746_s20 + $0x28] sm:$0xff] %v1223_v30  ;;  %v719_v41 = vmul.f32 %v2716_v7, %v206_v27  ;;  %v1226_v45 = vadd.f32 %v2720_v10, %v713_v34  ;;  %v1227_v46 = vadd.f32 %v2720_v10, %v714_v35  ;;  %v226_v29 = vld [vmem:[%s2703_s24 + $0x110] sm:$0xff]  ;;  %v227_v30 = vld [vmem:[%s2703_s24 + $0x118] sm:$0xff] }
  0x68   : > { %1736 = vst [vmem:[%s2746_s20 + $0x30] sm:$0xff] %v1224_v31  ;;  %1737 = vst [vmem:[%s2746_s20 + $0x38] sm:$0xff] %v1225_v33  ;;  %v1228_v47 = vadd.f32 %v2720_v10, %v715_v36  ;;  %v720_v48 = vmul.f32 %v2716_v7, %v207_v32  ;;  %v1229_v52 = vadd.f32 %v2720_v10, %v716_v38  ;;  %v228_v35 = vld [vmem:[%s2703_s24 + $0x120] sm:$0xff]  ;;  %v229_v36 = vld [vmem:[%s2703_s24 + $0x128] sm:$0xff] }
  0x69   : > { %v1230_v53 = vadd.f32 %v2720_v10, %v717_v39  ;;  %v1231_v54 = vadd.f32 %v2720_v10, %v718_v40  ;;  %v1232_v55 = vadd.f32 %v2720_v10, %v719_v41  ;;  %1738 = vst [vmem:[%s2746_s20 + $0x40] sm:$0xff] %v1226_v45  ;;  %1739 = vst [vmem:[%s2746_s20 + $0x48] sm:$0xff] %v1227_v46 }
  0x6a   : > { %1740 = vst [vmem:[%s2746_s20 + $0x50] sm:$0xff] %v1228_v47  ;;  %v1233_v57 = vadd.f32 %v2720_v10, %v720_v48  ;;  %v721_v58 = vmul.f32 %v2716_v7, %v208_v37  ;;  %v722_v59 = vmul.f32 %v2716_v7, %v209_v42  ;;  %v723_v60 = vmul.f32 %v2716_v7, %v210_v43  ;;  %v230_v37 = vld [vmem:[%s2703_s24 + $0x130] sm:$0xff]  ;;  %v231_v42 = vld [vmem:[%s2703_s24 + $0x138] sm:$0xff]  ;;  %v232_v47 = vld [vmem:[%s2703_s24 + $0x140] sm:$0xff] }
  0x6b   : > { %1741 = vst [vmem:[%s2746_s20 + $0x58] sm:$0xff] %v1229_v52  ;;  %1742 = vst [vmem:[%s2746_s20 + $0x60] sm:$0xff] %v1230_v53  ;;  %v724_v62 = vmul.f32 %v2716_v7, %v211_v44  ;;  %v725_v63 = vmul.f32 %v2716_v7, %v212_v49  ;;  %v726_v0 = vmul.f32 %v2716_v7, %v213_v50  ;;  %v233_v52 = vld [vmem:[%s2703_s24 + $0x148] sm:$0xff]  ;;  %v234_v53 = vld [vmem:[%s2703_s24 + $0x150] sm:$0xff] }
  0x6c   : > { %1743 = vst [vmem:[%s2746_s20 + $0x68] sm:$0xff] %v1231_v54  ;;  %1744 = vst [vmem:[%s2746_s20 + $0x70] sm:$0xff] %v1232_v55  ;;  %v727_v1 = vmul.f32 %v2716_v7, %v214_v51  ;;  %v1234_v5 = vadd.f32 %v2720_v10, %v721_v58  ;;  %v1235_v6 = vadd.f32 %v2720_v10, %v722_v59  ;;  %v235_v54 = vld [vmem:[%s2703_s24 + $0x158] sm:$0xff]  ;;  %v236_v59 = vld [vmem:[%s2703_s24 + $0x160] sm:$0xff] }
  0x6d   : > { %1745 = vst [vmem:[%s2746_s20 + $0x78] sm:$0xff] %v1233_v57  ;;  %v1236_v8 = vadd.f32 %v2720_v10, %v723_v60  ;;  %v728_v9 = vmul.f32 %v2716_v7, %v215_v56  ;;  %v1237_v14 = vadd.f32 %v2720_v10, %v724_v62  ;;  %v1238_v15 = vadd.f32 %v2720_v10, %v725_v63  ;;  %v237_v60 = vld [vmem:[%s2703_s24 + $0x168] sm:$0xff] }
  0x6e   : > { %v1239_v16 = vadd.f32 %v2720_v10, %v726_v0  ;;  %v1240_v17 = vadd.f32 %v2720_v10, %v727_v1  ;;  %1746 = vst [vmem:[%s2746_s20 + $0x80] sm:$0xff] %v1234_v5  ;;  %1747 = vst [vmem:[%s2746_s20 + $0x88] sm:$0xff] %v1235_v6  ;;  %v729_v20 = vmul.f32 %v2716_v7, %v216_v61  ;;  %v238_v61 = vld [vmem:[%s2703_s24 + $0x170] sm:$0xff] }
  0x6f   : > { %1748 = vst [vmem:[%s2746_s20 + $0x90] sm:$0xff] %v1236_v8  ;;  %v1241_v19 = vadd.f32 %v2720_v10, %v728_v9  ;;  %v730_v21 = vmul.f32 %v2716_v7, %v217_v2  ;;  %v731_v22 = vmul.f32 %v2716_v7, %v218_v3  ;;  %1749 = vst [vmem:[%s2746_s20 + $0x98] sm:$0xff] %v1237_v14  ;;  %v239_v2 = vld [vmem:[%s2703_s24 + $0x178] sm:$0xff]  ;;  %v240_v8 = vld [vmem:[%s2703_s24 + $0x180] sm:$0xff] }
  0x70   : > { %1750 = vst [vmem:[%s2746_s20 + $0xa0] sm:$0xff] %v1238_v15  ;;  %1751 = vst [vmem:[%s2746_s20 + $0xa8] sm:$0xff] %v1239_v16  ;;  %v732_v24 = vmul.f32 %v2716_v7, %v219_v4  ;;  %v733_v25 = vmul.f32 %v2716_v7, %v220_v11  ;;  %v734_v26 = vmul.f32 %v2716_v7, %v221_v12  ;;  %v241_v14 = vld [vmem:[%s2703_s24 + $0x188] sm:$0xff]  ;;  %v242_v15 = vld [vmem:[%s2703_s24 + $0x190] sm:$0xff] }
  0x71   : > { %1752 = vst [vmem:[%s2746_s20 + $0xb0] sm:$0xff] %v1240_v17  ;;  %v735_v27 = vmul.f32 %v2716_v7, %v222_v13  ;;  %1753 = vst [vmem:[%s2746_s20 + $0xb8] sm:$0xff] %v1241_v19  ;;  %v1242_v31 = vadd.f32 %v2720_v10, %v729_v20  ;;  %v1243_v32 = vadd.f32 %v2720_v10, %v730_v21  ;;  %v243_v16 = vld [vmem:[%s2703_s24 + $0x198] sm:$0xff]  ;;  %v244_v21 = vld [vmem:[%s2703_s24 + $0x1a0] sm:$0xff] }
  0x72   : > { %v1244_v33 = vadd.f32 %v2720_v10, %v731_v22  ;;  %v736_v34 = vmul.f32 %v2716_v7, %v223_v18  ;;  %v1245_v38 = vadd.f32 %v2720_v10, %v732_v24  ;;  %v1246_v39 = vadd.f32 %v2720_v10, %v733_v25  ;;  %v245_v22 = vld [vmem:[%s2703_s24 + $0x1a8] sm:$0xff] }
  0x73   : > { %v1247_v40 = vadd.f32 %v2720_v10, %v734_v26  ;;  %v1248_v41 = vadd.f32 %v2720_v10, %v735_v27  ;;  %1754 = vst [vmem:[%s2746_s20 + $0xc0] sm:$0xff] %v1242_v31  ;;  %1755 = vst [vmem:[%s2746_s20 + $0xc8] sm:$0xff] %v1243_v32  ;;  %v737_v44 = vmul.f32 %v2716_v7, %v224_v23  ;;  %v246_v23 = vld [vmem:[%s2703_s24 + $0x1b0] sm:$0xff] }
  0x74   : > { %1756 = vst [vmem:[%s2746_s20 + $0xd0] sm:$0xff] %v1244_v33  ;;  %v1249_v43 = vadd.f32 %v2720_v10, %v736_v34  ;;  %v738_v45 = vmul.f32 %v2716_v7, %v225_v28  ;;  %v739_v46 = vmul.f32 %v2716_v7, %v226_v29  ;;  %1757 = vst [vmem:[%s2746_s20 + $0xd8] sm:$0xff] %v1245_v38  ;;  %v247_v28 = vld [vmem:[%s2703_s24 + $0x1b8] sm:$0xff]  ;;  %v248_v33 = vld [vmem:[%s2703_s24 + $0x1c0] sm:$0xff] }
  0x75   : > { %1758 = vst [vmem:[%s2746_s20 + $0xe0] sm:$0xff] %v1246_v39  ;;  %1759 = vst [vmem:[%s2746_s20 + $0xe8] sm:$0xff] %v1247_v40  ;;  %v740_v48 = vmul.f32 %v2716_v7, %v227_v30  ;;  %v741_v49 = vmul.f32 %v2716_v7, %v228_v35  ;;  %v742_v50 = vmul.f32 %v2716_v7, %v229_v36  ;;  %v249_v38 = vld [vmem:[%s2703_s24 + $0x1c8] sm:$0xff]  ;;  %v250_v39 = vld [vmem:[%s2703_s24 + $0x1d0] sm:$0xff] }
  0x76   : > { %1760 = vst [vmem:[%s2746_s20 + $0xf0] sm:$0xff] %v1248_v41  ;;  %v743_v51 = vmul.f32 %v2716_v7, %v230_v37  ;;  %1761 = vst [vmem:[%s2746_s20 + $0xf8] sm:$0xff] %v1249_v43  ;;  %v1250_v55 = vadd.f32 %v2720_v10, %v737_v44  ;;  %v1251_v56 = vadd.f32 %v2720_v10, %v738_v45  ;;  %v251_v40 = vld [vmem:[%s2703_s24 + $0x1d8] sm:$0xff]  ;;  %v252_v45 = vld [vmem:[%s2703_s24 + $0x1e0] sm:$0xff] }
  0x77   : > { %v1252_v57 = vadd.f32 %v2720_v10, %v739_v46  ;;  %v744_v58 = vmul.f32 %v2716_v7, %v231_v42  ;;  %v1253_v62 = vadd.f32 %v2720_v10, %v740_v48  ;;  %v1254_v63 = vadd.f32 %v2720_v10, %v741_v49  ;;  %v253_v46 = vld [vmem:[%s2703_s24 + $0x1e8] sm:$0xff] }
  0x78   : > { %v1255_v0 = vadd.f32 %v2720_v10, %v742_v50  ;;  %v1256_v1 = vadd.f32 %v2720_v10, %v743_v51  ;;  %1762 = vst [vmem:[%s2746_s20 + $0x100] sm:$0xff] %v1250_v55  ;;  %1763 = vst [vmem:[%s2746_s20 + $0x108] sm:$0xff] %v1251_v56  ;;  %v745_v4 = vmul.f32 %v2716_v7, %v232_v47  ;;  %v254_v47 = vld [vmem:[%s2703_s24 + $0x1f0] sm:$0xff] }
  0x79   : > { %1764 = vst [vmem:[%s2746_s20 + $0x110] sm:$0xff] %v1252_v57  ;;  %v1257_v3 = vadd.f32 %v2720_v10, %v744_v58  ;;  %v746_v5 = vmul.f32 %v2716_v7, %v233_v52  ;;  %v747_v6 = vmul.f32 %v2716_v7, %v234_v53  ;;  %1765 = vst [vmem:[%s2746_s20 + $0x118] sm:$0xff] %v1253_v62  ;;  %v255_v52 = vld [vmem:[%s2703_s24 + $0x1f8] sm:$0xff]  ;;  %v256_v57 = vld [vmem:[%s2703_s24 + $0x200] sm:$0xff] }
  0x7a   : > { %1766 = vst [vmem:[%s2746_s20 + $0x120] sm:$0xff] %v1254_v63  ;;  %1767 = vst [vmem:[%s2746_s20 + $0x128] sm:$0xff] %v1255_v0  ;;  %v748_v9 = vmul.f32 %v2716_v7, %v235_v54  ;;  %v749_v11 = vmul.f32 %v2716_v7, %v236_v59  ;;  %v750_v12 = vmul.f32 %v2716_v7, %v237_v60  ;;  %v257_v62 = vld [vmem:[%s2703_s24 + $0x208] sm:$0xff]  ;;  %v258_v63 = vld [vmem:[%s2703_s24 + $0x210] sm:$0xff] }
  0x7b   : > { %1768 = vst [vmem:[%s2746_s20 + $0x130] sm:$0xff] %v1256_v1  ;;  %v751_v13 = vmul.f32 %v2716_v7, %v238_v61  ;;  %1769 = vst [vmem:[%s2746_s20 + $0x138] sm:$0xff] %v1257_v3  ;;  %v1258_v17 = vadd.f32 %v2720_v10, %v745_v4  ;;  %v1259_v18 = vadd.f32 %v2720_v10, %v746_v5  ;;  %v259_v0 = vld [vmem:[%s2703_s24 + $0x218] sm:$0xff]  ;;  %v260_v5 = vld [vmem:[%s2703_s24 + $0x220] sm:$0xff] }
  0x7c   : > { %v1260_v19 = vadd.f32 %v2720_v10, %v747_v6  ;;  %v752_v20 = vmul.f32 %v2716_v7, %v239_v2  ;;  %v1261_v24 = vadd.f32 %v2720_v10, %v748_v9  ;;  %v1262_v25 = vadd.f32 %v2720_v10, %v749_v11  ;;  %v261_v6 = vld [vmem:[%s2703_s24 + $0x228] sm:$0xff] }
  0x7d   : > { %v1263_v26 = vadd.f32 %v2720_v10, %v750_v12  ;;  %v1264_v27 = vadd.f32 %v2720_v10, %v751_v13  ;;  %1770 = vst [vmem:[%s2746_s20 + $0x140] sm:$0xff] %v1258_v17  ;;  %1771 = vst [vmem:[%s2746_s20 + $0x148] sm:$0xff] %v1259_v18  ;;  %v753_v30 = vmul.f32 %v2716_v7, %v240_v8  ;;  %v262_v8 = vld [vmem:[%s2703_s24 + $0x230] sm:$0xff] }
  0x7e   : > { %1772 = vst [vmem:[%s2746_s20 + $0x150] sm:$0xff] %v1260_v19  ;;  %v1265_v29 = vadd.f32 %v2720_v10, %v752_v20  ;;  %v754_v31 = vmul.f32 %v2716_v7, %v241_v14  ;;  %v755_v32 = vmul.f32 %v2716_v7, %v242_v15  ;;  %1773 = vst [vmem:[%s2746_s20 + $0x158] sm:$0xff] %v1261_v24  ;;  %v263_v14 = vld [vmem:[%s2703_s24 + $0x238] sm:$0xff]  ;;  %v264_v19 = vld [vmem:[%s2703_s24 + $0x240] sm:$0xff] }
  0x7f   : > { %1774 = vst [vmem:[%s2746_s20 + $0x160] sm:$0xff] %v1262_v25  ;;  %1775 = vst [vmem:[%s2746_s20 + $0x168] sm:$0xff] %v1263_v26  ;;  %v756_v34 = vmul.f32 %v2716_v7, %v243_v16  ;;  %v757_v35 = vmul.f32 %v2716_v7, %v244_v21  ;;  %v758_v36 = vmul.f32 %v2716_v7, %v245_v22  ;;  %v265_v24 = vld [vmem:[%s2703_s24 + $0x248] sm:$0xff]  ;;  %v266_v25 = vld [vmem:[%s2703_s24 + $0x250] sm:$0xff] }
  0x80   : > { %1776 = vst [vmem:[%s2746_s20 + $0x170] sm:$0xff] %v1264_v27  ;;  %v759_v37 = vmul.f32 %v2716_v7, %v246_v23  ;;  %1777 = vst [vmem:[%s2746_s20 + $0x178] sm:$0xff] %v1265_v29  ;;  %v1266_v41 = vadd.f32 %v2720_v10, %v753_v30  ;;  %v1267_v42 = vadd.f32 %v2720_v10, %v754_v31  ;;  %v267_v26 = vld [vmem:[%s2703_s24 + $0x258] sm:$0xff]  ;;  %v268_v31 = vld [vmem:[%s2703_s24 + $0x260] sm:$0xff] }
  0x81   : > { %v1268_v43 = vadd.f32 %v2720_v10, %v755_v32  ;;  %v760_v44 = vmul.f32 %v2716_v7, %v247_v28  ;;  %v1269_v48 = vadd.f32 %v2720_v10, %v756_v34  ;;  %v1270_v49 = vadd.f32 %v2720_v10, %v757_v35  ;;  %v269_v32 = vld [vmem:[%s2703_s24 + $0x268] sm:$0xff] }
  0x82   : > { %v1271_v50 = vadd.f32 %v2720_v10, %v758_v36  ;;  %v1272_v51 = vadd.f32 %v2720_v10, %v759_v37  ;;  %1778 = vst [vmem:[%s2746_s20 + $0x180] sm:$0xff] %v1266_v41  ;;  %1779 = vst [vmem:[%s2746_s20 + $0x188] sm:$0xff] %v1267_v42  ;;  %v761_v54 = vmul.f32 %v2716_v7, %v248_v33  ;;  %v270_v33 = vld [vmem:[%s2703_s24 + $0x270] sm:$0xff] }
  0x83   : > { %1780 = vst [vmem:[%s2746_s20 + $0x190] sm:$0xff] %v1268_v43  ;;  %v1273_v53 = vadd.f32 %v2720_v10, %v760_v44  ;;  %v762_v55 = vmul.f32 %v2716_v7, %v249_v38  ;;  %v763_v56 = vmul.f32 %v2716_v7, %v250_v39  ;;  %1781 = vst [vmem:[%s2746_s20 + $0x198] sm:$0xff] %v1269_v48  ;;  %v271_v38 = vld [vmem:[%s2703_s24 + $0x278] sm:$0xff]  ;;  %v272_v43 = vld [vmem:[%s2703_s24 + $0x280] sm:$0xff] }
  0x84   : > { %1782 = vst [vmem:[%s2746_s20 + $0x1a0] sm:$0xff] %v1270_v49  ;;  %1783 = vst [vmem:[%s2746_s20 + $0x1a8] sm:$0xff] %v1271_v50  ;;  %v764_v58 = vmul.f32 %v2716_v7, %v251_v40  ;;  %v765_v59 = vmul.f32 %v2716_v7, %v252_v45  ;;  %v766_v60 = vmul.f32 %v2716_v7, %v253_v46  ;;  %v273_v48 = vld [vmem:[%s2703_s24 + $0x288] sm:$0xff]  ;;  %v274_v49 = vld [vmem:[%s2703_s24 + $0x290] sm:$0xff] }
  0x85   : > { %1784 = vst [vmem:[%s2746_s20 + $0x1b0] sm:$0xff] %v1272_v51  ;;  %v767_v61 = vmul.f32 %v2716_v7, %v254_v47  ;;  %1785 = vst [vmem:[%s2746_s20 + $0x1b8] sm:$0xff] %v1273_v53  ;;  %v1274_v1 = vadd.f32 %v2720_v10, %v761_v54  ;;  %v1275_v2 = vadd.f32 %v2720_v10, %v762_v55  ;;  %v275_v50 = vld [vmem:[%s2703_s24 + $0x298] sm:$0xff]  ;;  %v276_v55 = vld [vmem:[%s2703_s24 + $0x2a0] sm:$0xff] }
  0x86   : > { %v1276_v3 = vadd.f32 %v2720_v10, %v763_v56  ;;  %v768_v4 = vmul.f32 %v2716_v7, %v255_v52  ;;  %v1277_v9 = vadd.f32 %v2720_v10, %v764_v58  ;;  %v1278_v11 = vadd.f32 %v2720_v10, %v765_v59  ;;  %v277_v56 = vld [vmem:[%s2703_s24 + $0x2a8] sm:$0xff] }
  0x87   : > { %v1279_v12 = vadd.f32 %v2720_v10, %v766_v60  ;;  %v1280_v13 = vadd.f32 %v2720_v10, %v767_v61  ;;  %1786 = vst [vmem:[%s2746_s20 + $0x1c0] sm:$0xff] %v1274_v1  ;;  %1787 = vst [vmem:[%s2746_s20 + $0x1c8] sm:$0xff] %v1275_v2  ;;  %v769_v16 = vmul.f32 %v2716_v7, %v256_v57  ;;  %v278_v57 = vld [vmem:[%s2703_s24 + $0x2b0] sm:$0xff] }
  0x88   : > { %1788 = vst [vmem:[%s2746_s20 + $0x1d0] sm:$0xff] %v1276_v3  ;;  %v1281_v15 = vadd.f32 %v2720_v10, %v768_v4  ;;  %v770_v17 = vmul.f32 %v2716_v7, %v257_v62  ;;  %v771_v18 = vmul.f32 %v2716_v7, %v258_v63  ;;  %1789 = vst [vmem:[%s2746_s20 + $0x1d8] sm:$0xff] %v1277_v9  ;;  %v279_v62 = vld [vmem:[%s2703_s24 + $0x2b8] sm:$0xff]  ;;  %v280_v3 = vld [vmem:[%s2703_s24 + $0x2c0] sm:$0xff] }
  0x89   : > { %1790 = vst [vmem:[%s2746_s20 + $0x1e0] sm:$0xff] %v1278_v11  ;;  %1791 = vst [vmem:[%s2746_s20 + $0x1e8] sm:$0xff] %v1279_v12  ;;  %v772_v20 = vmul.f32 %v2716_v7, %v259_v0  ;;  %v773_v21 = vmul.f32 %v2716_v7, %v260_v5  ;;  %v774_v22 = vmul.f32 %v2716_v7, %v261_v6  ;;  %v281_v9 = vld [vmem:[%s2703_s24 + $0x2c8] sm:$0xff]  ;;  %v282_v11 = vld [vmem:[%s2703_s24 + $0x2d0] sm:$0xff] }
  0x8a   : > { %1792 = vst [vmem:[%s2746_s20 + $0x1f0] sm:$0xff] %v1280_v13  ;;  %v775_v23 = vmul.f32 %v2716_v7, %v262_v8  ;;  %1793 = vst [vmem:[%s2746_s20 + $0x1f8] sm:$0xff] %v1281_v15  ;;  %v1282_v27 = vadd.f32 %v2720_v10, %v769_v16  ;;  %v1283_v28 = vadd.f32 %v2720_v10, %v770_v17  ;;  %v283_v12 = vld [vmem:[%s2703_s24 + $0x2d8] sm:$0xff]  ;;  %v284_v17 = vld [vmem:[%s2703_s24 + $0x2e0] sm:$0xff] }
  0x8b   : > { %v1284_v29 = vadd.f32 %v2720_v10, %v771_v18  ;;  %v776_v30 = vmul.f32 %v2716_v7, %v263_v14  ;;  %v1285_v34 = vadd.f32 %v2720_v10, %v772_v20  ;;  %v1286_v35 = vadd.f32 %v2720_v10, %v773_v21  ;;  %v285_v18 = vld [vmem:[%s2703_s24 + $0x2e8] sm:$0xff] }
  0x8c   : > { %v1287_v36 = vadd.f32 %v2720_v10, %v774_v22  ;;  %v1288_v37 = vadd.f32 %v2720_v10, %v775_v23  ;;  %1794 = vst [vmem:[%s2746_s20 + $0x200] sm:$0xff] %v1282_v27  ;;  %1795 = vst [vmem:[%s2746_s20 + $0x208] sm:$0xff] %v1283_v28  ;;  %v777_v40 = vmul.f32 %v2716_v7, %v264_v19  ;;  %v286_v19 = vld [vmem:[%s2703_s24 + $0x2f0] sm:$0xff] }
  0x8d   : > { %1796 = vst [vmem:[%s2746_s20 + $0x210] sm:$0xff] %v1284_v29  ;;  %v1289_v39 = vadd.f32 %v2720_v10, %v776_v30  ;;  %v778_v41 = vmul.f32 %v2716_v7, %v265_v24  ;;  %v779_v42 = vmul.f32 %v2716_v7, %v266_v25  ;;  %1797 = vst [vmem:[%s2746_s20 + $0x218] sm:$0xff] %v1285_v34  ;;  %v287_v24 = vld [vmem:[%s2703_s24 + $0x2f8] sm:$0xff]  ;;  %v288_v29 = vld [vmem:[%s2703_s24 + $0x300] sm:$0xff] }
  0x8e   : > { %1798 = vst [vmem:[%s2746_s20 + $0x220] sm:$0xff] %v1286_v35  ;;  %1799 = vst [vmem:[%s2746_s20 + $0x228] sm:$0xff] %v1287_v36  ;;  %v780_v44 = vmul.f32 %v2716_v7, %v267_v26  ;;  %v781_v45 = vmul.f32 %v2716_v7, %v268_v31  ;;  %v782_v46 = vmul.f32 %v2716_v7, %v269_v32  ;;  %v289_v34 = vld [vmem:[%s2703_s24 + $0x308] sm:$0xff]  ;;  %v290_v35 = vld [vmem:[%s2703_s24 + $0x310] sm:$0xff] }
  0x8f   : > { %1800 = vst [vmem:[%s2746_s20 + $0x230] sm:$0xff] %v1288_v37  ;;  %v783_v47 = vmul.f32 %v2716_v7, %v270_v33  ;;  %1801 = vst [vmem:[%s2746_s20 + $0x238] sm:$0xff] %v1289_v39  ;;  %v1290_v51 = vadd.f32 %v2720_v10, %v777_v40  ;;  %v1291_v52 = vadd.f32 %v2720_v10, %v778_v41  ;;  %v291_v36 = vld [vmem:[%s2703_s24 + $0x318] sm:$0xff]  ;;  %v292_v41 = vld [vmem:[%s2703_s24 + $0x320] sm:$0xff] }
  0x90   : > { %v1292_v53 = vadd.f32 %v2720_v10, %v779_v42  ;;  %v784_v54 = vmul.f32 %v2716_v7, %v271_v38  ;;  %v1293_v58 = vadd.f32 %v2720_v10, %v780_v44  ;;  %v1294_v59 = vadd.f32 %v2720_v10, %v781_v45  ;;  %v293_v42 = vld [vmem:[%s2703_s24 + $0x328] sm:$0xff] }
  0x91   : > { %v1295_v60 = vadd.f32 %v2720_v10, %v782_v46  ;;  %v1296_v61 = vadd.f32 %v2720_v10, %v783_v47  ;;  %1802 = vst [vmem:[%s2746_s20 + $0x240] sm:$0xff] %v1290_v51  ;;  %1803 = vst [vmem:[%s2746_s20 + $0x248] sm:$0xff] %v1291_v52  ;;  %v785_v0 = vmul.f32 %v2716_v7, %v272_v43  ;;  %v294_v43 = vld [vmem:[%s2703_s24 + $0x330] sm:$0xff] }
  0x92   : > { %1804 = vst [vmem:[%s2746_s20 + $0x250] sm:$0xff] %v1292_v53  ;;  %v1297_v63 = vadd.f32 %v2720_v10, %v784_v54  ;;  %v786_v1 = vmul.f32 %v2716_v7, %v273_v48  ;;  %v787_v2 = vmul.f32 %v2716_v7, %v274_v49  ;;  %1805 = vst [vmem:[%s2746_s20 + $0x258] sm:$0xff] %v1293_v58  ;;  %v295_v48 = vld [vmem:[%s2703_s24 + $0x338] sm:$0xff]  ;;  %v296_v53 = vld [vmem:[%s2703_s24 + $0x340] sm:$0xff] }
  0x93   : > { %1806 = vst [vmem:[%s2746_s20 + $0x260] sm:$0xff] %v1294_v59  ;;  %1807 = vst [vmem:[%s2746_s20 + $0x268] sm:$0xff] %v1295_v60  ;;  %v788_v4 = vmul.f32 %v2716_v7, %v275_v50  ;;  %v789_v5 = vmul.f32 %v2716_v7, %v276_v55  ;;  %v790_v6 = vmul.f32 %v2716_v7, %v277_v56  ;;  %v297_v58 = vld [vmem:[%s2703_s24 + $0x348] sm:$0xff]  ;;  %v298_v59 = vld [vmem:[%s2703_s24 + $0x350] sm:$0xff] }
  0x94   : > { %1808 = vst [vmem:[%s2746_s20 + $0x270] sm:$0xff] %v1296_v61  ;;  %v791_v8 = vmul.f32 %v2716_v7, %v278_v57  ;;  %1809 = vst [vmem:[%s2746_s20 + $0x278] sm:$0xff] %v1297_v63  ;;  %v1298_v13 = vadd.f32 %v2720_v10, %v785_v0  ;;  %v1299_v14 = vadd.f32 %v2720_v10, %v786_v1  ;;  %v299_v60 = vld [vmem:[%s2703_s24 + $0x358] sm:$0xff]  ;;  %v300_v1 = vld [vmem:[%s2703_s24 + $0x360] sm:$0xff] }
  0x95   : > { %v1300_v15 = vadd.f32 %v2720_v10, %v787_v2  ;;  %v792_v16 = vmul.f32 %v2716_v7, %v279_v62  ;;  %v1301_v20 = vadd.f32 %v2720_v10, %v788_v4  ;;  %v1302_v21 = vadd.f32 %v2720_v10, %v789_v5  ;;  %v301_v2 = vld [vmem:[%s2703_s24 + $0x368] sm:$0xff] }
  0x96   : > { %v1303_v22 = vadd.f32 %v2720_v10, %v790_v6  ;;  %v1304_v23 = vadd.f32 %v2720_v10, %v791_v8  ;;  %1810 = vst [vmem:[%s2746_s20 + $0x280] sm:$0xff] %v1298_v13  ;;  %1811 = vst [vmem:[%s2746_s20 + $0x288] sm:$0xff] %v1299_v14  ;;  %v793_v26 = vmul.f32 %v2716_v7, %v280_v3  ;;  %v302_v3 = vld [vmem:[%s2703_s24 + $0x370] sm:$0xff] }
  0x97   : > { %1812 = vst [vmem:[%s2746_s20 + $0x290] sm:$0xff] %v1300_v15  ;;  %v1305_v25 = vadd.f32 %v2720_v10, %v792_v16  ;;  %v794_v27 = vmul.f32 %v2716_v7, %v281_v9  ;;  %v795_v28 = vmul.f32 %v2716_v7, %v282_v11  ;;  %1813 = vst [vmem:[%s2746_s20 + $0x298] sm:$0xff] %v1301_v20  ;;  %v303_v9 = vld [vmem:[%s2703_s24 + $0x378] sm:$0xff]  ;;  %v304_v15 = vld [vmem:[%s2703_s24 + $0x380] sm:$0xff] }
  0x98   : > { %1814 = vst [vmem:[%s2746_s20 + $0x2a0] sm:$0xff] %v1302_v21  ;;  %1815 = vst [vmem:[%s2746_s20 + $0x2a8] sm:$0xff] %v1303_v22  ;;  %v796_v30 = vmul.f32 %v2716_v7, %v283_v12  ;;  %v797_v31 = vmul.f32 %v2716_v7, %v284_v17  ;;  %v798_v32 = vmul.f32 %v2716_v7, %v285_v18  ;;  %v305_v20 = vld [vmem:[%s2703_s24 + $0x388] sm:$0xff]  ;;  %v306_v21 = vld [vmem:[%s2703_s24 + $0x390] sm:$0xff] }
  0x99   : > { %1816 = vst [vmem:[%s2746_s20 + $0x2b0] sm:$0xff] %v1304_v23  ;;  %v799_v33 = vmul.f32 %v2716_v7, %v286_v19  ;;  %1817 = vst [vmem:[%s2746_s20 + $0x2b8] sm:$0xff] %v1305_v25  ;;  %v1306_v37 = vadd.f32 %v2720_v10, %v793_v26  ;;  %v1307_v38 = vadd.f32 %v2720_v10, %v794_v27  ;;  %v307_v22 = vld [vmem:[%s2703_s24 + $0x398] sm:$0xff]  ;;  %v308_v27 = vld [vmem:[%s2703_s24 + $0x3a0] sm:$0xff] }
  0x9a   : > { %v1308_v39 = vadd.f32 %v2720_v10, %v795_v28  ;;  %v800_v40 = vmul.f32 %v2716_v7, %v287_v24  ;;  %v1309_v44 = vadd.f32 %v2720_v10, %v796_v30  ;;  %v1310_v45 = vadd.f32 %v2720_v10, %v797_v31  ;;  %v309_v28 = vld [vmem:[%s2703_s24 + $0x3a8] sm:$0xff] }
  0x9b   : > { %v1311_v46 = vadd.f32 %v2720_v10, %v798_v32  ;;  %v1312_v47 = vadd.f32 %v2720_v10, %v799_v33  ;;  %1818 = vst [vmem:[%s2746_s20 + $0x2c0] sm:$0xff] %v1306_v37  ;;  %1819 = vst [vmem:[%s2746_s20 + $0x2c8] sm:$0xff] %v1307_v38  ;;  %v801_v50 = vmul.f32 %v2716_v7, %v288_v29  ;;  %v310_v29 = vld [vmem:[%s2703_s24 + $0x3b0] sm:$0xff] }
  0x9c   : > { %1820 = vst [vmem:[%s2746_s20 + $0x2d0] sm:$0xff] %v1308_v39  ;;  %v1313_v49 = vadd.f32 %v2720_v10, %v800_v40  ;;  %v802_v51 = vmul.f32 %v2716_v7, %v289_v34  ;;  %v803_v52 = vmul.f32 %v2716_v7, %v290_v35  ;;  %1821 = vst [vmem:[%s2746_s20 + $0x2d8] sm:$0xff] %v1309_v44  ;;  %v311_v34 = vld [vmem:[%s2703_s24 + $0x3b8] sm:$0xff]  ;;  %v312_v39 = vld [vmem:[%s2703_s24 + $0x3c0] sm:$0xff] }
  0x9d   : > { %1822 = vst [vmem:[%s2746_s20 + $0x2e0] sm:$0xff] %v1310_v45  ;;  %1823 = vst [vmem:[%s2746_s20 + $0x2e8] sm:$0xff] %v1311_v46  ;;  %v804_v54 = vmul.f32 %v2716_v7, %v291_v36  ;;  %v805_v55 = vmul.f32 %v2716_v7, %v292_v41  ;;  %v806_v56 = vmul.f32 %v2716_v7, %v293_v42  ;;  %v313_v44 = vld [vmem:[%s2703_s24 + $0x3c8] sm:$0xff]  ;;  %v314_v45 = vld [vmem:[%s2703_s24 + $0x3d0] sm:$0xff] }
  0x9e   : > { %1824 = vst [vmem:[%s2746_s20 + $0x2f0] sm:$0xff] %v1312_v47  ;;  %v807_v57 = vmul.f32 %v2716_v7, %v294_v43  ;;  %1825 = vst [vmem:[%s2746_s20 + $0x2f8] sm:$0xff] %v1313_v49  ;;  %v1314_v61 = vadd.f32 %v2720_v10, %v801_v50  ;;  %v1315_v62 = vadd.f32 %v2720_v10, %v802_v51  ;;  %v315_v46 = vld [vmem:[%s2703_s24 + $0x3d8] sm:$0xff]  ;;  %v316_v51 = vld [vmem:[%s2703_s24 + $0x3e0] sm:$0xff] }
  0x9f   : > { %v1316_v63 = vadd.f32 %v2720_v10, %v803_v52  ;;  %v808_v0 = vmul.f32 %v2716_v7, %v295_v48  ;;  %v1317_v4 = vadd.f32 %v2720_v10, %v804_v54  ;;  %v1318_v5 = vadd.f32 %v2720_v10, %v805_v55  ;;  %v317_v52 = vld [vmem:[%s2703_s24 + $0x3e8] sm:$0xff] }
  0xa0   : > { %v1319_v6 = vadd.f32 %v2720_v10, %v806_v56  ;;  %v1320_v8 = vadd.f32 %v2720_v10, %v807_v57  ;;  %1826 = vst [vmem:[%s2746_s20 + $0x300] sm:$0xff] %v1314_v61  ;;  %1827 = vst [vmem:[%s2746_s20 + $0x308] sm:$0xff] %v1315_v62  ;;  %v809_v12 = vmul.f32 %v2716_v7, %v296_v53  ;;  %v318_v53 = vld [vmem:[%s2703_s24 + $0x3f0] sm:$0xff] }
  0xa1   : > { %1828 = vst [vmem:[%s2746_s20 + $0x310] sm:$0xff] %v1316_v63  ;;  %v1321_v11 = vadd.f32 %v2720_v10, %v808_v0  ;;  %v810_v13 = vmul.f32 %v2716_v7, %v297_v58  ;;  %v811_v14 = vmul.f32 %v2716_v7, %v298_v59  ;;  %1829 = vst [vmem:[%s2746_s20 + $0x318] sm:$0xff] %v1317_v4  ;;  %v319_v58 = vld [vmem:[%s2703_s24 + $0x3f8] sm:$0xff]  ;;  %v320_v63 = vld [vmem:[%s2703_s24 + $0x400] sm:$0xff] }
  0xa2   : > { %1830 = vst [vmem:[%s2746_s20 + $0x320] sm:$0xff] %v1318_v5  ;;  %1831 = vst [vmem:[%s2746_s20 + $0x328] sm:$0xff] %v1319_v6  ;;  %v812_v16 = vmul.f32 %v2716_v7, %v299_v60  ;;  %v813_v17 = vmul.f32 %v2716_v7, %v300_v1  ;;  %v814_v18 = vmul.f32 %v2716_v7, %v301_v2  ;;  %v321_v4 = vld [vmem:[%s2703_s24 + $0x408] sm:$0xff]  ;;  %v322_v5 = vld [vmem:[%s2703_s24 + $0x410] sm:$0xff] }
  0xa3   : > { %1832 = vst [vmem:[%s2746_s20 + $0x330] sm:$0xff] %v1320_v8  ;;  %v815_v19 = vmul.f32 %v2716_v7, %v302_v3  ;;  %1833 = vst [vmem:[%s2746_s20 + $0x338] sm:$0xff] %v1321_v11  ;;  %v1322_v23 = vadd.f32 %v2720_v10, %v809_v12  ;;  %v1323_v24 = vadd.f32 %v2720_v10, %v810_v13  ;;  %v323_v6 = vld [vmem:[%s2703_s24 + $0x418] sm:$0xff]  ;;  %v324_v13 = vld [vmem:[%s2703_s24 + $0x420] sm:$0xff] }
  0xa4   : > { %v1324_v25 = vadd.f32 %v2720_v10, %v811_v14  ;;  %v816_v26 = vmul.f32 %v2716_v7, %v303_v9  ;;  %v1325_v30 = vadd.f32 %v2720_v10, %v812_v16  ;;  %v1326_v31 = vadd.f32 %v2720_v10, %v813_v17  ;;  %v325_v14 = vld [vmem:[%s2703_s24 + $0x428] sm:$0xff] }
  0xa5   : > { %v1327_v32 = vadd.f32 %v2720_v10, %v814_v18  ;;  %v1328_v33 = vadd.f32 %v2720_v10, %v815_v19  ;;  %1834 = vst [vmem:[%s2746_s20 + $0x340] sm:$0xff] %v1322_v23  ;;  %1835 = vst [vmem:[%s2746_s20 + $0x348] sm:$0xff] %v1323_v24  ;;  %v817_v36 = vmul.f32 %v2716_v7, %v304_v15  ;;  %v326_v15 = vld [vmem:[%s2703_s24 + $0x430] sm:$0xff] }
  0xa6   : > { %1836 = vst [vmem:[%s2746_s20 + $0x350] sm:$0xff] %v1324_v25  ;;  %v1329_v35 = vadd.f32 %v2720_v10, %v816_v26  ;;  %v818_v37 = vmul.f32 %v2716_v7, %v305_v20  ;;  %v819_v38 = vmul.f32 %v2716_v7, %v306_v21  ;;  %1837 = vst [vmem:[%s2746_s20 + $0x358] sm:$0xff] %v1325_v30  ;;  %v327_v20 = vld [vmem:[%s2703_s24 + $0x438] sm:$0xff]  ;;  %v328_v25 = vld [vmem:[%s2703_s24 + $0x440] sm:$0xff] }
  0xa7   : > { %1838 = vst [vmem:[%s2746_s20 + $0x360] sm:$0xff] %v1326_v31  ;;  %1839 = vst [vmem:[%s2746_s20 + $0x368] sm:$0xff] %v1327_v32  ;;  %v820_v40 = vmul.f32 %v2716_v7, %v307_v22  ;;  %v821_v41 = vmul.f32 %v2716_v7, %v308_v27  ;;  %v822_v42 = vmul.f32 %v2716_v7, %v309_v28  ;;  %v329_v30 = vld [vmem:[%s2703_s24 + $0x448] sm:$0xff]  ;;  %v330_v31 = vld [vmem:[%s2703_s24 + $0x450] sm:$0xff] }
  0xa8   : > { %1840 = vst [vmem:[%s2746_s20 + $0x370] sm:$0xff] %v1328_v33  ;;  %v823_v43 = vmul.f32 %v2716_v7, %v310_v29  ;;  %1841 = vst [vmem:[%s2746_s20 + $0x378] sm:$0xff] %v1329_v35  ;;  %v1330_v47 = vadd.f32 %v2720_v10, %v817_v36  ;;  %v1331_v48 = vadd.f32 %v2720_v10, %v818_v37  ;;  %v331_v32 = vld [vmem:[%s2703_s24 + $0x458] sm:$0xff]  ;;  %v332_v37 = vld [vmem:[%s2703_s24 + $0x460] sm:$0xff] }
  0xa9   : > { %v1332_v49 = vadd.f32 %v2720_v10, %v819_v38  ;;  %v824_v50 = vmul.f32 %v2716_v7, %v311_v34  ;;  %v1333_v54 = vadd.f32 %v2720_v10, %v820_v40  ;;  %v1334_v55 = vadd.f32 %v2720_v10, %v821_v41  ;;  %v333_v38 = vld [vmem:[%s2703_s24 + $0x468] sm:$0xff] }
  0xaa   : > { %v1335_v56 = vadd.f32 %v2720_v10, %v822_v42  ;;  %v1336_v57 = vadd.f32 %v2720_v10, %v823_v43  ;;  %1842 = vst [vmem:[%s2746_s20 + $0x380] sm:$0xff] %v1330_v47  ;;  %1843 = vst [vmem:[%s2746_s20 + $0x388] sm:$0xff] %v1331_v48  ;;  %v825_v60 = vmul.f32 %v2716_v7, %v312_v39  ;;  %v334_v39 = vld [vmem:[%s2703_s24 + $0x470] sm:$0xff] }
  0xab   : > { %1844 = vst [vmem:[%s2746_s20 + $0x390] sm:$0xff] %v1332_v49  ;;  %v1337_v59 = vadd.f32 %v2720_v10, %v824_v50  ;;  %v826_v61 = vmul.f32 %v2716_v7, %v313_v44  ;;  %v827_v62 = vmul.f32 %v2716_v7, %v314_v45  ;;  %1845 = vst [vmem:[%s2746_s20 + $0x398] sm:$0xff] %v1333_v54  ;;  %v335_v44 = vld [vmem:[%s2703_s24 + $0x478] sm:$0xff]  ;;  %v336_v49 = vld [vmem:[%s2703_s24 + $0x480] sm:$0xff] }
  0xac   : > { %1846 = vst [vmem:[%s2746_s20 + $0x3a0] sm:$0xff] %v1334_v55  ;;  %1847 = vst [vmem:[%s2746_s20 + $0x3a8] sm:$0xff] %v1335_v56  ;;  %v828_v0 = vmul.f32 %v2716_v7, %v315_v46  ;;  %v829_v1 = vmul.f32 %v2716_v7, %v316_v51  ;;  %v830_v2 = vmul.f32 %v2716_v7, %v317_v52  ;;  %v337_v54 = vld [vmem:[%s2703_s24 + $0x488] sm:$0xff]  ;;  %v338_v55 = vld [vmem:[%s2703_s24 + $0x490] sm:$0xff] }
  0xad   : > { %1848 = vst [vmem:[%s2746_s20 + $0x3b0] sm:$0xff] %v1336_v57  ;;  %v831_v3 = vmul.f32 %v2716_v7, %v318_v53  ;;  %1849 = vst [vmem:[%s2746_s20 + $0x3b8] sm:$0xff] %v1337_v59  ;;  %v1338_v8 = vadd.f32 %v2720_v10, %v825_v60  ;;  %v1339_v9 = vadd.f32 %v2720_v10, %v826_v61  ;;  %v339_v56 = vld [vmem:[%s2703_s24 + $0x498] sm:$0xff]  ;;  %v340_v61 = vld [vmem:[%s2703_s24 + $0x4a0] sm:$0xff] }
  0xae   : > { %v1340_v11 = vadd.f32 %v2720_v10, %v827_v62  ;;  %v832_v12 = vmul.f32 %v2716_v7, %v319_v58  ;;  %v1341_v16 = vadd.f32 %v2720_v10, %v828_v0  ;;  %v1342_v17 = vadd.f32 %v2720_v10, %v829_v1  ;;  %v341_v62 = vld [vmem:[%s2703_s24 + $0x4a8] sm:$0xff] }
  0xaf   : > { %v1343_v18 = vadd.f32 %v2720_v10, %v830_v2  ;;  %v1344_v19 = vadd.f32 %v2720_v10, %v831_v3  ;;  %1850 = vst [vmem:[%s2746_s20 + $0x3c0] sm:$0xff] %v1338_v8  ;;  %1851 = vst [vmem:[%s2746_s20 + $0x3c8] sm:$0xff] %v1339_v9  ;;  %v833_v22 = vmul.f32 %v2716_v7, %v320_v63  ;;  %v342_v63 = vld [vmem:[%s2703_s24 + $0x4b0] sm:$0xff] }
  0xb0   : > { %1852 = vst [vmem:[%s2746_s20 + $0x3d0] sm:$0xff] %v1340_v11  ;;  %v1345_v21 = vadd.f32 %v2720_v10, %v832_v12  ;;  %v834_v23 = vmul.f32 %v2716_v7, %v321_v4  ;;  %v835_v24 = vmul.f32 %v2716_v7, %v322_v5  ;;  %1853 = vst [vmem:[%s2746_s20 + $0x3d8] sm:$0xff] %v1341_v16  ;;  %v343_v4 = vld [vmem:[%s2703_s24 + $0x4b8] sm:$0xff]  ;;  %v344_v11 = vld [vmem:[%s2703_s24 + $0x4c0] sm:$0xff] }
  0xb1   : > { %1854 = vst [vmem:[%s2746_s20 + $0x3e0] sm:$0xff] %v1342_v17  ;;  %1855 = vst [vmem:[%s2746_s20 + $0x3e8] sm:$0xff] %v1343_v18  ;;  %v836_v26 = vmul.f32 %v2716_v7, %v323_v6  ;;  %v837_v27 = vmul.f32 %v2716_v7, %v324_v13  ;;  %v838_v28 = vmul.f32 %v2716_v7, %v325_v14  ;;  %v345_v16 = vld [vmem:[%s2703_s24 + $0x4c8] sm:$0xff]  ;;  %v346_v17 = vld [vmem:[%s2703_s24 + $0x4d0] sm:$0xff] }
  0xb2   : > { %1856 = vst [vmem:[%s2746_s20 + $0x3f0] sm:$0xff] %v1344_v19  ;;  %v839_v29 = vmul.f32 %v2716_v7, %v326_v15  ;;  %1857 = vst [vmem:[%s2746_s20 + $0x3f8] sm:$0xff] %v1345_v21  ;;  %v1346_v33 = vadd.f32 %v2720_v10, %v833_v22  ;;  %v1347_v34 = vadd.f32 %v2720_v10, %v834_v23  ;;  %v347_v18 = vld [vmem:[%s2703_s24 + $0x4d8] sm:$0xff]  ;;  %v348_v23 = vld [vmem:[%s2703_s24 + $0x4e0] sm:$0xff] }
  0xb3   : > { %v1348_v35 = vadd.f32 %v2720_v10, %v835_v24  ;;  %v840_v36 = vmul.f32 %v2716_v7, %v327_v20  ;;  %v1349_v40 = vadd.f32 %v2720_v10, %v836_v26  ;;  %v1350_v41 = vadd.f32 %v2720_v10, %v837_v27  ;;  %v349_v24 = vld [vmem:[%s2703_s24 + $0x4e8] sm:$0xff] }
  0xb4   : > { %v1351_v42 = vadd.f32 %v2720_v10, %v838_v28  ;;  %v1352_v43 = vadd.f32 %v2720_v10, %v839_v29  ;;  %1858 = vst [vmem:[%s2746_s20 + $0x400] sm:$0xff] %v1346_v33  ;;  %1859 = vst [vmem:[%s2746_s20 + $0x408] sm:$0xff] %v1347_v34  ;;  %v841_v46 = vmul.f32 %v2716_v7, %v328_v25  ;;  %v350_v25 = vld [vmem:[%s2703_s24 + $0x4f0] sm:$0xff] }
  0xb5   : > { %1860 = vst [vmem:[%s2746_s20 + $0x410] sm:$0xff] %v1348_v35  ;;  %v1353_v45 = vadd.f32 %v2720_v10, %v840_v36  ;;  %v842_v47 = vmul.f32 %v2716_v7, %v329_v30  ;;  %v843_v48 = vmul.f32 %v2716_v7, %v330_v31  ;;  %1861 = vst [vmem:[%s2746_s20 + $0x418] sm:$0xff] %v1349_v40  ;;  %v351_v30 = vld [vmem:[%s2703_s24 + $0x4f8] sm:$0xff]  ;;  %v352_v35 = vld [vmem:[%s2703_s24 + $0x500] sm:$0xff] }
  0xb6   : > { %1862 = vst [vmem:[%s2746_s20 + $0x420] sm:$0xff] %v1350_v41  ;;  %1863 = vst [vmem:[%s2746_s20 + $0x428] sm:$0xff] %v1351_v42  ;;  %v844_v50 = vmul.f32 %v2716_v7, %v331_v32  ;;  %v845_v51 = vmul.f32 %v2716_v7, %v332_v37  ;;  %v846_v52 = vmul.f32 %v2716_v7, %v333_v38  ;;  %v353_v40 = vld [vmem:[%s2703_s24 + $0x508] sm:$0xff]  ;;  %v354_v41 = vld [vmem:[%s2703_s24 + $0x510] sm:$0xff] }
  0xb7   : > { %1864 = vst [vmem:[%s2746_s20 + $0x430] sm:$0xff] %v1352_v43  ;;  %v847_v53 = vmul.f32 %v2716_v7, %v334_v39  ;;  %1865 = vst [vmem:[%s2746_s20 + $0x438] sm:$0xff] %v1353_v45  ;;  %v1354_v57 = vadd.f32 %v2720_v10, %v841_v46  ;;  %v1355_v58 = vadd.f32 %v2720_v10, %v842_v47  ;;  %v355_v42 = vld [vmem:[%s2703_s24 + $0x518] sm:$0xff]  ;;  %v356_v47 = vld [vmem:[%s2703_s24 + $0x520] sm:$0xff] }
  0xb8   : > { %v1356_v59 = vadd.f32 %v2720_v10, %v843_v48  ;;  %v848_v60 = vmul.f32 %v2716_v7, %v335_v44  ;;  %v1357_v0 = vadd.f32 %v2720_v10, %v844_v50  ;;  %v1358_v1 = vadd.f32 %v2720_v10, %v845_v51  ;;  %v357_v48 = vld [vmem:[%s2703_s24 + $0x528] sm:$0xff] }
  0xb9   : > { %v1359_v2 = vadd.f32 %v2720_v10, %v846_v52  ;;  %v1360_v3 = vadd.f32 %v2720_v10, %v847_v53  ;;  %1866 = vst [vmem:[%s2746_s20 + $0x440] sm:$0xff] %v1354_v57  ;;  %1867 = vst [vmem:[%s2746_s20 + $0x448] sm:$0xff] %v1355_v58  ;;  %v849_v6 = vmul.f32 %v2716_v7, %v336_v49  ;;  %v358_v49 = vld [vmem:[%s2703_s24 + $0x530] sm:$0xff] }
  0xba   : > { %1868 = vst [vmem:[%s2746_s20 + $0x450] sm:$0xff] %v1356_v59  ;;  %v1361_v5 = vadd.f32 %v2720_v10, %v848_v60  ;;  %v850_v8 = vmul.f32 %v2716_v7, %v337_v54  ;;  %v851_v9 = vmul.f32 %v2716_v7, %v338_v55  ;;  %1869 = vst [vmem:[%s2746_s20 + $0x458] sm:$0xff] %v1357_v0  ;;  %v359_v54 = vld [vmem:[%s2703_s24 + $0x538] sm:$0xff]  ;;  %v360_v59 = vld [vmem:[%s2703_s24 + $0x540] sm:$0xff] }
  0xbb   : > { %1870 = vst [vmem:[%s2746_s20 + $0x460] sm:$0xff] %v1358_v1  ;;  %1871 = vst [vmem:[%s2746_s20 + $0x468] sm:$0xff] %v1359_v2  ;;  %v852_v12 = vmul.f32 %v2716_v7, %v339_v56  ;;  %v853_v13 = vmul.f32 %v2716_v7, %v340_v61  ;;  %v854_v14 = vmul.f32 %v2716_v7, %v341_v62  ;;  %v361_v0 = vld [vmem:[%s2703_s24 + $0x548] sm:$0xff]  ;;  %v362_v1 = vld [vmem:[%s2703_s24 + $0x550] sm:$0xff] }
  0xbc   : > { %1872 = vst [vmem:[%s2746_s20 + $0x470] sm:$0xff] %v1360_v3  ;;  %v855_v15 = vmul.f32 %v2716_v7, %v342_v63  ;;  %1873 = vst [vmem:[%s2746_s20 + $0x478] sm:$0xff] %v1361_v5  ;;  %v1362_v19 = vadd.f32 %v2720_v10, %v849_v6  ;;  %v1363_v20 = vadd.f32 %v2720_v10, %v850_v8  ;;  %v363_v2 = vld [vmem:[%s2703_s24 + $0x558] sm:$0xff]  ;;  %v364_v8 = vld [vmem:[%s2703_s24 + $0x560] sm:$0xff] }
  0xbd   : > { %v1364_v21 = vadd.f32 %v2720_v10, %v851_v9  ;;  %v856_v22 = vmul.f32 %v2716_v7, %v343_v4  ;;  %v1365_v26 = vadd.f32 %v2720_v10, %v852_v12  ;;  %v1366_v27 = vadd.f32 %v2720_v10, %v853_v13  ;;  %v365_v9 = vld [vmem:[%s2703_s24 + $0x568] sm:$0xff] }
  0xbe   : > { %v1367_v28 = vadd.f32 %v2720_v10, %v854_v14  ;;  %v1368_v29 = vadd.f32 %v2720_v10, %v855_v15  ;;  %1874 = vst [vmem:[%s2746_s20 + $0x480] sm:$0xff] %v1362_v19  ;;  %1875 = vst [vmem:[%s2746_s20 + $0x488] sm:$0xff] %v1363_v20  ;;  %v857_v32 = vmul.f32 %v2716_v7, %v344_v11  ;;  %v366_v11 = vld [vmem:[%s2703_s24 + $0x570] sm:$0xff] }
  0xbf   : > { %1876 = vst [vmem:[%s2746_s20 + $0x490] sm:$0xff] %v1364_v21  ;;  %v1369_v31 = vadd.f32 %v2720_v10, %v856_v22  ;;  %v858_v33 = vmul.f32 %v2716_v7, %v345_v16  ;;  %v859_v34 = vmul.f32 %v2716_v7, %v346_v17  ;;  %1877 = vst [vmem:[%s2746_s20 + $0x498] sm:$0xff] %v1365_v26  ;;  %v367_v16 = vld [vmem:[%s2703_s24 + $0x578] sm:$0xff]  ;;  %v368_v21 = vld [vmem:[%s2703_s24 + $0x580] sm:$0xff] }
  0xc0   : > { %1878 = vst [vmem:[%s2746_s20 + $0x4a0] sm:$0xff] %v1366_v27  ;;  %1879 = vst [vmem:[%s2746_s20 + $0x4a8] sm:$0xff] %v1367_v28  ;;  %v860_v36 = vmul.f32 %v2716_v7, %v347_v18  ;;  %v861_v37 = vmul.f32 %v2716_v7, %v348_v23  ;;  %v862_v38 = vmul.f32 %v2716_v7, %v349_v24  ;;  %v369_v26 = vld [vmem:[%s2703_s24 + $0x588] sm:$0xff]  ;;  %v370_v27 = vld [vmem:[%s2703_s24 + $0x590] sm:$0xff] }
  0xc1   : > { %1880 = vst [vmem:[%s2746_s20 + $0x4b0] sm:$0xff] %v1368_v29  ;;  %v863_v39 = vmul.f32 %v2716_v7, %v350_v25  ;;  %1881 = vst [vmem:[%s2746_s20 + $0x4b8] sm:$0xff] %v1369_v31  ;;  %v1370_v43 = vadd.f32 %v2720_v10, %v857_v32  ;;  %v1371_v44 = vadd.f32 %v2720_v10, %v858_v33  ;;  %v371_v28 = vld [vmem:[%s2703_s24 + $0x598] sm:$0xff]  ;;  %v372_v33 = vld [vmem:[%s2703_s24 + $0x5a0] sm:$0xff] }
  0xc2   : > { %v1372_v45 = vadd.f32 %v2720_v10, %v859_v34  ;;  %v864_v46 = vmul.f32 %v2716_v7, %v351_v30  ;;  %v1373_v50 = vadd.f32 %v2720_v10, %v860_v36  ;;  %v1374_v51 = vadd.f32 %v2720_v10, %v861_v37  ;;  %v373_v34 = vld [vmem:[%s2703_s24 + $0x5a8] sm:$0xff] }
  0xc3   : > { %v1375_v52 = vadd.f32 %v2720_v10, %v862_v38  ;;  %v1376_v53 = vadd.f32 %v2720_v10, %v863_v39  ;;  %1882 = vst [vmem:[%s2746_s20 + $0x4c0] sm:$0xff] %v1370_v43  ;;  %1883 = vst [vmem:[%s2746_s20 + $0x4c8] sm:$0xff] %v1371_v44  ;;  %v865_v56 = vmul.f32 %v2716_v7, %v352_v35  ;;  %v374_v35 = vld [vmem:[%s2703_s24 + $0x5b0] sm:$0xff] }
  0xc4   : > { %1884 = vst [vmem:[%s2746_s20 + $0x4d0] sm:$0xff] %v1372_v45  ;;  %v1377_v55 = vadd.f32 %v2720_v10, %v864_v46  ;;  %v866_v57 = vmul.f32 %v2716_v7, %v353_v40  ;;  %v867_v58 = vmul.f32 %v2716_v7, %v354_v41  ;;  %1885 = vst [vmem:[%s2746_s20 + $0x4d8] sm:$0xff] %v1373_v50  ;;  %v375_v40 = vld [vmem:[%s2703_s24 + $0x5b8] sm:$0xff]  ;;  %v376_v45 = vld [vmem:[%s2703_s24 + $0x5c0] sm:$0xff] }
  0xc5   : > { %1886 = vst [vmem:[%s2746_s20 + $0x4e0] sm:$0xff] %v1374_v51  ;;  %1887 = vst [vmem:[%s2746_s20 + $0x4e8] sm:$0xff] %v1375_v52  ;;  %v868_v60 = vmul.f32 %v2716_v7, %v355_v42  ;;  %v869_v61 = vmul.f32 %v2716_v7, %v356_v47  ;;  %v870_v62 = vmul.f32 %v2716_v7, %v357_v48  ;;  %v377_v50 = vld [vmem:[%s2703_s24 + $0x5c8] sm:$0xff]  ;;  %v378_v51 = vld [vmem:[%s2703_s24 + $0x5d0] sm:$0xff] }
  0xc6   : > { %1888 = vst [vmem:[%s2746_s20 + $0x4f0] sm:$0xff] %v1376_v53  ;;  %v871_v63 = vmul.f32 %v2716_v7, %v358_v49  ;;  %1889 = vst [vmem:[%s2746_s20 + $0x4f8] sm:$0xff] %v1377_v55  ;;  %v1378_v3 = vadd.f32 %v2720_v10, %v865_v56  ;;  %v1379_v4 = vadd.f32 %v2720_v10, %v866_v57  ;;  %v379_v52 = vld [vmem:[%s2703_s24 + $0x5d8] sm:$0xff]  ;;  %v380_v57 = vld [vmem:[%s2703_s24 + $0x5e0] sm:$0xff] }
  0xc7   : > { %v1380_v5 = vadd.f32 %v2720_v10, %v867_v58  ;;  %v872_v6 = vmul.f32 %v2716_v7, %v359_v54  ;;  %v1381_v12 = vadd.f32 %v2720_v10, %v868_v60  ;;  %v1382_v13 = vadd.f32 %v2720_v10, %v869_v61  ;;  %v381_v58 = vld [vmem:[%s2703_s24 + $0x5e8] sm:$0xff] }
  0xc8   : > { %v1383_v14 = vadd.f32 %v2720_v10, %v870_v62  ;;  %v1384_v15 = vadd.f32 %v2720_v10, %v871_v63  ;;  %1890 = vst [vmem:[%s2746_s20 + $0x500] sm:$0xff] %v1378_v3  ;;  %1891 = vst [vmem:[%s2746_s20 + $0x508] sm:$0xff] %v1379_v4  ;;  %v873_v18 = vmul.f32 %v2716_v7, %v360_v59  ;;  %v382_v59 = vld [vmem:[%s2703_s24 + $0x5f0] sm:$0xff] }
  0xc9   : > { %1892 = vst [vmem:[%s2746_s20 + $0x510] sm:$0xff] %v1380_v5  ;;  %v1385_v17 = vadd.f32 %v2720_v10, %v872_v6  ;;  %v874_v19 = vmul.f32 %v2716_v7, %v361_v0  ;;  %v875_v20 = vmul.f32 %v2716_v7, %v362_v1  ;;  %1893 = vst [vmem:[%s2746_s20 + $0x518] sm:$0xff] %v1381_v12  ;;  %v383_v0 = vld [vmem:[%s2703_s24 + $0x5f8] sm:$0xff]  ;;  %v384_v5 = vld [vmem:[%s2703_s24 + $0x600] sm:$0xff] }
  0xca   : > { %1894 = vst [vmem:[%s2746_s20 + $0x520] sm:$0xff] %v1382_v13  ;;  %1895 = vst [vmem:[%s2746_s20 + $0x528] sm:$0xff] %v1383_v14  ;;  %v876_v22 = vmul.f32 %v2716_v7, %v363_v2  ;;  %v877_v23 = vmul.f32 %v2716_v7, %v364_v8  ;;  %v878_v24 = vmul.f32 %v2716_v7, %v365_v9  ;;  %v385_v12 = vld [vmem:[%s2703_s24 + $0x608] sm:$0xff]  ;;  %v386_v13 = vld [vmem:[%s2703_s24 + $0x610] sm:$0xff] }
  0xcb   : > { %1896 = vst [vmem:[%s2746_s20 + $0x530] sm:$0xff] %v1384_v15  ;;  %v879_v25 = vmul.f32 %v2716_v7, %v366_v11  ;;  %1897 = vst [vmem:[%s2746_s20 + $0x538] sm:$0xff] %v1385_v17  ;;  %v1386_v29 = vadd.f32 %v2720_v10, %v873_v18  ;;  %v1387_v30 = vadd.f32 %v2720_v10, %v874_v19  ;;  %v387_v14 = vld [vmem:[%s2703_s24 + $0x618] sm:$0xff]  ;;  %v388_v19 = vld [vmem:[%s2703_s24 + $0x620] sm:$0xff] }
  0xcc   : > { %v1388_v31 = vadd.f32 %v2720_v10, %v875_v20  ;;  %v880_v32 = vmul.f32 %v2716_v7, %v367_v16  ;;  %v1389_v36 = vadd.f32 %v2720_v10, %v876_v22  ;;  %v1390_v37 = vadd.f32 %v2720_v10, %v877_v23  ;;  %v389_v20 = vld [vmem:[%s2703_s24 + $0x628] sm:$0xff] }
  0xcd   : > { %v1391_v38 = vadd.f32 %v2720_v10, %v878_v24  ;;  %v1392_v39 = vadd.f32 %v2720_v10, %v879_v25  ;;  %1898 = vst [vmem:[%s2746_s20 + $0x540] sm:$0xff] %v1386_v29  ;;  %1899 = vst [vmem:[%s2746_s20 + $0x548] sm:$0xff] %v1387_v30  ;;  %v881_v42 = vmul.f32 %v2716_v7, %v368_v21  ;;  %v390_v21 = vld [vmem:[%s2703_s24 + $0x630] sm:$0xff] }
  0xce   : > { %1900 = vst [vmem:[%s2746_s20 + $0x550] sm:$0xff] %v1388_v31  ;;  %v1393_v41 = vadd.f32 %v2720_v10, %v880_v32  ;;  %v882_v43 = vmul.f32 %v2716_v7, %v369_v26  ;;  %v883_v44 = vmul.f32 %v2716_v7, %v370_v27  ;;  %1901 = vst [vmem:[%s2746_s20 + $0x558] sm:$0xff] %v1389_v36  ;;  %v391_v26 = vld [vmem:[%s2703_s24 + $0x638] sm:$0xff]  ;;  %v392_v31 = vld [vmem:[%s2703_s24 + $0x640] sm:$0xff] }
  0xcf   : > { %1902 = vst [vmem:[%s2746_s20 + $0x560] sm:$0xff] %v1390_v37  ;;  %1903 = vst [vmem:[%s2746_s20 + $0x568] sm:$0xff] %v1391_v38  ;;  %v884_v46 = vmul.f32 %v2716_v7, %v371_v28  ;;  %v885_v47 = vmul.f32 %v2716_v7, %v372_v33  ;;  %v886_v48 = vmul.f32 %v2716_v7, %v373_v34  ;;  %v393_v36 = vld [vmem:[%s2703_s24 + $0x648] sm:$0xff]  ;;  %v394_v37 = vld [vmem:[%s2703_s24 + $0x650] sm:$0xff] }
  0xd0   : > { %1904 = vst [vmem:[%s2746_s20 + $0x570] sm:$0xff] %v1392_v39  ;;  %v887_v49 = vmul.f32 %v2716_v7, %v374_v35  ;;  %1905 = vst [vmem:[%s2746_s20 + $0x578] sm:$0xff] %v1393_v41  ;;  %v1394_v53 = vadd.f32 %v2720_v10, %v881_v42  ;;  %v1395_v54 = vadd.f32 %v2720_v10, %v882_v43  ;;  %v395_v38 = vld [vmem:[%s2703_s24 + $0x658] sm:$0xff]  ;;  %v396_v43 = vld [vmem:[%s2703_s24 + $0x660] sm:$0xff] }
  0xd1   : > { %v1396_v55 = vadd.f32 %v2720_v10, %v883_v44  ;;  %v888_v56 = vmul.f32 %v2716_v7, %v375_v40  ;;  %v1397_v60 = vadd.f32 %v2720_v10, %v884_v46  ;;  %v1398_v61 = vadd.f32 %v2720_v10, %v885_v47  ;;  %v397_v44 = vld [vmem:[%s2703_s24 + $0x668] sm:$0xff] }
  0xd2   : > { %v1399_v62 = vadd.f32 %v2720_v10, %v886_v48  ;;  %v1400_v63 = vadd.f32 %v2720_v10, %v887_v49  ;;  %1906 = vst [vmem:[%s2746_s20 + $0x580] sm:$0xff] %v1394_v53  ;;  %1907 = vst [vmem:[%s2746_s20 + $0x588] sm:$0xff] %v1395_v54  ;;  %v889_v2 = vmul.f32 %v2716_v7, %v376_v45  ;;  %v398_v45 = vld [vmem:[%s2703_s24 + $0x670] sm:$0xff] }
  0xd3   : > { %1908 = vst [vmem:[%s2746_s20 + $0x590] sm:$0xff] %v1396_v55  ;;  %v1401_v1 = vadd.f32 %v2720_v10, %v888_v56  ;;  %v890_v3 = vmul.f32 %v2716_v7, %v377_v50  ;;  %v891_v4 = vmul.f32 %v2716_v7, %v378_v51  ;;  %1909 = vst [vmem:[%s2746_s20 + $0x598] sm:$0xff] %v1397_v60  ;;  %v399_v50 = vld [vmem:[%s2703_s24 + $0x678] sm:$0xff]  ;;  %v400_v55 = vld [vmem:[%s2703_s24 + $0x680] sm:$0xff] }
  0xd4   : > { %1910 = vst [vmem:[%s2746_s20 + $0x5a0] sm:$0xff] %v1398_v61  ;;  %1911 = vst [vmem:[%s2746_s20 + $0x5a8] sm:$0xff] %v1399_v62  ;;  %v892_v6 = vmul.f32 %v2716_v7, %v379_v52  ;;  %v893_v8 = vmul.f32 %v2716_v7, %v380_v57  ;;  %v894_v9 = vmul.f32 %v2716_v7, %v381_v58  ;;  %v401_v60 = vld [vmem:[%s2703_s24 + $0x688] sm:$0xff]  ;;  %v402_v61 = vld [vmem:[%s2703_s24 + $0x690] sm:$0xff] }
  0xd5   : > { %1912 = vst [vmem:[%s2746_s20 + $0x5b0] sm:$0xff] %v1400_v63  ;;  %v895_v11 = vmul.f32 %v2716_v7, %v382_v59  ;;  %1913 = vst [vmem:[%s2746_s20 + $0x5b8] sm:$0xff] %v1401_v1  ;;  %v1402_v15 = vadd.f32 %v2720_v10, %v889_v2  ;;  %v1403_v16 = vadd.f32 %v2720_v10, %v890_v3  ;;  %v403_v62 = vld [vmem:[%s2703_s24 + $0x698] sm:$0xff]  ;;  %v404_v3 = vld [vmem:[%s2703_s24 + $0x6a0] sm:$0xff] }
  0xd6   : > { %v1404_v17 = vadd.f32 %v2720_v10, %v891_v4  ;;  %v896_v18 = vmul.f32 %v2716_v7, %v383_v0  ;;  %v1405_v22 = vadd.f32 %v2720_v10, %v892_v6  ;;  %v1406_v23 = vadd.f32 %v2720_v10, %v893_v8  ;;  %v405_v4 = vld [vmem:[%s2703_s24 + $0x6a8] sm:$0xff] }
  0xd7   : > { %v1407_v24 = vadd.f32 %v2720_v10, %v894_v9  ;;  %v1408_v25 = vadd.f32 %v2720_v10, %v895_v11  ;;  %1914 = vst [vmem:[%s2746_s20 + $0x5c0] sm:$0xff] %v1402_v15  ;;  %1915 = vst [vmem:[%s2746_s20 + $0x5c8] sm:$0xff] %v1403_v16  ;;  %v897_v28 = vmul.f32 %v2716_v7, %v384_v5  ;;  %v406_v5 = vld [vmem:[%s2703_s24 + $0x6b0] sm:$0xff] }
  0xd8   : > { %1916 = vst [vmem:[%s2746_s20 + $0x5d0] sm:$0xff] %v1404_v17  ;;  %v1409_v27 = vadd.f32 %v2720_v10, %v896_v18  ;;  %v898_v29 = vmul.f32 %v2716_v7, %v385_v12  ;;  %v899_v30 = vmul.f32 %v2716_v7, %v386_v13  ;;  %1917 = vst [vmem:[%s2746_s20 + $0x5d8] sm:$0xff] %v1405_v22  ;;  %v407_v12 = vld [vmem:[%s2703_s24 + $0x6b8] sm:$0xff]  ;;  %v408_v17 = vld [vmem:[%s2703_s24 + $0x6c0] sm:$0xff] }
  0xd9   : > { %1918 = vst [vmem:[%s2746_s20 + $0x5e0] sm:$0xff] %v1406_v23  ;;  %1919 = vst [vmem:[%s2746_s20 + $0x5e8] sm:$0xff] %v1407_v24  ;;  %v900_v32 = vmul.f32 %v2716_v7, %v387_v14  ;;  %v901_v33 = vmul.f32 %v2716_v7, %v388_v19  ;;  %v902_v34 = vmul.f32 %v2716_v7, %v389_v20  ;;  %v409_v22 = vld [vmem:[%s2703_s24 + $0x6c8] sm:$0xff]  ;;  %v410_v23 = vld [vmem:[%s2703_s24 + $0x6d0] sm:$0xff] }
  0xda   : > { %1920 = vst [vmem:[%s2746_s20 + $0x5f0] sm:$0xff] %v1408_v25  ;;  %v903_v35 = vmul.f32 %v2716_v7, %v390_v21  ;;  %1921 = vst [vmem:[%s2746_s20 + $0x5f8] sm:$0xff] %v1409_v27  ;;  %v1410_v39 = vadd.f32 %v2720_v10, %v897_v28  ;;  %v1411_v40 = vadd.f32 %v2720_v10, %v898_v29  ;;  %v411_v24 = vld [vmem:[%s2703_s24 + $0x6d8] sm:$0xff]  ;;  %v412_v29 = vld [vmem:[%s2703_s24 + $0x6e0] sm:$0xff] }
  0xdb   : > { %v1412_v41 = vadd.f32 %v2720_v10, %v899_v30  ;;  %v904_v42 = vmul.f32 %v2716_v7, %v391_v26  ;;  %v1413_v46 = vadd.f32 %v2720_v10, %v900_v32  ;;  %v1414_v47 = vadd.f32 %v2720_v10, %v901_v33  ;;  %v413_v30 = vld [vmem:[%s2703_s24 + $0x6e8] sm:$0xff] }
  0xdc   : > { %v1415_v48 = vadd.f32 %v2720_v10, %v902_v34  ;;  %v1416_v49 = vadd.f32 %v2720_v10, %v903_v35  ;;  %1922 = vst [vmem:[%s2746_s20 + $0x600] sm:$0xff] %v1410_v39  ;;  %1923 = vst [vmem:[%s2746_s20 + $0x608] sm:$0xff] %v1411_v40  ;;  %v905_v52 = vmul.f32 %v2716_v7, %v392_v31  ;;  %v414_v31 = vld [vmem:[%s2703_s24 + $0x6f0] sm:$0xff] }
  0xdd   : > { %1924 = vst [vmem:[%s2746_s20 + $0x610] sm:$0xff] %v1412_v41  ;;  %v1417_v51 = vadd.f32 %v2720_v10, %v904_v42  ;;  %v906_v53 = vmul.f32 %v2716_v7, %v393_v36  ;;  %v907_v54 = vmul.f32 %v2716_v7, %v394_v37  ;;  %1925 = vst [vmem:[%s2746_s20 + $0x618] sm:$0xff] %v1413_v46  ;;  %v415_v36 = vld [vmem:[%s2703_s24 + $0x6f8] sm:$0xff]  ;;  %v416_v41 = vld [vmem:[%s2703_s24 + $0x700] sm:$0xff] }
  0xde   : > { %1926 = vst [vmem:[%s2746_s20 + $0x620] sm:$0xff] %v1414_v47  ;;  %1927 = vst [vmem:[%s2746_s20 + $0x628] sm:$0xff] %v1415_v48  ;;  %v908_v56 = vmul.f32 %v2716_v7, %v395_v38  ;;  %v909_v57 = vmul.f32 %v2716_v7, %v396_v43  ;;  %v910_v58 = vmul.f32 %v2716_v7, %v397_v44  ;;  %v417_v46 = vld [vmem:[%s2703_s24 + $0x708] sm:$0xff]  ;;  %v418_v47 = vld [vmem:[%s2703_s24 + $0x710] sm:$0xff] }
  0xdf   : > { %1928 = vst [vmem:[%s2746_s20 + $0x630] sm:$0xff] %v1416_v49  ;;  %v911_v59 = vmul.f32 %v2716_v7, %v398_v45  ;;  %1929 = vst [vmem:[%s2746_s20 + $0x638] sm:$0xff] %v1417_v51  ;;  %v1418_v63 = vadd.f32 %v2720_v10, %v905_v52  ;;  %v1419_v0 = vadd.f32 %v2720_v10, %v906_v53  ;;  %v419_v48 = vld [vmem:[%s2703_s24 + $0x718] sm:$0xff]  ;;  %v420_v53 = vld [vmem:[%s2703_s24 + $0x720] sm:$0xff] }
  0xe0   : > { %v1420_v1 = vadd.f32 %v2720_v10, %v907_v54  ;;  %v912_v2 = vmul.f32 %v2716_v7, %v399_v50  ;;  %v1421_v6 = vadd.f32 %v2720_v10, %v908_v56  ;;  %v1422_v8 = vadd.f32 %v2720_v10, %v909_v57  ;;  %v421_v54 = vld [vmem:[%s2703_s24 + $0x728] sm:$0xff] }
  0xe1   : > { %v1423_v9 = vadd.f32 %v2720_v10, %v910_v58  ;;  %v1424_v11 = vadd.f32 %v2720_v10, %v911_v59  ;;  %1930 = vst [vmem:[%s2746_s20 + $0x640] sm:$0xff] %v1418_v63  ;;  %1931 = vst [vmem:[%s2746_s20 + $0x648] sm:$0xff] %v1419_v0  ;;  %v913_v14 = vmul.f32 %v2716_v7, %v400_v55  ;;  %v422_v55 = vld [vmem:[%s2703_s24 + $0x730] sm:$0xff] }
  0xe2   : > { %1932 = vst [vmem:[%s2746_s20 + $0x650] sm:$0xff] %v1420_v1  ;;  %v1425_v13 = vadd.f32 %v2720_v10, %v912_v2  ;;  %v914_v15 = vmul.f32 %v2716_v7, %v401_v60  ;;  %v915_v16 = vmul.f32 %v2716_v7, %v402_v61  ;;  %1933 = vst [vmem:[%s2746_s20 + $0x658] sm:$0xff] %v1421_v6  ;;  %v423_v60 = vld [vmem:[%s2703_s24 + $0x738] sm:$0xff]  ;;  %v424_v1 = vld [vmem:[%s2703_s24 + $0x740] sm:$0xff] }
  0xe3   : > { %1934 = vst [vmem:[%s2746_s20 + $0x660] sm:$0xff] %v1422_v8  ;;  %1935 = vst [vmem:[%s2746_s20 + $0x668] sm:$0xff] %v1423_v9  ;;  %v916_v18 = vmul.f32 %v2716_v7, %v403_v62  ;;  %v917_v19 = vmul.f32 %v2716_v7, %v404_v3  ;;  %v918_v20 = vmul.f32 %v2716_v7, %v405_v4  ;;  %v425_v6 = vld [vmem:[%s2703_s24 + $0x748] sm:$0xff]  ;;  %v426_v8 = vld [vmem:[%s2703_s24 + $0x750] sm:$0xff] }
  0xe4   : > { %1936 = vst [vmem:[%s2746_s20 + $0x670] sm:$0xff] %v1424_v11  ;;  %v919_v21 = vmul.f32 %v2716_v7, %v406_v5  ;;  %1937 = vst [vmem:[%s2746_s20 + $0x678] sm:$0xff] %v1425_v13  ;;  %v1426_v25 = vadd.f32 %v2720_v10, %v913_v14  ;;  %v1427_v26 = vadd.f32 %v2720_v10, %v914_v15  ;;  %v427_v9 = vld [vmem:[%s2703_s24 + $0x758] sm:$0xff]  ;;  %v428_v15 = vld [vmem:[%s2703_s24 + $0x760] sm:$0xff] }
  0xe5   : > { %v1428_v27 = vadd.f32 %v2720_v10, %v915_v16  ;;  %v920_v28 = vmul.f32 %v2716_v7, %v407_v12  ;;  %v1429_v32 = vadd.f32 %v2720_v10, %v916_v18  ;;  %v1430_v33 = vadd.f32 %v2720_v10, %v917_v19  ;;  %v429_v16 = vld [vmem:[%s2703_s24 + $0x768] sm:$0xff] }
  0xe6   : > { %v1431_v34 = vadd.f32 %v2720_v10, %v918_v20  ;;  %v1432_v35 = vadd.f32 %v2720_v10, %v919_v21  ;;  %1938 = vst [vmem:[%s2746_s20 + $0x680] sm:$0xff] %v1426_v25  ;;  %1939 = vst [vmem:[%s2746_s20 + $0x688] sm:$0xff] %v1427_v26  ;;  %v921_v38 = vmul.f32 %v2716_v7, %v408_v17  ;;  %v430_v17 = vld [vmem:[%s2703_s24 + $0x770] sm:$0xff] }
  0xe7   : > { %1940 = vst [vmem:[%s2746_s20 + $0x690] sm:$0xff] %v1428_v27  ;;  %v1433_v37 = vadd.f32 %v2720_v10, %v920_v28  ;;  %v922_v39 = vmul.f32 %v2716_v7, %v409_v22  ;;  %v923_v40 = vmul.f32 %v2716_v7, %v410_v23  ;;  %1941 = vst [vmem:[%s2746_s20 + $0x698] sm:$0xff] %v1429_v32  ;;  %v431_v22 = vld [vmem:[%s2703_s24 + $0x778] sm:$0xff]  ;;  %v432_v27 = vld [vmem:[%s2703_s24 + $0x780] sm:$0xff] }
  0xe8   : > { %1942 = vst [vmem:[%s2746_s20 + $0x6a0] sm:$0xff] %v1430_v33  ;;  %1943 = vst [vmem:[%s2746_s20 + $0x6a8] sm:$0xff] %v1431_v34  ;;  %v924_v42 = vmul.f32 %v2716_v7, %v411_v24  ;;  %v925_v43 = vmul.f32 %v2716_v7, %v412_v29  ;;  %v926_v44 = vmul.f32 %v2716_v7, %v413_v30  ;;  %v433_v32 = vld [vmem:[%s2703_s24 + $0x788] sm:$0xff]  ;;  %v434_v33 = vld [vmem:[%s2703_s24 + $0x790] sm:$0xff] }
  0xe9   : > { %1944 = vst [vmem:[%s2746_s20 + $0x6b0] sm:$0xff] %v1432_v35  ;;  %v927_v45 = vmul.f32 %v2716_v7, %v414_v31  ;;  %1945 = vst [vmem:[%s2746_s20 + $0x6b8] sm:$0xff] %v1433_v37  ;;  %v1434_v49 = vadd.f32 %v2720_v10, %v921_v38  ;;  %v1435_v50 = vadd.f32 %v2720_v10, %v922_v39  ;;  %v435_v34 = vld [vmem:[%s2703_s24 + $0x798] sm:$0xff]  ;;  %v436_v39 = vld [vmem:[%s2703_s24 + $0x7a0] sm:$0xff] }
  0xea   : > { %v1436_v51 = vadd.f32 %v2720_v10, %v923_v40  ;;  %v928_v52 = vmul.f32 %v2716_v7, %v415_v36  ;;  %v1437_v56 = vadd.f32 %v2720_v10, %v924_v42  ;;  %v1438_v57 = vadd.f32 %v2720_v10, %v925_v43  ;;  %v437_v40 = vld [vmem:[%s2703_s24 + $0x7a8] sm:$0xff] }
  0xeb   : > { %v1439_v58 = vadd.f32 %v2720_v10, %v926_v44  ;;  %v1440_v59 = vadd.f32 %v2720_v10, %v927_v45  ;;  %1946 = vst [vmem:[%s2746_s20 + $0x6c0] sm:$0xff] %v1434_v49  ;;  %1947 = vst [vmem:[%s2746_s20 + $0x6c8] sm:$0xff] %v1435_v50  ;;  %v929_v62 = vmul.f32 %v2716_v7, %v416_v41  ;;  %v438_v41 = vld [vmem:[%s2703_s24 + $0x7b0] sm:$0xff] }
  0xec   : > { %1948 = vst [vmem:[%s2746_s20 + $0x6d0] sm:$0xff] %v1436_v51  ;;  %v1441_v61 = vadd.f32 %v2720_v10, %v928_v52  ;;  %v930_v63 = vmul.f32 %v2716_v7, %v417_v46  ;;  %v931_v0 = vmul.f32 %v2716_v7, %v418_v47  ;;  %1949 = vst [vmem:[%s2746_s20 + $0x6d8] sm:$0xff] %v1437_v56  ;;  %v439_v46 = vld [vmem:[%s2703_s24 + $0x7b8] sm:$0xff]  ;;  %v440_v51 = vld [vmem:[%s2703_s24 + $0x7c0] sm:$0xff] }
  0xed   : > { %1950 = vst [vmem:[%s2746_s20 + $0x6e0] sm:$0xff] %v1438_v57  ;;  %1951 = vst [vmem:[%s2746_s20 + $0x6e8] sm:$0xff] %v1439_v58  ;;  %v932_v2 = vmul.f32 %v2716_v7, %v419_v48  ;;  %v933_v3 = vmul.f32 %v2716_v7, %v420_v53  ;;  %v934_v4 = vmul.f32 %v2716_v7, %v421_v54  ;;  %v441_v56 = vld [vmem:[%s2703_s24 + $0x7c8] sm:$0xff]  ;;  %v442_v57 = vld [vmem:[%s2703_s24 + $0x7d0] sm:$0xff] }
  0xee   : > { %1952 = vst [vmem:[%s2746_s20 + $0x6f0] sm:$0xff] %v1440_v59  ;;  %v935_v5 = vmul.f32 %v2716_v7, %v422_v55  ;;  %1953 = vst [vmem:[%s2746_s20 + $0x6f8] sm:$0xff] %v1441_v61  ;;  %v1442_v11 = vadd.f32 %v2720_v10, %v929_v62  ;;  %v1443_v12 = vadd.f32 %v2720_v10, %v930_v63  ;;  %v443_v58 = vld [vmem:[%s2703_s24 + $0x7d8] sm:$0xff]  ;;  %v444_v63 = vld [vmem:[%s2703_s24 + $0x7e0] sm:$0xff] }
  0xef   : > { %v1444_v13 = vadd.f32 %v2720_v10, %v931_v0  ;;  %v936_v14 = vmul.f32 %v2716_v7, %v423_v60  ;;  %v1445_v18 = vadd.f32 %v2720_v10, %v932_v2  ;;  %v1446_v19 = vadd.f32 %v2720_v10, %v933_v3  ;;  %v445_v0 = vld [vmem:[%s2703_s24 + $0x7e8] sm:$0xff] }
  0xf0   : > { %v1447_v20 = vadd.f32 %v2720_v10, %v934_v4  ;;  %v1448_v21 = vadd.f32 %v2720_v10, %v935_v5  ;;  %1954 = vst [vmem:[%s2746_s20 + $0x700] sm:$0xff] %v1442_v11  ;;  %1955 = vst [vmem:[%s2746_s20 + $0x708] sm:$0xff] %v1443_v12  ;;  %v937_v24 = vmul.f32 %v2716_v7, %v424_v1  ;;  %v446_v1 = vld [vmem:[%s2703_s24 + $0x7f0] sm:$0xff] }
  0xf1   : > { %1956 = vst [vmem:[%s2746_s20 + $0x710] sm:$0xff] %v1444_v13  ;;  %v1449_v23 = vadd.f32 %v2720_v10, %v936_v14  ;;  %v938_v25 = vmul.f32 %v2716_v7, %v425_v6  ;;  %v939_v26 = vmul.f32 %v2716_v7, %v426_v8  ;;  %1957 = vst [vmem:[%s2746_s20 + $0x718] sm:$0xff] %v1445_v18  ;;  %v447_v6 = vld [vmem:[%s2703_s24 + $0x7f8] sm:$0xff]  ;;  %v448_v13 = vld [vmem:[%s2703_s24 + $0x800] sm:$0xff] }
  0xf2   : > { %1958 = vst [vmem:[%s2746_s20 + $0x720] sm:$0xff] %v1446_v19  ;;  %1959 = vst [vmem:[%s2746_s20 + $0x728] sm:$0xff] %v1447_v20  ;;  %v940_v28 = vmul.f32 %v2716_v7, %v427_v9  ;;  %v941_v29 = vmul.f32 %v2716_v7, %v428_v15  ;;  %v942_v30 = vmul.f32 %v2716_v7, %v429_v16  ;;  %v449_v18 = vld [vmem:[%s2703_s24 + $0x808] sm:$0xff]  ;;  %v450_v19 = vld [vmem:[%s2703_s24 + $0x810] sm:$0xff] }
  0xf3   : > { %1960 = vst [vmem:[%s2746_s20 + $0x730] sm:$0xff] %v1448_v21  ;;  %v943_v31 = vmul.f32 %v2716_v7, %v430_v17  ;;  %1961 = vst [vmem:[%s2746_s20 + $0x738] sm:$0xff] %v1449_v23  ;;  %v1450_v35 = vadd.f32 %v2720_v10, %v937_v24  ;;  %v1451_v36 = vadd.f32 %v2720_v10, %v938_v25  ;;  %v451_v20 = vld [vmem:[%s2703_s24 + $0x818] sm:$0xff]  ;;  %v452_v25 = vld [vmem:[%s2703_s24 + $0x820] sm:$0xff] }
  0xf4   : > { %v1452_v37 = vadd.f32 %v2720_v10, %v939_v26  ;;  %v944_v38 = vmul.f32 %v2716_v7, %v431_v22  ;;  %v1453_v42 = vadd.f32 %v2720_v10, %v940_v28  ;;  %v1454_v43 = vadd.f32 %v2720_v10, %v941_v29  ;;  %v453_v26 = vld [vmem:[%s2703_s24 + $0x828] sm:$0xff] }
  0xf5   : > { %v1455_v44 = vadd.f32 %v2720_v10, %v942_v30  ;;  %v1456_v45 = vadd.f32 %v2720_v10, %v943_v31  ;;  %1962 = vst [vmem:[%s2746_s20 + $0x740] sm:$0xff] %v1450_v35  ;;  %1963 = vst [vmem:[%s2746_s20 + $0x748] sm:$0xff] %v1451_v36  ;;  %v945_v48 = vmul.f32 %v2716_v7, %v432_v27  ;;  %v454_v27 = vld [vmem:[%s2703_s24 + $0x830] sm:$0xff] }
  0xf6   : > { %1964 = vst [vmem:[%s2746_s20 + $0x750] sm:$0xff] %v1452_v37  ;;  %v1457_v47 = vadd.f32 %v2720_v10, %v944_v38  ;;  %v946_v49 = vmul.f32 %v2716_v7, %v433_v32  ;;  %v947_v50 = vmul.f32 %v2716_v7, %v434_v33  ;;  %1965 = vst [vmem:[%s2746_s20 + $0x758] sm:$0xff] %v1453_v42  ;;  %v455_v32 = vld [vmem:[%s2703_s24 + $0x838] sm:$0xff]  ;;  %v456_v37 = vld [vmem:[%s2703_s24 + $0x840] sm:$0xff] }
  0xf7   : > { %1966 = vst [vmem:[%s2746_s20 + $0x760] sm:$0xff] %v1454_v43  ;;  %1967 = vst [vmem:[%s2746_s20 + $0x768] sm:$0xff] %v1455_v44  ;;  %v948_v52 = vmul.f32 %v2716_v7, %v435_v34  ;;  %v949_v53 = vmul.f32 %v2716_v7, %v436_v39  ;;  %v950_v54 = vmul.f32 %v2716_v7, %v437_v40  ;;  %v457_v42 = vld [vmem:[%s2703_s24 + $0x848] sm:$0xff]  ;;  %v458_v43 = vld [vmem:[%s2703_s24 + $0x850] sm:$0xff] }
  0xf8   : > { %1968 = vst [vmem:[%s2746_s20 + $0x770] sm:$0xff] %v1456_v45  ;;  %v951_v55 = vmul.f32 %v2716_v7, %v438_v41  ;;  %1969 = vst [vmem:[%s2746_s20 + $0x778] sm:$0xff] %v1457_v47  ;;  %v1458_v59 = vadd.f32 %v2720_v10, %v945_v48  ;;  %v1459_v60 = vadd.f32 %v2720_v10, %v946_v49  ;;  %v459_v44 = vld [vmem:[%s2703_s24 + $0x858] sm:$0xff]  ;;  %v460_v49 = vld [vmem:[%s2703_s24 + $0x860] sm:$0xff] }
  0xf9   : > { %v1460_v61 = vadd.f32 %v2720_v10, %v947_v50  ;;  %v952_v62 = vmul.f32 %v2716_v7, %v439_v46  ;;  %v1461_v2 = vadd.f32 %v2720_v10, %v948_v52  ;;  %v1462_v3 = vadd.f32 %v2720_v10, %v949_v53  ;;  %v461_v50 = vld [vmem:[%s2703_s24 + $0x868] sm:$0xff] }
  0xfa   : > { %v1463_v4 = vadd.f32 %v2720_v10, %v950_v54  ;;  %v1464_v5 = vadd.f32 %v2720_v10, %v951_v55  ;;  %1970 = vst [vmem:[%s2746_s20 + $0x780] sm:$0xff] %v1458_v59  ;;  %1971 = vst [vmem:[%s2746_s20 + $0x788] sm:$0xff] %v1459_v60  ;;  %v953_v9 = vmul.f32 %v2716_v7, %v440_v51  ;;  %v462_v51 = vld [vmem:[%s2703_s24 + $0x870] sm:$0xff] }
  0xfb   : > { %1972 = vst [vmem:[%s2746_s20 + $0x790] sm:$0xff] %v1460_v61  ;;  %v1465_v8 = vadd.f32 %v2720_v10, %v952_v62  ;;  %v954_v11 = vmul.f32 %v2716_v7, %v441_v56  ;;  %v955_v12 = vmul.f32 %v2716_v7, %v442_v57  ;;  %1973 = vst [vmem:[%s2746_s20 + $0x798] sm:$0xff] %v1461_v2  ;;  %v463_v56 = vld [vmem:[%s2703_s24 + $0x878] sm:$0xff]  ;;  %v464_v61 = vld [vmem:[%s2703_s24 + $0x880] sm:$0xff] }
  0xfc   : > { %1974 = vst [vmem:[%s2746_s20 + $0x7a0] sm:$0xff] %v1462_v3  ;;  %1975 = vst [vmem:[%s2746_s20 + $0x7a8] sm:$0xff] %v1463_v4  ;;  %v956_v14 = vmul.f32 %v2716_v7, %v443_v58  ;;  %v957_v15 = vmul.f32 %v2716_v7, %v444_v63  ;;  %v958_v16 = vmul.f32 %v2716_v7, %v445_v0  ;;  %v465_v2 = vld [vmem:[%s2703_s24 + $0x888] sm:$0xff]  ;;  %v466_v3 = vld [vmem:[%s2703_s24 + $0x890] sm:$0xff] }
  0xfd   : > { %1976 = vst [vmem:[%s2746_s20 + $0x7b0] sm:$0xff] %v1464_v5  ;;  %v959_v17 = vmul.f32 %v2716_v7, %v446_v1  ;;  %1977 = vst [vmem:[%s2746_s20 + $0x7b8] sm:$0xff] %v1465_v8  ;;  %v1466_v21 = vadd.f32 %v2720_v10, %v953_v9  ;;  %v1467_v22 = vadd.f32 %v2720_v10, %v954_v11  ;;  %v467_v4 = vld [vmem:[%s2703_s24 + $0x898] sm:$0xff]  ;;  %v468_v11 = vld [vmem:[%s2703_s24 + $0x8a0] sm:$0xff] }
  0xfe   : > { %v1468_v23 = vadd.f32 %v2720_v10, %v955_v12  ;;  %v960_v24 = vmul.f32 %v2716_v7, %v447_v6  ;;  %v1469_v28 = vadd.f32 %v2720_v10, %v956_v14  ;;  %v1470_v29 = vadd.f32 %v2720_v10, %v957_v15  ;;  %v469_v12 = vld [vmem:[%s2703_s24 + $0x8a8] sm:$0xff] }
  0xff   : > { %v1471_v30 = vadd.f32 %v2720_v10, %v958_v16  ;;  %v1472_v31 = vadd.f32 %v2720_v10, %v959_v17  ;;  %1978 = vst [vmem:[%s2746_s20 + $0x7c0] sm:$0xff] %v1466_v21  ;;  %1979 = vst [vmem:[%s2746_s20 + $0x7c8] sm:$0xff] %v1467_v22  ;;  %v961_v34 = vmul.f32 %v2716_v7, %v448_v13  ;;  %v470_v13 = vld [vmem:[%s2703_s24 + $0x8b0] sm:$0xff] }
 0x100   : > { %1980 = vst [vmem:[%s2746_s20 + $0x7d0] sm:$0xff] %v1468_v23  ;;  %v1473_v33 = vadd.f32 %v2720_v10, %v960_v24  ;;  %v962_v35 = vmul.f32 %v2716_v7, %v449_v18  ;;  %v963_v36 = vmul.f32 %v2716_v7, %v450_v19  ;;  %1981 = vst [vmem:[%s2746_s20 + $0x7d8] sm:$0xff] %v1469_v28  ;;  %v471_v18 = vld [vmem:[%s2703_s24 + $0x8b8] sm:$0xff]  ;;  %v472_v23 = vld [vmem:[%s2703_s24 + $0x8c0] sm:$0xff] }
 0x101   : > { %1982 = vst [vmem:[%s2746_s20 + $0x7e0] sm:$0xff] %v1470_v29  ;;  %1983 = vst [vmem:[%s2746_s20 + $0x7e8] sm:$0xff] %v1471_v30  ;;  %v964_v38 = vmul.f32 %v2716_v7, %v451_v20  ;;  %v965_v39 = vmul.f32 %v2716_v7, %v452_v25  ;;  %v966_v40 = vmul.f32 %v2716_v7, %v453_v26  ;;  %v473_v28 = vld [vmem:[%s2703_s24 + $0x8c8] sm:$0xff]  ;;  %v474_v29 = vld [vmem:[%s2703_s24 + $0x8d0] sm:$0xff] }
 0x102   : > { %1984 = vst [vmem:[%s2746_s20 + $0x7f0] sm:$0xff] %v1472_v31  ;;  %v967_v41 = vmul.f32 %v2716_v7, %v454_v27  ;;  %1985 = vst [vmem:[%s2746_s20 + $0x7f8] sm:$0xff] %v1473_v33  ;;  %v1474_v45 = vadd.f32 %v2720_v10, %v961_v34  ;;  %v1475_v46 = vadd.f32 %v2720_v10, %v962_v35  ;;  %v475_v30 = vld [vmem:[%s2703_s24 + $0x8d8] sm:$0xff]  ;;  %v476_v35 = vld [vmem:[%s2703_s24 + $0x8e0] sm:$0xff] }
 0x103   : > { %v1476_v47 = vadd.f32 %v2720_v10, %v963_v36  ;;  %v968_v48 = vmul.f32 %v2716_v7, %v455_v32  ;;  %v1477_v52 = vadd.f32 %v2720_v10, %v964_v38  ;;  %v1478_v53 = vadd.f32 %v2720_v10, %v965_v39  ;;  %v477_v36 = vld [vmem:[%s2703_s24 + $0x8e8] sm:$0xff] }
 0x104   : > { %v1479_v54 = vadd.f32 %v2720_v10, %v966_v40  ;;  %v1480_v55 = vadd.f32 %v2720_v10, %v967_v41  ;;  %1986 = vst [vmem:[%s2746_s20 + $0x800] sm:$0xff] %v1474_v45  ;;  %1987 = vst [vmem:[%s2746_s20 + $0x808] sm:$0xff] %v1475_v46  ;;  %v969_v58 = vmul.f32 %v2716_v7, %v456_v37  ;;  %v478_v37 = vld [vmem:[%s2703_s24 + $0x8f0] sm:$0xff] }
 0x105   : > { %1988 = vst [vmem:[%s2746_s20 + $0x810] sm:$0xff] %v1476_v47  ;;  %v1481_v57 = vadd.f32 %v2720_v10, %v968_v48  ;;  %v970_v59 = vmul.f32 %v2716_v7, %v457_v42  ;;  %v971_v60 = vmul.f32 %v2716_v7, %v458_v43  ;;  %1989 = vst [vmem:[%s2746_s20 + $0x818] sm:$0xff] %v1477_v52  ;;  %v479_v42 = vld [vmem:[%s2703_s24 + $0x8f8] sm:$0xff]  ;;  %v480_v47 = vld [vmem:[%s2703_s24 + $0x900] sm:$0xff] }
 0x106   : > { %1990 = vst [vmem:[%s2746_s20 + $0x820] sm:$0xff] %v1478_v53  ;;  %1991 = vst [vmem:[%s2746_s20 + $0x828] sm:$0xff] %v1479_v54  ;;  %v972_v62 = vmul.f32 %v2716_v7, %v459_v44  ;;  %v973_v63 = vmul.f32 %v2716_v7, %v460_v49  ;;  %v974_v0 = vmul.f32 %v2716_v7, %v461_v50  ;;  %v481_v52 = vld [vmem:[%s2703_s24 + $0x908] sm:$0xff]  ;;  %v482_v53 = vld [vmem:[%s2703_s24 + $0x910] sm:$0xff] }
 0x107   : > { %1992 = vst [vmem:[%s2746_s20 + $0x830] sm:$0xff] %v1480_v55  ;;  %v975_v1 = vmul.f32 %v2716_v7, %v462_v51  ;;  %1993 = vst [vmem:[%s2746_s20 + $0x838] sm:$0xff] %v1481_v57  ;;  %v1482_v5 = vadd.f32 %v2720_v10, %v969_v58  ;;  %v1483_v6 = vadd.f32 %v2720_v10, %v970_v59  ;;  %v483_v54 = vld [vmem:[%s2703_s24 + $0x918] sm:$0xff]  ;;  %v484_v59 = vld [vmem:[%s2703_s24 + $0x920] sm:$0xff] }
 0x108   : > { %v1484_v8 = vadd.f32 %v2720_v10, %v971_v60  ;;  %v976_v9 = vmul.f32 %v2716_v7, %v463_v56  ;;  %v1485_v14 = vadd.f32 %v2720_v10, %v972_v62  ;;  %v1486_v15 = vadd.f32 %v2720_v10, %v973_v63  ;;  %v485_v60 = vld [vmem:[%s2703_s24 + $0x928] sm:$0xff] }
 0x109   : > { %v1487_v16 = vadd.f32 %v2720_v10, %v974_v0  ;;  %v1488_v17 = vadd.f32 %v2720_v10, %v975_v1  ;;  %1994 = vst [vmem:[%s2746_s20 + $0x840] sm:$0xff] %v1482_v5  ;;  %1995 = vst [vmem:[%s2746_s20 + $0x848] sm:$0xff] %v1483_v6  ;;  %v977_v20 = vmul.f32 %v2716_v7, %v464_v61  ;;  %v486_v61 = vld [vmem:[%s2703_s24 + $0x930] sm:$0xff] }
 0x10a   : > { %1996 = vst [vmem:[%s2746_s20 + $0x850] sm:$0xff] %v1484_v8  ;;  %v1489_v19 = vadd.f32 %v2720_v10, %v976_v9  ;;  %v978_v21 = vmul.f32 %v2716_v7, %v465_v2  ;;  %v979_v22 = vmul.f32 %v2716_v7, %v466_v3  ;;  %1997 = vst [vmem:[%s2746_s20 + $0x858] sm:$0xff] %v1485_v14  ;;  %v487_v2 = vld [vmem:[%s2703_s24 + $0x938] sm:$0xff]  ;;  %v488_v8 = vld [vmem:[%s2703_s24 + $0x940] sm:$0xff] }
 0x10b   : > { %1998 = vst [vmem:[%s2746_s20 + $0x860] sm:$0xff] %v1486_v15  ;;  %1999 = vst [vmem:[%s2746_s20 + $0x868] sm:$0xff] %v1487_v16  ;;  %v980_v24 = vmul.f32 %v2716_v7, %v467_v4  ;;  %v981_v25 = vmul.f32 %v2716_v7, %v468_v11  ;;  %v982_v26 = vmul.f32 %v2716_v7, %v469_v12  ;;  %v489_v14 = vld [vmem:[%s2703_s24 + $0x948] sm:$0xff]  ;;  %v490_v15 = vld [vmem:[%s2703_s24 + $0x950] sm:$0xff] }
 0x10c   : > { %2000 = vst [vmem:[%s2746_s20 + $0x870] sm:$0xff] %v1488_v17  ;;  %v983_v27 = vmul.f32 %v2716_v7, %v470_v13  ;;  %2001 = vst [vmem:[%s2746_s20 + $0x878] sm:$0xff] %v1489_v19  ;;  %v1490_v31 = vadd.f32 %v2720_v10, %v977_v20  ;;  %v1491_v32 = vadd.f32 %v2720_v10, %v978_v21  ;;  %v491_v16 = vld [vmem:[%s2703_s24 + $0x958] sm:$0xff]  ;;  %v492_v21 = vld [vmem:[%s2703_s24 + $0x960] sm:$0xff] }
 0x10d   : > { %v1492_v33 = vadd.f32 %v2720_v10, %v979_v22  ;;  %v984_v34 = vmul.f32 %v2716_v7, %v471_v18  ;;  %v1493_v38 = vadd.f32 %v2720_v10, %v980_v24  ;;  %v1494_v39 = vadd.f32 %v2720_v10, %v981_v25  ;;  %v493_v22 = vld [vmem:[%s2703_s24 + $0x968] sm:$0xff] }
 0x10e   : > { %v1495_v40 = vadd.f32 %v2720_v10, %v982_v26  ;;  %v1496_v41 = vadd.f32 %v2720_v10, %v983_v27  ;;  %2002 = vst [vmem:[%s2746_s20 + $0x880] sm:$0xff] %v1490_v31  ;;  %2003 = vst [vmem:[%s2746_s20 + $0x888] sm:$0xff] %v1491_v32  ;;  %v985_v44 = vmul.f32 %v2716_v7, %v472_v23  ;;  %v494_v23 = vld [vmem:[%s2703_s24 + $0x970] sm:$0xff] }
 0x10f   : > { %2004 = vst [vmem:[%s2746_s20 + $0x890] sm:$0xff] %v1492_v33  ;;  %v1497_v43 = vadd.f32 %v2720_v10, %v984_v34  ;;  %v986_v45 = vmul.f32 %v2716_v7, %v473_v28  ;;  %v987_v46 = vmul.f32 %v2716_v7, %v474_v29  ;;  %2005 = vst [vmem:[%s2746_s20 + $0x898] sm:$0xff] %v1493_v38  ;;  %v495_v28 = vld [vmem:[%s2703_s24 + $0x978] sm:$0xff]  ;;  %v496_v33 = vld [vmem:[%s2703_s24 + $0x980] sm:$0xff] }
 0x110   : > { %2006 = vst [vmem:[%s2746_s20 + $0x8a0] sm:$0xff] %v1494_v39  ;;  %2007 = vst [vmem:[%s2746_s20 + $0x8a8] sm:$0xff] %v1495_v40  ;;  %v988_v48 = vmul.f32 %v2716_v7, %v475_v30  ;;  %v989_v49 = vmul.f32 %v2716_v7, %v476_v35  ;;  %v990_v50 = vmul.f32 %v2716_v7, %v477_v36  ;;  %v497_v38 = vld [vmem:[%s2703_s24 + $0x988] sm:$0xff]  ;;  %v498_v39 = vld [vmem:[%s2703_s24 + $0x990] sm:$0xff] }
 0x111   : > { %2008 = vst [vmem:[%s2746_s20 + $0x8b0] sm:$0xff] %v1496_v41  ;;  %v991_v51 = vmul.f32 %v2716_v7, %v478_v37  ;;  %2009 = vst [vmem:[%s2746_s20 + $0x8b8] sm:$0xff] %v1497_v43  ;;  %v1498_v55 = vadd.f32 %v2720_v10, %v985_v44  ;;  %v1499_v56 = vadd.f32 %v2720_v10, %v986_v45  ;;  %v499_v40 = vld [vmem:[%s2703_s24 + $0x998] sm:$0xff]  ;;  %v500_v45 = vld [vmem:[%s2703_s24 + $0x9a0] sm:$0xff] }
 0x112   : > { %v1500_v57 = vadd.f32 %v2720_v10, %v987_v46  ;;  %v992_v58 = vmul.f32 %v2716_v7, %v479_v42  ;;  %v1501_v62 = vadd.f32 %v2720_v10, %v988_v48  ;;  %v1502_v63 = vadd.f32 %v2720_v10, %v989_v49  ;;  %v501_v46 = vld [vmem:[%s2703_s24 + $0x9a8] sm:$0xff] }
 0x113   : > { %v1503_v0 = vadd.f32 %v2720_v10, %v990_v50  ;;  %v1504_v1 = vadd.f32 %v2720_v10, %v991_v51  ;;  %2010 = vst [vmem:[%s2746_s20 + $0x8c0] sm:$0xff] %v1498_v55  ;;  %2011 = vst [vmem:[%s2746_s20 + $0x8c8] sm:$0xff] %v1499_v56  ;;  %v993_v4 = vmul.f32 %v2716_v7, %v480_v47  ;;  %v502_v47 = vld [vmem:[%s2703_s24 + $0x9b0] sm:$0xff] }
 0x114   : > { %2012 = vst [vmem:[%s2746_s20 + $0x8d0] sm:$0xff] %v1500_v57  ;;  %v1505_v3 = vadd.f32 %v2720_v10, %v992_v58  ;;  %v994_v5 = vmul.f32 %v2716_v7, %v481_v52  ;;  %v995_v6 = vmul.f32 %v2716_v7, %v482_v53  ;;  %2013 = vst [vmem:[%s2746_s20 + $0x8d8] sm:$0xff] %v1501_v62  ;;  %v503_v52 = vld [vmem:[%s2703_s24 + $0x9b8] sm:$0xff]  ;;  %v504_v57 = vld [vmem:[%s2703_s24 + $0x9c0] sm:$0xff] }
 0x115   : > { %2014 = vst [vmem:[%s2746_s20 + $0x8e0] sm:$0xff] %v1502_v63  ;;  %2015 = vst [vmem:[%s2746_s20 + $0x8e8] sm:$0xff] %v1503_v0  ;;  %v996_v9 = vmul.f32 %v2716_v7, %v483_v54  ;;  %v997_v11 = vmul.f32 %v2716_v7, %v484_v59  ;;  %v998_v12 = vmul.f32 %v2716_v7, %v485_v60  ;;  %v505_v62 = vld [vmem:[%s2703_s24 + $0x9c8] sm:$0xff]  ;;  %v506_v63 = vld [vmem:[%s2703_s24 + $0x9d0] sm:$0xff] }
 0x116   : > { %2016 = vst [vmem:[%s2746_s20 + $0x8f0] sm:$0xff] %v1504_v1  ;;  %v999_v13 = vmul.f32 %v2716_v7, %v486_v61  ;;  %2017 = vst [vmem:[%s2746_s20 + $0x8f8] sm:$0xff] %v1505_v3  ;;  %v1506_v17 = vadd.f32 %v2720_v10, %v993_v4  ;;  %v1507_v18 = vadd.f32 %v2720_v10, %v994_v5  ;;  %v507_v0 = vld [vmem:[%s2703_s24 + $0x9d8] sm:$0xff]  ;;  %v508_v5 = vld [vmem:[%s2703_s24 + $0x9e0] sm:$0xff] }
 0x117   : > { %v1508_v19 = vadd.f32 %v2720_v10, %v995_v6  ;;  %v1000_v20 = vmul.f32 %v2716_v7, %v487_v2  ;;  %v1509_v24 = vadd.f32 %v2720_v10, %v996_v9  ;;  %v1510_v25 = vadd.f32 %v2720_v10, %v997_v11  ;;  %v509_v6 = vld [vmem:[%s2703_s24 + $0x9e8] sm:$0xff] }
 0x118   : > { %v1511_v26 = vadd.f32 %v2720_v10, %v998_v12  ;;  %v1512_v27 = vadd.f32 %v2720_v10, %v999_v13  ;;  %2018 = vst [vmem:[%s2746_s20 + $0x900] sm:$0xff] %v1506_v17  ;;  %2019 = vst [vmem:[%s2746_s20 + $0x908] sm:$0xff] %v1507_v18  ;;  %v1001_v30 = vmul.f32 %v2716_v7, %v488_v8  ;;  %v510_v8 = vld [vmem:[%s2703_s24 + $0x9f0] sm:$0xff] }
 0x119   : > { %2020 = vst [vmem:[%s2746_s20 + $0x910] sm:$0xff] %v1508_v19  ;;  %v1513_v29 = vadd.f32 %v2720_v10, %v1000_v20  ;;  %v1002_v31 = vmul.f32 %v2716_v7, %v489_v14  ;;  %v1003_v32 = vmul.f32 %v2716_v7, %v490_v15  ;;  %2021 = vst [vmem:[%s2746_s20 + $0x918] sm:$0xff] %v1509_v24  ;;  %v511_v14 = vld [vmem:[%s2703_s24 + $0x9f8] sm:$0xff]  ;;  %v512_v19 = vld [vmem:[%s2703_s24 + $0xa00] sm:$0xff] }
 0x11a   : > { %2022 = vst [vmem:[%s2746_s20 + $0x920] sm:$0xff] %v1510_v25  ;;  %2023 = vst [vmem:[%s2746_s20 + $0x928] sm:$0xff] %v1511_v26  ;;  %v1004_v34 = vmul.f32 %v2716_v7, %v491_v16  ;;  %v1005_v35 = vmul.f32 %v2716_v7, %v492_v21  ;;  %v1006_v36 = vmul.f32 %v2716_v7, %v493_v22  ;;  %v513_v24 = vld [vmem:[%s2703_s24 + $0xa08] sm:$0xff]  ;;  %v514_v25 = vld [vmem:[%s2703_s24 + $0xa10] sm:$0xff] }
 0x11b   : > { %2024 = vst [vmem:[%s2746_s20 + $0x930] sm:$0xff] %v1512_v27  ;;  %v1007_v37 = vmul.f32 %v2716_v7, %v494_v23  ;;  %2025 = vst [vmem:[%s2746_s20 + $0x938] sm:$0xff] %v1513_v29  ;;  %v1514_v41 = vadd.f32 %v2720_v10, %v1001_v30  ;;  %v1515_v42 = vadd.f32 %v2720_v10, %v1002_v31  ;;  %v515_v26 = vld [vmem:[%s2703_s24 + $0xa18] sm:$0xff]  ;;  %v516_v31 = vld [vmem:[%s2703_s24 + $0xa20] sm:$0xff] }
 0x11c   : > { %v1516_v43 = vadd.f32 %v2720_v10, %v1003_v32  ;;  %v1008_v44 = vmul.f32 %v2716_v7, %v495_v28  ;;  %v1517_v48 = vadd.f32 %v2720_v10, %v1004_v34  ;;  %v1518_v49 = vadd.f32 %v2720_v10, %v1005_v35  ;;  %v517_v32 = vld [vmem:[%s2703_s24 + $0xa28] sm:$0xff] }
 0x11d   : > { %v1519_v50 = vadd.f32 %v2720_v10, %v1006_v36  ;;  %v1520_v51 = vadd.f32 %v2720_v10, %v1007_v37  ;;  %2026 = vst [vmem:[%s2746_s20 + $0x940] sm:$0xff] %v1514_v41  ;;  %2027 = vst [vmem:[%s2746_s20 + $0x948] sm:$0xff] %v1515_v42  ;;  %v1009_v54 = vmul.f32 %v2716_v7, %v496_v33  ;;  %v518_v33 = vld [vmem:[%s2703_s24 + $0xa30] sm:$0xff] }
 0x11e   : > { %2028 = vst [vmem:[%s2746_s20 + $0x950] sm:$0xff] %v1516_v43  ;;  %v1521_v53 = vadd.f32 %v2720_v10, %v1008_v44  ;;  %v1010_v55 = vmul.f32 %v2716_v7, %v497_v38  ;;  %v1011_v56 = vmul.f32 %v2716_v7, %v498_v39  ;;  %2029 = vst [vmem:[%s2746_s20 + $0x958] sm:$0xff] %v1517_v48  ;;  %v519_v38 = vld [vmem:[%s2703_s24 + $0xa38] sm:$0xff]  ;;  %v520_v43 = vld [vmem:[%s2703_s24 + $0xa40] sm:$0xff] }
 0x11f   : > { %2030 = vst [vmem:[%s2746_s20 + $0x960] sm:$0xff] %v1518_v49  ;;  %2031 = vst [vmem:[%s2746_s20 + $0x968] sm:$0xff] %v1519_v50  ;;  %v1012_v58 = vmul.f32 %v2716_v7, %v499_v40  ;;  %v1013_v59 = vmul.f32 %v2716_v7, %v500_v45  ;;  %v1014_v60 = vmul.f32 %v2716_v7, %v501_v46  ;;  %v521_v48 = vld [vmem:[%s2703_s24 + $0xa48] sm:$0xff]  ;;  %v522_v49 = vld [vmem:[%s2703_s24 + $0xa50] sm:$0xff] }
 0x120   : > { %2032 = vst [vmem:[%s2746_s20 + $0x970] sm:$0xff] %v1520_v51  ;;  %v1015_v61 = vmul.f32 %v2716_v7, %v502_v47  ;;  %2033 = vst [vmem:[%s2746_s20 + $0x978] sm:$0xff] %v1521_v53  ;;  %v1522_v1 = vadd.f32 %v2720_v10, %v1009_v54  ;;  %v1523_v2 = vadd.f32 %v2720_v10, %v1010_v55  ;;  %v523_v50 = vld [vmem:[%s2703_s24 + $0xa58] sm:$0xff]  ;;  %v524_v55 = vld [vmem:[%s2703_s24 + $0xa60] sm:$0xff] }
 0x121   : > { %v1524_v3 = vadd.f32 %v2720_v10, %v1011_v56  ;;  %v1016_v4 = vmul.f32 %v2716_v7, %v503_v52  ;;  %v1525_v9 = vadd.f32 %v2720_v10, %v1012_v58  ;;  %v1526_v11 = vadd.f32 %v2720_v10, %v1013_v59  ;;  %v525_v56 = vld [vmem:[%s2703_s24 + $0xa68] sm:$0xff] }
 0x122   : > { %v1527_v12 = vadd.f32 %v2720_v10, %v1014_v60  ;;  %v1528_v13 = vadd.f32 %v2720_v10, %v1015_v61  ;;  %2034 = vst [vmem:[%s2746_s20 + $0x980] sm:$0xff] %v1522_v1  ;;  %2035 = vst [vmem:[%s2746_s20 + $0x988] sm:$0xff] %v1523_v2  ;;  %v1017_v16 = vmul.f32 %v2716_v7, %v504_v57  ;;  %v526_v57 = vld [vmem:[%s2703_s24 + $0xa70] sm:$0xff] }
 0x123   : > { %2036 = vst [vmem:[%s2746_s20 + $0x990] sm:$0xff] %v1524_v3  ;;  %v1529_v15 = vadd.f32 %v2720_v10, %v1016_v4  ;;  %v1018_v17 = vmul.f32 %v2716_v7, %v505_v62  ;;  %v1019_v18 = vmul.f32 %v2716_v7, %v506_v63  ;;  %2037 = vst [vmem:[%s2746_s20 + $0x998] sm:$0xff] %v1525_v9  ;;  %v527_v62 = vld [vmem:[%s2703_s24 + $0xa78] sm:$0xff]  ;;  %v528_v3 = vld [vmem:[%s2703_s24 + $0xa80] sm:$0xff] }
 0x124   : > { %2038 = vst [vmem:[%s2746_s20 + $0x9a0] sm:$0xff] %v1526_v11  ;;  %2039 = vst [vmem:[%s2746_s20 + $0x9a8] sm:$0xff] %v1527_v12  ;;  %v1020_v20 = vmul.f32 %v2716_v7, %v507_v0  ;;  %v1021_v21 = vmul.f32 %v2716_v7, %v508_v5  ;;  %v1022_v22 = vmul.f32 %v2716_v7, %v509_v6  ;;  %v529_v9 = vld [vmem:[%s2703_s24 + $0xa88] sm:$0xff]  ;;  %v530_v11 = vld [vmem:[%s2703_s24 + $0xa90] sm:$0xff] }
 0x125   : > { %2040 = vst [vmem:[%s2746_s20 + $0x9b0] sm:$0xff] %v1528_v13  ;;  %v1023_v23 = vmul.f32 %v2716_v7, %v510_v8  ;;  %2041 = vst [vmem:[%s2746_s20 + $0x9b8] sm:$0xff] %v1529_v15  ;;  %v1530_v27 = vadd.f32 %v2720_v10, %v1017_v16  ;;  %v1531_v28 = vadd.f32 %v2720_v10, %v1018_v17  ;;  %v531_v12 = vld [vmem:[%s2703_s24 + $0xa98] sm:$0xff]  ;;  %v532_v17 = vld [vmem:[%s2703_s24 + $0xaa0] sm:$0xff] }
 0x126   : > { %v1532_v29 = vadd.f32 %v2720_v10, %v1019_v18  ;;  %v1024_v30 = vmul.f32 %v2716_v7, %v511_v14  ;;  %v1533_v34 = vadd.f32 %v2720_v10, %v1020_v20  ;;  %v1534_v35 = vadd.f32 %v2720_v10, %v1021_v21  ;;  %v533_v18 = vld [vmem:[%s2703_s24 + $0xaa8] sm:$0xff] }
 0x127   : > { %v1535_v36 = vadd.f32 %v2720_v10, %v1022_v22  ;;  %v1536_v37 = vadd.f32 %v2720_v10, %v1023_v23  ;;  %2042 = vst [vmem:[%s2746_s20 + $0x9c0] sm:$0xff] %v1530_v27  ;;  %2043 = vst [vmem:[%s2746_s20 + $0x9c8] sm:$0xff] %v1531_v28  ;;  %v1025_v40 = vmul.f32 %v2716_v7, %v512_v19  ;;  %v534_v19 = vld [vmem:[%s2703_s24 + $0xab0] sm:$0xff] }
 0x128   : > { %2044 = vst [vmem:[%s2746_s20 + $0x9d0] sm:$0xff] %v1532_v29  ;;  %v1537_v39 = vadd.f32 %v2720_v10, %v1024_v30  ;;  %v1026_v41 = vmul.f32 %v2716_v7, %v513_v24  ;;  %v1027_v42 = vmul.f32 %v2716_v7, %v514_v25  ;;  %2045 = vst [vmem:[%s2746_s20 + $0x9d8] sm:$0xff] %v1533_v34  ;;  %v535_v24 = vld [vmem:[%s2703_s24 + $0xab8] sm:$0xff]  ;;  %v536_v29 = vld [vmem:[%s2703_s24 + $0xac0] sm:$0xff] }
 0x129   : > { %2046 = vst [vmem:[%s2746_s20 + $0x9e0] sm:$0xff] %v1534_v35  ;;  %2047 = vst [vmem:[%s2746_s20 + $0x9e8] sm:$0xff] %v1535_v36  ;;  %v1028_v44 = vmul.f32 %v2716_v7, %v515_v26  ;;  %v1029_v45 = vmul.f32 %v2716_v7, %v516_v31  ;;  %v1030_v46 = vmul.f32 %v2716_v7, %v517_v32  ;;  %v537_v34 = vld [vmem:[%s2703_s24 + $0xac8] sm:$0xff]  ;;  %v538_v35 = vld [vmem:[%s2703_s24 + $0xad0] sm:$0xff] }
 0x12a   : > { %2048 = vst [vmem:[%s2746_s20 + $0x9f0] sm:$0xff] %v1536_v37  ;;  %v1031_v47 = vmul.f32 %v2716_v7, %v518_v33  ;;  %2049 = vst [vmem:[%s2746_s20 + $0x9f8] sm:$0xff] %v1537_v39  ;;  %v1538_v51 = vadd.f32 %v2720_v10, %v1025_v40  ;;  %v1539_v52 = vadd.f32 %v2720_v10, %v1026_v41  ;;  %v539_v36 = vld [vmem:[%s2703_s24 + $0xad8] sm:$0xff]  ;;  %v540_v41 = vld [vmem:[%s2703_s24 + $0xae0] sm:$0xff] }
 0x12b   : > { %v1540_v53 = vadd.f32 %v2720_v10, %v1027_v42  ;;  %v1032_v54 = vmul.f32 %v2716_v7, %v519_v38  ;;  %v1541_v58 = vadd.f32 %v2720_v10, %v1028_v44  ;;  %v1542_v59 = vadd.f32 %v2720_v10, %v1029_v45  ;;  %v541_v42 = vld [vmem:[%s2703_s24 + $0xae8] sm:$0xff] }
 0x12c   : > { %v1543_v60 = vadd.f32 %v2720_v10, %v1030_v46  ;;  %v1544_v61 = vadd.f32 %v2720_v10, %v1031_v47  ;;  %2050 = vst [vmem:[%s2746_s20 + $0xa00] sm:$0xff] %v1538_v51  ;;  %2051 = vst [vmem:[%s2746_s20 + $0xa08] sm:$0xff] %v1539_v52  ;;  %v1033_v0 = vmul.f32 %v2716_v7, %v520_v43  ;;  %v542_v43 = vld [vmem:[%s2703_s24 + $0xaf0] sm:$0xff] }
 0x12d   : > { %2052 = vst [vmem:[%s2746_s20 + $0xa10] sm:$0xff] %v1540_v53  ;;  %v1545_v63 = vadd.f32 %v2720_v10, %v1032_v54  ;;  %v1034_v1 = vmul.f32 %v2716_v7, %v521_v48  ;;  %v1035_v2 = vmul.f32 %v2716_v7, %v522_v49  ;;  %2053 = vst [vmem:[%s2746_s20 + $0xa18] sm:$0xff] %v1541_v58  ;;  %v543_v48 = vld [vmem:[%s2703_s24 + $0xaf8] sm:$0xff]  ;;  %v544_v53 = vld [vmem:[%s2703_s24 + $0xb00] sm:$0xff] }
 0x12e   : > { %2054 = vst [vmem:[%s2746_s20 + $0xa20] sm:$0xff] %v1542_v59  ;;  %2055 = vst [vmem:[%s2746_s20 + $0xa28] sm:$0xff] %v1543_v60  ;;  %v1036_v4 = vmul.f32 %v2716_v7, %v523_v50  ;;  %v1037_v5 = vmul.f32 %v2716_v7, %v524_v55  ;;  %v1038_v6 = vmul.f32 %v2716_v7, %v525_v56  ;;  %v545_v58 = vld [vmem:[%s2703_s24 + $0xb08] sm:$0xff]  ;;  %v546_v59 = vld [vmem:[%s2703_s24 + $0xb10] sm:$0xff] }
 0x12f   : > { %2056 = vst [vmem:[%s2746_s20 + $0xa30] sm:$0xff] %v1544_v61  ;;  %v1039_v8 = vmul.f32 %v2716_v7, %v526_v57  ;;  %2057 = vst [vmem:[%s2746_s20 + $0xa38] sm:$0xff] %v1545_v63  ;;  %v1546_v13 = vadd.f32 %v2720_v10, %v1033_v0  ;;  %v1547_v14 = vadd.f32 %v2720_v10, %v1034_v1  ;;  %v547_v60 = vld [vmem:[%s2703_s24 + $0xb18] sm:$0xff]  ;;  %v548_v1 = vld [vmem:[%s2703_s24 + $0xb20] sm:$0xff] }
 0x130   : > { %v1548_v15 = vadd.f32 %v2720_v10, %v1035_v2  ;;  %v1040_v16 = vmul.f32 %v2716_v7, %v527_v62  ;;  %v1549_v20 = vadd.f32 %v2720_v10, %v1036_v4  ;;  %v1550_v21 = vadd.f32 %v2720_v10, %v1037_v5  ;;  %v549_v2 = vld [vmem:[%s2703_s24 + $0xb28] sm:$0xff] }
 0x131   : > { %v1551_v22 = vadd.f32 %v2720_v10, %v1038_v6  ;;  %v1552_v23 = vadd.f32 %v2720_v10, %v1039_v8  ;;  %2058 = vst [vmem:[%s2746_s20 + $0xa40] sm:$0xff] %v1546_v13  ;;  %2059 = vst [vmem:[%s2746_s20 + $0xa48] sm:$0xff] %v1547_v14  ;;  %v1041_v26 = vmul.f32 %v2716_v7, %v528_v3  ;;  %v550_v3 = vld [vmem:[%s2703_s24 + $0xb30] sm:$0xff] }
 0x132   : > { %2060 = vst [vmem:[%s2746_s20 + $0xa50] sm:$0xff] %v1548_v15  ;;  %v1553_v25 = vadd.f32 %v2720_v10, %v1040_v16  ;;  %v1042_v27 = vmul.f32 %v2716_v7, %v529_v9  ;;  %v1043_v28 = vmul.f32 %v2716_v7, %v530_v11  ;;  %2061 = vst [vmem:[%s2746_s20 + $0xa58] sm:$0xff] %v1549_v20  ;;  %v551_v9 = vld [vmem:[%s2703_s24 + $0xb38] sm:$0xff]  ;;  %v552_v15 = vld [vmem:[%s2703_s24 + $0xb40] sm:$0xff] }
 0x133   : > { %2062 = vst [vmem:[%s2746_s20 + $0xa60] sm:$0xff] %v1550_v21  ;;  %2063 = vst [vmem:[%s2746_s20 + $0xa68] sm:$0xff] %v1551_v22  ;;  %v1044_v30 = vmul.f32 %v2716_v7, %v531_v12  ;;  %v1045_v31 = vmul.f32 %v2716_v7, %v532_v17  ;;  %v1046_v32 = vmul.f32 %v2716_v7, %v533_v18  ;;  %v553_v20 = vld [vmem:[%s2703_s24 + $0xb48] sm:$0xff]  ;;  %v554_v21 = vld [vmem:[%s2703_s24 + $0xb50] sm:$0xff] }
 0x134   : > { %2064 = vst [vmem:[%s2746_s20 + $0xa70] sm:$0xff] %v1552_v23  ;;  %v1047_v33 = vmul.f32 %v2716_v7, %v534_v19  ;;  %2065 = vst [vmem:[%s2746_s20 + $0xa78] sm:$0xff] %v1553_v25  ;;  %v1554_v37 = vadd.f32 %v2720_v10, %v1041_v26  ;;  %v1555_v38 = vadd.f32 %v2720_v10, %v1042_v27  ;;  %v555_v22 = vld [vmem:[%s2703_s24 + $0xb58] sm:$0xff]  ;;  %v556_v27 = vld [vmem:[%s2703_s24 + $0xb60] sm:$0xff] }
 0x135   : > { %v1556_v39 = vadd.f32 %v2720_v10, %v1043_v28  ;;  %v1048_v40 = vmul.f32 %v2716_v7, %v535_v24  ;;  %v1557_v44 = vadd.f32 %v2720_v10, %v1044_v30  ;;  %v1558_v45 = vadd.f32 %v2720_v10, %v1045_v31  ;;  %v557_v28 = vld [vmem:[%s2703_s24 + $0xb68] sm:$0xff] }
 0x136   : > { %v1559_v46 = vadd.f32 %v2720_v10, %v1046_v32  ;;  %v1560_v47 = vadd.f32 %v2720_v10, %v1047_v33  ;;  %2066 = vst [vmem:[%s2746_s20 + $0xa80] sm:$0xff] %v1554_v37  ;;  %2067 = vst [vmem:[%s2746_s20 + $0xa88] sm:$0xff] %v1555_v38  ;;  %v1049_v50 = vmul.f32 %v2716_v7, %v536_v29  ;;  %v558_v29 = vld [vmem:[%s2703_s24 + $0xb70] sm:$0xff] }
 0x137   : > { %2068 = vst [vmem:[%s2746_s20 + $0xa90] sm:$0xff] %v1556_v39  ;;  %v1561_v49 = vadd.f32 %v2720_v10, %v1048_v40  ;;  %v1050_v51 = vmul.f32 %v2716_v7, %v537_v34  ;;  %v1051_v52 = vmul.f32 %v2716_v7, %v538_v35  ;;  %2069 = vst [vmem:[%s2746_s20 + $0xa98] sm:$0xff] %v1557_v44  ;;  %v559_v34 = vld [vmem:[%s2703_s24 + $0xb78] sm:$0xff]  ;;  %v560_v39 = vld [vmem:[%s2703_s24 + $0xb80] sm:$0xff] }
 0x138   : > { %2070 = vst [vmem:[%s2746_s20 + $0xaa0] sm:$0xff] %v1558_v45  ;;  %2071 = vst [vmem:[%s2746_s20 + $0xaa8] sm:$0xff] %v1559_v46  ;;  %v1052_v54 = vmul.f32 %v2716_v7, %v539_v36  ;;  %v1053_v55 = vmul.f32 %v2716_v7, %v540_v41  ;;  %v1054_v56 = vmul.f32 %v2716_v7, %v541_v42  ;;  %v561_v44 = vld [vmem:[%s2703_s24 + $0xb88] sm:$0xff]  ;;  %v562_v45 = vld [vmem:[%s2703_s24 + $0xb90] sm:$0xff] }
 0x139   : > { %2072 = vst [vmem:[%s2746_s20 + $0xab0] sm:$0xff] %v1560_v47  ;;  %v1055_v57 = vmul.f32 %v2716_v7, %v542_v43  ;;  %2073 = vst [vmem:[%s2746_s20 + $0xab8] sm:$0xff] %v1561_v49  ;;  %v1562_v61 = vadd.f32 %v2720_v10, %v1049_v50  ;;  %v1563_v62 = vadd.f32 %v2720_v10, %v1050_v51  ;;  %v563_v46 = vld [vmem:[%s2703_s24 + $0xb98] sm:$0xff]  ;;  %v564_v51 = vld [vmem:[%s2703_s24 + $0xba0] sm:$0xff] }
 0x13a   : > { %v1564_v63 = vadd.f32 %v2720_v10, %v1051_v52  ;;  %v1056_v0 = vmul.f32 %v2716_v7, %v543_v48  ;;  %v1565_v4 = vadd.f32 %v2720_v10, %v1052_v54  ;;  %v1566_v5 = vadd.f32 %v2720_v10, %v1053_v55  ;;  %v565_v52 = vld [vmem:[%s2703_s24 + $0xba8] sm:$0xff] }
 0x13b   : > { %v1567_v6 = vadd.f32 %v2720_v10, %v1054_v56  ;;  %v1568_v8 = vadd.f32 %v2720_v10, %v1055_v57  ;;  %2074 = vst [vmem:[%s2746_s20 + $0xac0] sm:$0xff] %v1562_v61  ;;  %2075 = vst [vmem:[%s2746_s20 + $0xac8] sm:$0xff] %v1563_v62  ;;  %v1057_v12 = vmul.f32 %v2716_v7, %v544_v53  ;;  %v566_v53 = vld [vmem:[%s2703_s24 + $0xbb0] sm:$0xff] }
 0x13c   : > { %2076 = vst [vmem:[%s2746_s20 + $0xad0] sm:$0xff] %v1564_v63  ;;  %v1569_v11 = vadd.f32 %v2720_v10, %v1056_v0  ;;  %v1058_v13 = vmul.f32 %v2716_v7, %v545_v58  ;;  %v1059_v14 = vmul.f32 %v2716_v7, %v546_v59  ;;  %2077 = vst [vmem:[%s2746_s20 + $0xad8] sm:$0xff] %v1565_v4  ;;  %v567_v58 = vld [vmem:[%s2703_s24 + $0xbb8] sm:$0xff]  ;;  %v568_v63 = vld [vmem:[%s2703_s24 + $0xbc0] sm:$0xff] }
 0x13d   : > { %2078 = vst [vmem:[%s2746_s20 + $0xae0] sm:$0xff] %v1566_v5  ;;  %2079 = vst [vmem:[%s2746_s20 + $0xae8] sm:$0xff] %v1567_v6  ;;  %v1060_v16 = vmul.f32 %v2716_v7, %v547_v60  ;;  %v1061_v17 = vmul.f32 %v2716_v7, %v548_v1  ;;  %v1062_v18 = vmul.f32 %v2716_v7, %v549_v2  ;;  %v569_v4 = vld [vmem:[%s2703_s24 + $0xbc8] sm:$0xff]  ;;  %v570_v5 = vld [vmem:[%s2703_s24 + $0xbd0] sm:$0xff] }
 0x13e   : > { %2080 = vst [vmem:[%s2746_s20 + $0xaf0] sm:$0xff] %v1568_v8  ;;  %v1063_v19 = vmul.f32 %v2716_v7, %v550_v3  ;;  %2081 = vst [vmem:[%s2746_s20 + $0xaf8] sm:$0xff] %v1569_v11  ;;  %v1570_v23 = vadd.f32 %v2720_v10, %v1057_v12  ;;  %v1571_v24 = vadd.f32 %v2720_v10, %v1058_v13  ;;  %v571_v6 = vld [vmem:[%s2703_s24 + $0xbd8] sm:$0xff]  ;;  %v572_v13 = vld [vmem:[%s2703_s24 + $0xbe0] sm:$0xff] }
 0x13f   : > { %v1572_v25 = vadd.f32 %v2720_v10, %v1059_v14  ;;  %v1064_v26 = vmul.f32 %v2716_v7, %v551_v9  ;;  %v1573_v30 = vadd.f32 %v2720_v10, %v1060_v16  ;;  %v1574_v31 = vadd.f32 %v2720_v10, %v1061_v17  ;;  %v573_v14 = vld [vmem:[%s2703_s24 + $0xbe8] sm:$0xff] }
 0x140   : > { %v1575_v32 = vadd.f32 %v2720_v10, %v1062_v18  ;;  %v1576_v33 = vadd.f32 %v2720_v10, %v1063_v19  ;;  %2082 = vst [vmem:[%s2746_s20 + $0xb00] sm:$0xff] %v1570_v23  ;;  %2083 = vst [vmem:[%s2746_s20 + $0xb08] sm:$0xff] %v1571_v24  ;;  %v1065_v36 = vmul.f32 %v2716_v7, %v552_v15  ;;  %v574_v15 = vld [vmem:[%s2703_s24 + $0xbf0] sm:$0xff] }
 0x141   : > { %2084 = vst [vmem:[%s2746_s20 + $0xb10] sm:$0xff] %v1572_v25  ;;  %v1577_v35 = vadd.f32 %v2720_v10, %v1064_v26  ;;  %v1066_v37 = vmul.f32 %v2716_v7, %v553_v20  ;;  %v1067_v38 = vmul.f32 %v2716_v7, %v554_v21  ;;  %2085 = vst [vmem:[%s2746_s20 + $0xb18] sm:$0xff] %v1573_v30  ;;  %v575_v20 = vld [vmem:[%s2703_s24 + $0xbf8] sm:$0xff]  ;;  %v576_v25 = vld [vmem:[%s2703_s24 + $0xc00] sm:$0xff] }
 0x142   : > { %2086 = vst [vmem:[%s2746_s20 + $0xb20] sm:$0xff] %v1574_v31  ;;  %2087 = vst [vmem:[%s2746_s20 + $0xb28] sm:$0xff] %v1575_v32  ;;  %v1068_v40 = vmul.f32 %v2716_v7, %v555_v22  ;;  %v1069_v41 = vmul.f32 %v2716_v7, %v556_v27  ;;  %v1070_v42 = vmul.f32 %v2716_v7, %v557_v28  ;;  %v577_v30 = vld [vmem:[%s2703_s24 + $0xc08] sm:$0xff]  ;;  %v578_v31 = vld [vmem:[%s2703_s24 + $0xc10] sm:$0xff] }
 0x143   : > { %2088 = vst [vmem:[%s2746_s20 + $0xb30] sm:$0xff] %v1576_v33  ;;  %v1071_v43 = vmul.f32 %v2716_v7, %v558_v29  ;;  %2089 = vst [vmem:[%s2746_s20 + $0xb38] sm:$0xff] %v1577_v35  ;;  %v1578_v47 = vadd.f32 %v2720_v10, %v1065_v36  ;;  %v1579_v48 = vadd.f32 %v2720_v10, %v1066_v37  ;;  %v579_v32 = vld [vmem:[%s2703_s24 + $0xc18] sm:$0xff]  ;;  %v580_v37 = vld [vmem:[%s2703_s24 + $0xc20] sm:$0xff] }
 0x144   : > { %v1580_v49 = vadd.f32 %v2720_v10, %v1067_v38  ;;  %v1072_v50 = vmul.f32 %v2716_v7, %v559_v34  ;;  %v1581_v54 = vadd.f32 %v2720_v10, %v1068_v40  ;;  %v1582_v55 = vadd.f32 %v2720_v10, %v1069_v41  ;;  %v581_v38 = vld [vmem:[%s2703_s24 + $0xc28] sm:$0xff] }
 0x145   : > { %v1583_v56 = vadd.f32 %v2720_v10, %v1070_v42  ;;  %v1584_v57 = vadd.f32 %v2720_v10, %v1071_v43  ;;  %2090 = vst [vmem:[%s2746_s20 + $0xb40] sm:$0xff] %v1578_v47  ;;  %2091 = vst [vmem:[%s2746_s20 + $0xb48] sm:$0xff] %v1579_v48  ;;  %v1073_v60 = vmul.f32 %v2716_v7, %v560_v39  ;;  %v582_v39 = vld [vmem:[%s2703_s24 + $0xc30] sm:$0xff] }
 0x146   : > { %2092 = vst [vmem:[%s2746_s20 + $0xb50] sm:$0xff] %v1580_v49  ;;  %v1585_v59 = vadd.f32 %v2720_v10, %v1072_v50  ;;  %v1074_v61 = vmul.f32 %v2716_v7, %v561_v44  ;;  %v1075_v62 = vmul.f32 %v2716_v7, %v562_v45  ;;  %2093 = vst [vmem:[%s2746_s20 + $0xb58] sm:$0xff] %v1581_v54  ;;  %v583_v44 = vld [vmem:[%s2703_s24 + $0xc38] sm:$0xff]  ;;  %v584_v49 = vld [vmem:[%s2703_s24 + $0xc40] sm:$0xff] }
 0x147   : > { %2094 = vst [vmem:[%s2746_s20 + $0xb60] sm:$0xff] %v1582_v55  ;;  %2095 = vst [vmem:[%s2746_s20 + $0xb68] sm:$0xff] %v1583_v56  ;;  %v1076_v0 = vmul.f32 %v2716_v7, %v563_v46  ;;  %v1077_v1 = vmul.f32 %v2716_v7, %v564_v51  ;;  %v1078_v2 = vmul.f32 %v2716_v7, %v565_v52  ;;  %v585_v54 = vld [vmem:[%s2703_s24 + $0xc48] sm:$0xff]  ;;  %v586_v55 = vld [vmem:[%s2703_s24 + $0xc50] sm:$0xff] }
 0x148   : > { %2096 = vst [vmem:[%s2746_s20 + $0xb70] sm:$0xff] %v1584_v57  ;;  %v1079_v3 = vmul.f32 %v2716_v7, %v566_v53  ;;  %2097 = vst [vmem:[%s2746_s20 + $0xb78] sm:$0xff] %v1585_v59  ;;  %v1586_v8 = vadd.f32 %v2720_v10, %v1073_v60  ;;  %v1587_v9 = vadd.f32 %v2720_v10, %v1074_v61  ;;  %v587_v56 = vld [vmem:[%s2703_s24 + $0xc58] sm:$0xff]  ;;  %v588_v61 = vld [vmem:[%s2703_s24 + $0xc60] sm:$0xff] }
 0x149   : > { %v1588_v11 = vadd.f32 %v2720_v10, %v1075_v62  ;;  %v1080_v12 = vmul.f32 %v2716_v7, %v567_v58  ;;  %v1589_v16 = vadd.f32 %v2720_v10, %v1076_v0  ;;  %v1590_v17 = vadd.f32 %v2720_v10, %v1077_v1  ;;  %v589_v62 = vld [vmem:[%s2703_s24 + $0xc68] sm:$0xff] }
 0x14a   : > { %v1591_v18 = vadd.f32 %v2720_v10, %v1078_v2  ;;  %v1592_v19 = vadd.f32 %v2720_v10, %v1079_v3  ;;  %2098 = vst [vmem:[%s2746_s20 + $0xb80] sm:$0xff] %v1586_v8  ;;  %2099 = vst [vmem:[%s2746_s20 + $0xb88] sm:$0xff] %v1587_v9  ;;  %v1081_v22 = vmul.f32 %v2716_v7, %v568_v63  ;;  %v590_v63 = vld [vmem:[%s2703_s24 + $0xc70] sm:$0xff] }
 0x14b   : > { %2100 = vst [vmem:[%s2746_s20 + $0xb90] sm:$0xff] %v1588_v11  ;;  %v1593_v21 = vadd.f32 %v2720_v10, %v1080_v12  ;;  %v1082_v23 = vmul.f32 %v2716_v7, %v569_v4  ;;  %v1083_v24 = vmul.f32 %v2716_v7, %v570_v5  ;;  %2101 = vst [vmem:[%s2746_s20 + $0xb98] sm:$0xff] %v1589_v16  ;;  %v591_v4 = vld [vmem:[%s2703_s24 + $0xc78] sm:$0xff]  ;;  %v592_v11 = vld [vmem:[%s2703_s24 + $0xc80] sm:$0xff] }
 0x14c   : > { %2102 = vst [vmem:[%s2746_s20 + $0xba0] sm:$0xff] %v1590_v17  ;;  %2103 = vst [vmem:[%s2746_s20 + $0xba8] sm:$0xff] %v1591_v18  ;;  %v1084_v26 = vmul.f32 %v2716_v7, %v571_v6  ;;  %v1085_v27 = vmul.f32 %v2716_v7, %v572_v13  ;;  %v1086_v28 = vmul.f32 %v2716_v7, %v573_v14  ;;  %v593_v16 = vld [vmem:[%s2703_s24 + $0xc88] sm:$0xff]  ;;  %v594_v17 = vld [vmem:[%s2703_s24 + $0xc90] sm:$0xff] }
 0x14d   : > { %2104 = vst [vmem:[%s2746_s20 + $0xbb0] sm:$0xff] %v1592_v19  ;;  %v1087_v29 = vmul.f32 %v2716_v7, %v574_v15  ;;  %2105 = vst [vmem:[%s2746_s20 + $0xbb8] sm:$0xff] %v1593_v21  ;;  %v1594_v33 = vadd.f32 %v2720_v10, %v1081_v22  ;;  %v1595_v34 = vadd.f32 %v2720_v10, %v1082_v23  ;;  %v595_v18 = vld [vmem:[%s2703_s24 + $0xc98] sm:$0xff]  ;;  %v596_v23 = vld [vmem:[%s2703_s24 + $0xca0] sm:$0xff] }
 0x14e   : > { %v1596_v35 = vadd.f32 %v2720_v10, %v1083_v24  ;;  %v1088_v36 = vmul.f32 %v2716_v7, %v575_v20  ;;  %v1597_v40 = vadd.f32 %v2720_v10, %v1084_v26  ;;  %v1598_v41 = vadd.f32 %v2720_v10, %v1085_v27  ;;  %v597_v24 = vld [vmem:[%s2703_s24 + $0xca8] sm:$0xff] }
 0x14f   : > { %v1599_v42 = vadd.f32 %v2720_v10, %v1086_v28  ;;  %v1600_v43 = vadd.f32 %v2720_v10, %v1087_v29  ;;  %2106 = vst [vmem:[%s2746_s20 + $0xbc0] sm:$0xff] %v1594_v33  ;;  %2107 = vst [vmem:[%s2746_s20 + $0xbc8] sm:$0xff] %v1595_v34  ;;  %v1089_v46 = vmul.f32 %v2716_v7, %v576_v25  ;;  %v598_v25 = vld [vmem:[%s2703_s24 + $0xcb0] sm:$0xff] }
 0x150   : > { %2108 = vst [vmem:[%s2746_s20 + $0xbd0] sm:$0xff] %v1596_v35  ;;  %v1601_v45 = vadd.f32 %v2720_v10, %v1088_v36  ;;  %v1090_v47 = vmul.f32 %v2716_v7, %v577_v30  ;;  %v1091_v48 = vmul.f32 %v2716_v7, %v578_v31  ;;  %2109 = vst [vmem:[%s2746_s20 + $0xbd8] sm:$0xff] %v1597_v40  ;;  %v599_v30 = vld [vmem:[%s2703_s24 + $0xcb8] sm:$0xff]  ;;  %v600_v35 = vld [vmem:[%s2703_s24 + $0xcc0] sm:$0xff] }
 0x151   : > { %2110 = vst [vmem:[%s2746_s20 + $0xbe0] sm:$0xff] %v1598_v41  ;;  %2111 = vst [vmem:[%s2746_s20 + $0xbe8] sm:$0xff] %v1599_v42  ;;  %v1092_v50 = vmul.f32 %v2716_v7, %v579_v32  ;;  %v1093_v51 = vmul.f32 %v2716_v7, %v580_v37  ;;  %v1094_v52 = vmul.f32 %v2716_v7, %v581_v38  ;;  %v601_v40 = vld [vmem:[%s2703_s24 + $0xcc8] sm:$0xff]  ;;  %v602_v41 = vld [vmem:[%s2703_s24 + $0xcd0] sm:$0xff] }
 0x152   : > { %2112 = vst [vmem:[%s2746_s20 + $0xbf0] sm:$0xff] %v1600_v43  ;;  %v1095_v53 = vmul.f32 %v2716_v7, %v582_v39  ;;  %2113 = vst [vmem:[%s2746_s20 + $0xbf8] sm:$0xff] %v1601_v45  ;;  %v1602_v57 = vadd.f32 %v2720_v10, %v1089_v46  ;;  %v1603_v58 = vadd.f32 %v2720_v10, %v1090_v47  ;;  %v603_v42 = vld [vmem:[%s2703_s24 + $0xcd8] sm:$0xff]  ;;  %v604_v47 = vld [vmem:[%s2703_s24 + $0xce0] sm:$0xff] }
 0x153   : > { %v1604_v59 = vadd.f32 %v2720_v10, %v1091_v48  ;;  %v1096_v60 = vmul.f32 %v2716_v7, %v583_v44  ;;  %v1605_v0 = vadd.f32 %v2720_v10, %v1092_v50  ;;  %v1606_v1 = vadd.f32 %v2720_v10, %v1093_v51  ;;  %v605_v48 = vld [vmem:[%s2703_s24 + $0xce8] sm:$0xff] }
 0x154   : > { %v1607_v2 = vadd.f32 %v2720_v10, %v1094_v52  ;;  %v1608_v3 = vadd.f32 %v2720_v10, %v1095_v53  ;;  %2114 = vst [vmem:[%s2746_s20 + $0xc00] sm:$0xff] %v1602_v57  ;;  %2115 = vst [vmem:[%s2746_s20 + $0xc08] sm:$0xff] %v1603_v58  ;;  %v1097_v6 = vmul.f32 %v2716_v7, %v584_v49  ;;  %v606_v49 = vld [vmem:[%s2703_s24 + $0xcf0] sm:$0xff] }
 0x155   : > { %2116 = vst [vmem:[%s2746_s20 + $0xc10] sm:$0xff] %v1604_v59  ;;  %v1609_v5 = vadd.f32 %v2720_v10, %v1096_v60  ;;  %v1098_v8 = vmul.f32 %v2716_v7, %v585_v54  ;;  %v1099_v9 = vmul.f32 %v2716_v7, %v586_v55  ;;  %2117 = vst [vmem:[%s2746_s20 + $0xc18] sm:$0xff] %v1605_v0  ;;  %v607_v54 = vld [vmem:[%s2703_s24 + $0xcf8] sm:$0xff]  ;;  %v608_v59 = vld [vmem:[%s2703_s24 + $0xd00] sm:$0xff] }
 0x156   : > { %2118 = vst [vmem:[%s2746_s20 + $0xc20] sm:$0xff] %v1606_v1  ;;  %2119 = vst [vmem:[%s2746_s20 + $0xc28] sm:$0xff] %v1607_v2  ;;  %v1100_v12 = vmul.f32 %v2716_v7, %v587_v56  ;;  %v1101_v13 = vmul.f32 %v2716_v7, %v588_v61  ;;  %v1102_v14 = vmul.f32 %v2716_v7, %v589_v62  ;;  %v609_v0 = vld [vmem:[%s2703_s24 + $0xd08] sm:$0xff]  ;;  %v610_v1 = vld [vmem:[%s2703_s24 + $0xd10] sm:$0xff] }
 0x157   : > { %2120 = vst [vmem:[%s2746_s20 + $0xc30] sm:$0xff] %v1608_v3  ;;  %v1103_v15 = vmul.f32 %v2716_v7, %v590_v63  ;;  %2121 = vst [vmem:[%s2746_s20 + $0xc38] sm:$0xff] %v1609_v5  ;;  %v1610_v19 = vadd.f32 %v2720_v10, %v1097_v6  ;;  %v1611_v20 = vadd.f32 %v2720_v10, %v1098_v8  ;;  %v611_v2 = vld [vmem:[%s2703_s24 + $0xd18] sm:$0xff]  ;;  %v612_v8 = vld [vmem:[%s2703_s24 + $0xd20] sm:$0xff] }
 0x158   : > { %v1612_v21 = vadd.f32 %v2720_v10, %v1099_v9  ;;  %v1104_v22 = vmul.f32 %v2716_v7, %v591_v4  ;;  %v1613_v26 = vadd.f32 %v2720_v10, %v1100_v12  ;;  %v1614_v27 = vadd.f32 %v2720_v10, %v1101_v13  ;;  %v613_v9 = vld [vmem:[%s2703_s24 + $0xd28] sm:$0xff] }
 0x159   : > { %v1615_v28 = vadd.f32 %v2720_v10, %v1102_v14  ;;  %v1616_v29 = vadd.f32 %v2720_v10, %v1103_v15  ;;  %2122 = vst [vmem:[%s2746_s20 + $0xc40] sm:$0xff] %v1610_v19  ;;  %2123 = vst [vmem:[%s2746_s20 + $0xc48] sm:$0xff] %v1611_v20  ;;  %v1105_v32 = vmul.f32 %v2716_v7, %v592_v11  ;;  %v614_v11 = vld [vmem:[%s2703_s24 + $0xd30] sm:$0xff] }
 0x15a   : > { %2124 = vst [vmem:[%s2746_s20 + $0xc50] sm:$0xff] %v1612_v21  ;;  %v1617_v31 = vadd.f32 %v2720_v10, %v1104_v22  ;;  %v1106_v33 = vmul.f32 %v2716_v7, %v593_v16  ;;  %v1107_v34 = vmul.f32 %v2716_v7, %v594_v17  ;;  %2125 = vst [vmem:[%s2746_s20 + $0xc58] sm:$0xff] %v1613_v26  ;;  %v615_v16 = vld [vmem:[%s2703_s24 + $0xd38] sm:$0xff]  ;;  %v616_v21 = vld [vmem:[%s2703_s24 + $0xd40] sm:$0xff] }
 0x15b   : > { %2126 = vst [vmem:[%s2746_s20 + $0xc60] sm:$0xff] %v1614_v27  ;;  %2127 = vst [vmem:[%s2746_s20 + $0xc68] sm:$0xff] %v1615_v28  ;;  %v1108_v36 = vmul.f32 %v2716_v7, %v595_v18  ;;  %v1109_v37 = vmul.f32 %v2716_v7, %v596_v23  ;;  %v1110_v38 = vmul.f32 %v2716_v7, %v597_v24  ;;  %v617_v26 = vld [vmem:[%s2703_s24 + $0xd48] sm:$0xff]  ;;  %v618_v27 = vld [vmem:[%s2703_s24 + $0xd50] sm:$0xff] }
 0x15c   : > { %2128 = vst [vmem:[%s2746_s20 + $0xc70] sm:$0xff] %v1616_v29  ;;  %v1111_v39 = vmul.f32 %v2716_v7, %v598_v25  ;;  %2129 = vst [vmem:[%s2746_s20 + $0xc78] sm:$0xff] %v1617_v31  ;;  %v1618_v43 = vadd.f32 %v2720_v10, %v1105_v32  ;;  %v1619_v44 = vadd.f32 %v2720_v10, %v1106_v33  ;;  %v619_v28 = vld [vmem:[%s2703_s24 + $0xd58] sm:$0xff]  ;;  %v620_v33 = vld [vmem:[%s2703_s24 + $0xd60] sm:$0xff] }
 0x15d   : > { %v1620_v45 = vadd.f32 %v2720_v10, %v1107_v34  ;;  %v1112_v46 = vmul.f32 %v2716_v7, %v599_v30  ;;  %v1621_v50 = vadd.f32 %v2720_v10, %v1108_v36  ;;  %v1622_v51 = vadd.f32 %v2720_v10, %v1109_v37  ;;  %v621_v34 = vld [vmem:[%s2703_s24 + $0xd68] sm:$0xff] }
 0x15e   : > { %v1623_v52 = vadd.f32 %v2720_v10, %v1110_v38  ;;  %v1624_v53 = vadd.f32 %v2720_v10, %v1111_v39  ;;  %2130 = vst [vmem:[%s2746_s20 + $0xc80] sm:$0xff] %v1618_v43  ;;  %2131 = vst [vmem:[%s2746_s20 + $0xc88] sm:$0xff] %v1619_v44  ;;  %v1113_v56 = vmul.f32 %v2716_v7, %v600_v35  ;;  %v622_v35 = vld [vmem:[%s2703_s24 + $0xd70] sm:$0xff] }
 0x15f   : > { %2132 = vst [vmem:[%s2746_s20 + $0xc90] sm:$0xff] %v1620_v45  ;;  %v1625_v55 = vadd.f32 %v2720_v10, %v1112_v46  ;;  %v1114_v57 = vmul.f32 %v2716_v7, %v601_v40  ;;  %v1115_v58 = vmul.f32 %v2716_v7, %v602_v41  ;;  %2133 = vst [vmem:[%s2746_s20 + $0xc98] sm:$0xff] %v1621_v50  ;;  %v623_v40 = vld [vmem:[%s2703_s24 + $0xd78] sm:$0xff]  ;;  %v624_v45 = vld [vmem:[%s2703_s24 + $0xd80] sm:$0xff] }
 0x160   : > { %2134 = vst [vmem:[%s2746_s20 + $0xca0] sm:$0xff] %v1622_v51  ;;  %2135 = vst [vmem:[%s2746_s20 + $0xca8] sm:$0xff] %v1623_v52  ;;  %v1116_v60 = vmul.f32 %v2716_v7, %v603_v42  ;;  %v1117_v61 = vmul.f32 %v2716_v7, %v604_v47  ;;  %v1118_v62 = vmul.f32 %v2716_v7, %v605_v48  ;;  %v625_v50 = vld [vmem:[%s2703_s24 + $0xd88] sm:$0xff]  ;;  %v626_v51 = vld [vmem:[%s2703_s24 + $0xd90] sm:$0xff] }
 0x161   : > { %2136 = vst [vmem:[%s2746_s20 + $0xcb0] sm:$0xff] %v1624_v53  ;;  %v1119_v63 = vmul.f32 %v2716_v7, %v606_v49  ;;  %2137 = vst [vmem:[%s2746_s20 + $0xcb8] sm:$0xff] %v1625_v55  ;;  %v1626_v3 = vadd.f32 %v2720_v10, %v1113_v56  ;;  %v1627_v4 = vadd.f32 %v2720_v10, %v1114_v57  ;;  %v627_v52 = vld [vmem:[%s2703_s24 + $0xd98] sm:$0xff]  ;;  %v628_v57 = vld [vmem:[%s2703_s24 + $0xda0] sm:$0xff] }
 0x162   : > { %v1628_v5 = vadd.f32 %v2720_v10, %v1115_v58  ;;  %v1120_v6 = vmul.f32 %v2716_v7, %v607_v54  ;;  %v1629_v12 = vadd.f32 %v2720_v10, %v1116_v60  ;;  %v1630_v13 = vadd.f32 %v2720_v10, %v1117_v61  ;;  %v629_v58 = vld [vmem:[%s2703_s24 + $0xda8] sm:$0xff] }
 0x163   : > { %v1631_v14 = vadd.f32 %v2720_v10, %v1118_v62  ;;  %v1632_v15 = vadd.f32 %v2720_v10, %v1119_v63  ;;  %2138 = vst [vmem:[%s2746_s20 + $0xcc0] sm:$0xff] %v1626_v3  ;;  %2139 = vst [vmem:[%s2746_s20 + $0xcc8] sm:$0xff] %v1627_v4  ;;  %v1121_v18 = vmul.f32 %v2716_v7, %v608_v59  ;;  %v630_v59 = vld [vmem:[%s2703_s24 + $0xdb0] sm:$0xff] }
 0x164   : > { %2140 = vst [vmem:[%s2746_s20 + $0xcd0] sm:$0xff] %v1628_v5  ;;  %v1633_v17 = vadd.f32 %v2720_v10, %v1120_v6  ;;  %v1122_v19 = vmul.f32 %v2716_v7, %v609_v0  ;;  %v1123_v20 = vmul.f32 %v2716_v7, %v610_v1  ;;  %2141 = vst [vmem:[%s2746_s20 + $0xcd8] sm:$0xff] %v1629_v12  ;;  %v631_v0 = vld [vmem:[%s2703_s24 + $0xdb8] sm:$0xff]  ;;  %v632_v5 = vld [vmem:[%s2703_s24 + $0xdc0] sm:$0xff] }
 0x165   : > { %2142 = vst [vmem:[%s2746_s20 + $0xce0] sm:$0xff] %v1630_v13  ;;  %2143 = vst [vmem:[%s2746_s20 + $0xce8] sm:$0xff] %v1631_v14  ;;  %v1124_v22 = vmul.f32 %v2716_v7, %v611_v2  ;;  %v1125_v23 = vmul.f32 %v2716_v7, %v612_v8  ;;  %v1126_v24 = vmul.f32 %v2716_v7, %v613_v9  ;;  %v633_v12 = vld [vmem:[%s2703_s24 + $0xdc8] sm:$0xff]  ;;  %v634_v13 = vld [vmem:[%s2703_s24 + $0xdd0] sm:$0xff] }
 0x166   : > { %2144 = vst [vmem:[%s2746_s20 + $0xcf0] sm:$0xff] %v1632_v15  ;;  %v1127_v25 = vmul.f32 %v2716_v7, %v614_v11  ;;  %2145 = vst [vmem:[%s2746_s20 + $0xcf8] sm:$0xff] %v1633_v17  ;;  %v1634_v29 = vadd.f32 %v2720_v10, %v1121_v18  ;;  %v1635_v30 = vadd.f32 %v2720_v10, %v1122_v19  ;;  %v635_v14 = vld [vmem:[%s2703_s24 + $0xdd8] sm:$0xff]  ;;  %v636_v19 = vld [vmem:[%s2703_s24 + $0xde0] sm:$0xff] }
 0x167   : > { %v1636_v31 = vadd.f32 %v2720_v10, %v1123_v20  ;;  %v1128_v32 = vmul.f32 %v2716_v7, %v615_v16  ;;  %v1637_v36 = vadd.f32 %v2720_v10, %v1124_v22  ;;  %v1638_v37 = vadd.f32 %v2720_v10, %v1125_v23  ;;  %v637_v20 = vld [vmem:[%s2703_s24 + $0xde8] sm:$0xff] }
 0x168   : > { %v1639_v38 = vadd.f32 %v2720_v10, %v1126_v24  ;;  %v1640_v39 = vadd.f32 %v2720_v10, %v1127_v25  ;;  %2146 = vst [vmem:[%s2746_s20 + $0xd00] sm:$0xff] %v1634_v29  ;;  %2147 = vst [vmem:[%s2746_s20 + $0xd08] sm:$0xff] %v1635_v30  ;;  %v1129_v42 = vmul.f32 %v2716_v7, %v616_v21  ;;  %v638_v21 = vld [vmem:[%s2703_s24 + $0xdf0] sm:$0xff] }
 0x169   : > { %2148 = vst [vmem:[%s2746_s20 + $0xd10] sm:$0xff] %v1636_v31  ;;  %v1641_v41 = vadd.f32 %v2720_v10, %v1128_v32  ;;  %v1130_v43 = vmul.f32 %v2716_v7, %v617_v26  ;;  %v1131_v44 = vmul.f32 %v2716_v7, %v618_v27  ;;  %2149 = vst [vmem:[%s2746_s20 + $0xd18] sm:$0xff] %v1637_v36  ;;  %v639_v26 = vld [vmem:[%s2703_s24 + $0xdf8] sm:$0xff]  ;;  %v640_v31 = vld [vmem:[%s2703_s24 + $0xe00] sm:$0xff] }
 0x16a   : > { %2150 = vst [vmem:[%s2746_s20 + $0xd20] sm:$0xff] %v1638_v37  ;;  %2151 = vst [vmem:[%s2746_s20 + $0xd28] sm:$0xff] %v1639_v38  ;;  %v1132_v46 = vmul.f32 %v2716_v7, %v619_v28  ;;  %v1133_v47 = vmul.f32 %v2716_v7, %v620_v33  ;;  %v1134_v48 = vmul.f32 %v2716_v7, %v621_v34  ;;  %v641_v36 = vld [vmem:[%s2703_s24 + $0xe08] sm:$0xff]  ;;  %v642_v37 = vld [vmem:[%s2703_s24 + $0xe10] sm:$0xff] }
 0x16b   : > { %2152 = vst [vmem:[%s2746_s20 + $0xd30] sm:$0xff] %v1640_v39  ;;  %v1135_v49 = vmul.f32 %v2716_v7, %v622_v35  ;;  %2153 = vst [vmem:[%s2746_s20 + $0xd38] sm:$0xff] %v1641_v41  ;;  %v1642_v53 = vadd.f32 %v2720_v10, %v1129_v42  ;;  %v1643_v54 = vadd.f32 %v2720_v10, %v1130_v43  ;;  %v643_v38 = vld [vmem:[%s2703_s24 + $0xe18] sm:$0xff]  ;;  %v644_v43 = vld [vmem:[%s2703_s24 + $0xe20] sm:$0xff] }
 0x16c   : > { %v1644_v55 = vadd.f32 %v2720_v10, %v1131_v44  ;;  %v1136_v56 = vmul.f32 %v2716_v7, %v623_v40  ;;  %v1645_v60 = vadd.f32 %v2720_v10, %v1132_v46  ;;  %v1646_v61 = vadd.f32 %v2720_v10, %v1133_v47  ;;  %v645_v44 = vld [vmem:[%s2703_s24 + $0xe28] sm:$0xff] }
 0x16d   : > { %v1647_v62 = vadd.f32 %v2720_v10, %v1134_v48  ;;  %v1648_v63 = vadd.f32 %v2720_v10, %v1135_v49  ;;  %2154 = vst [vmem:[%s2746_s20 + $0xd40] sm:$0xff] %v1642_v53  ;;  %2155 = vst [vmem:[%s2746_s20 + $0xd48] sm:$0xff] %v1643_v54  ;;  %v1137_v2 = vmul.f32 %v2716_v7, %v624_v45  ;;  %v646_v45 = vld [vmem:[%s2703_s24 + $0xe30] sm:$0xff] }
 0x16e   : > { %2156 = vst [vmem:[%s2746_s20 + $0xd50] sm:$0xff] %v1644_v55  ;;  %v1649_v1 = vadd.f32 %v2720_v10, %v1136_v56  ;;  %v1138_v3 = vmul.f32 %v2716_v7, %v625_v50  ;;  %v1139_v4 = vmul.f32 %v2716_v7, %v626_v51  ;;  %2157 = vst [vmem:[%s2746_s20 + $0xd58] sm:$0xff] %v1645_v60  ;;  %v647_v50 = vld [vmem:[%s2703_s24 + $0xe38] sm:$0xff]  ;;  %v648_v55 = vld [vmem:[%s2703_s24 + $0xe40] sm:$0xff] }
 0x16f   : > { %2158 = vst [vmem:[%s2746_s20 + $0xd60] sm:$0xff] %v1646_v61  ;;  %2159 = vst [vmem:[%s2746_s20 + $0xd68] sm:$0xff] %v1647_v62  ;;  %v1140_v6 = vmul.f32 %v2716_v7, %v627_v52  ;;  %v1141_v8 = vmul.f32 %v2716_v7, %v628_v57  ;;  %v1142_v9 = vmul.f32 %v2716_v7, %v629_v58  ;;  %v649_v60 = vld [vmem:[%s2703_s24 + $0xe48] sm:$0xff]  ;;  %v650_v61 = vld [vmem:[%s2703_s24 + $0xe50] sm:$0xff] }
 0x170   : > { %2160 = vst [vmem:[%s2746_s20 + $0xd70] sm:$0xff] %v1648_v63  ;;  %v1143_v11 = vmul.f32 %v2716_v7, %v630_v59  ;;  %2161 = vst [vmem:[%s2746_s20 + $0xd78] sm:$0xff] %v1649_v1  ;;  %v1650_v15 = vadd.f32 %v2720_v10, %v1137_v2  ;;  %v1651_v16 = vadd.f32 %v2720_v10, %v1138_v3  ;;  %v651_v62 = vld [vmem:[%s2703_s24 + $0xe58] sm:$0xff]  ;;  %v652_v3 = vld [vmem:[%s2703_s24 + $0xe60] sm:$0xff] }
 0x171   : > { %v1652_v17 = vadd.f32 %v2720_v10, %v1139_v4  ;;  %v1144_v18 = vmul.f32 %v2716_v7, %v631_v0  ;;  %v1653_v22 = vadd.f32 %v2720_v10, %v1140_v6  ;;  %v1654_v23 = vadd.f32 %v2720_v10, %v1141_v8  ;;  %v653_v4 = vld [vmem:[%s2703_s24 + $0xe68] sm:$0xff] }
 0x172   : > { %v1655_v24 = vadd.f32 %v2720_v10, %v1142_v9  ;;  %v1656_v25 = vadd.f32 %v2720_v10, %v1143_v11  ;;  %2162 = vst [vmem:[%s2746_s20 + $0xd80] sm:$0xff] %v1650_v15  ;;  %2163 = vst [vmem:[%s2746_s20 + $0xd88] sm:$0xff] %v1651_v16  ;;  %v1145_v28 = vmul.f32 %v2716_v7, %v632_v5  ;;  %v654_v5 = vld [vmem:[%s2703_s24 + $0xe70] sm:$0xff] }
 0x173   : > { %2164 = vst [vmem:[%s2746_s20 + $0xd90] sm:$0xff] %v1652_v17  ;;  %v1657_v27 = vadd.f32 %v2720_v10, %v1144_v18  ;;  %v1146_v29 = vmul.f32 %v2716_v7, %v633_v12  ;;  %v1147_v30 = vmul.f32 %v2716_v7, %v634_v13  ;;  %2165 = vst [vmem:[%s2746_s20 + $0xd98] sm:$0xff] %v1653_v22  ;;  %v655_v12 = vld [vmem:[%s2703_s24 + $0xe78] sm:$0xff]  ;;  %v656_v17 = vld [vmem:[%s2703_s24 + $0xe80] sm:$0xff] }
 0x174   : > { %2166 = vst [vmem:[%s2746_s20 + $0xda0] sm:$0xff] %v1654_v23  ;;  %2167 = vst [vmem:[%s2746_s20 + $0xda8] sm:$0xff] %v1655_v24  ;;  %v1148_v32 = vmul.f32 %v2716_v7, %v635_v14  ;;  %v1149_v33 = vmul.f32 %v2716_v7, %v636_v19  ;;  %v1150_v34 = vmul.f32 %v2716_v7, %v637_v20  ;;  %v657_v22 = vld [vmem:[%s2703_s24 + $0xe88] sm:$0xff]  ;;  %v658_v23 = vld [vmem:[%s2703_s24 + $0xe90] sm:$0xff] }
 0x175   : > { %2168 = vst [vmem:[%s2746_s20 + $0xdb0] sm:$0xff] %v1656_v25  ;;  %v1151_v35 = vmul.f32 %v2716_v7, %v638_v21  ;;  %2169 = vst [vmem:[%s2746_s20 + $0xdb8] sm:$0xff] %v1657_v27  ;;  %v1658_v39 = vadd.f32 %v2720_v10, %v1145_v28  ;;  %v1659_v40 = vadd.f32 %v2720_v10, %v1146_v29  ;;  %v659_v24 = vld [vmem:[%s2703_s24 + $0xe98] sm:$0xff]  ;;  %v660_v29 = vld [vmem:[%s2703_s24 + $0xea0] sm:$0xff] }
 0x176   : > { %v1660_v41 = vadd.f32 %v2720_v10, %v1147_v30  ;;  %v1152_v42 = vmul.f32 %v2716_v7, %v639_v26  ;;  %v1661_v46 = vadd.f32 %v2720_v10, %v1148_v32  ;;  %v1662_v47 = vadd.f32 %v2720_v10, %v1149_v33  ;;  %v661_v30 = vld [vmem:[%s2703_s24 + $0xea8] sm:$0xff] }
 0x177   : > { %v1663_v48 = vadd.f32 %v2720_v10, %v1150_v34  ;;  %v1664_v49 = vadd.f32 %v2720_v10, %v1151_v35  ;;  %2170 = vst [vmem:[%s2746_s20 + $0xdc0] sm:$0xff] %v1658_v39  ;;  %2171 = vst [vmem:[%s2746_s20 + $0xdc8] sm:$0xff] %v1659_v40  ;;  %v1153_v52 = vmul.f32 %v2716_v7, %v640_v31  ;;  %v662_v31 = vld [vmem:[%s2703_s24 + $0xeb0] sm:$0xff] }
 0x178   : > { %2172 = vst [vmem:[%s2746_s20 + $0xdd0] sm:$0xff] %v1660_v41  ;;  %v1665_v51 = vadd.f32 %v2720_v10, %v1152_v42  ;;  %v1154_v53 = vmul.f32 %v2716_v7, %v641_v36  ;;  %v1155_v54 = vmul.f32 %v2716_v7, %v642_v37  ;;  %2173 = vst [vmem:[%s2746_s20 + $0xdd8] sm:$0xff] %v1661_v46  ;;  %v663_v36 = vld [vmem:[%s2703_s24 + $0xeb8] sm:$0xff]  ;;  %v664_v41 = vld [vmem:[%s2703_s24 + $0xec0] sm:$0xff] }
 0x179   : > { %2174 = vst [vmem:[%s2746_s20 + $0xde0] sm:$0xff] %v1662_v47  ;;  %2175 = vst [vmem:[%s2746_s20 + $0xde8] sm:$0xff] %v1663_v48  ;;  %v1156_v56 = vmul.f32 %v2716_v7, %v643_v38  ;;  %v1157_v57 = vmul.f32 %v2716_v7, %v644_v43  ;;  %v1158_v58 = vmul.f32 %v2716_v7, %v645_v44  ;;  %v665_v46 = vld [vmem:[%s2703_s24 + $0xec8] sm:$0xff]  ;;  %v666_v47 = vld [vmem:[%s2703_s24 + $0xed0] sm:$0xff] }
 0x17a   : > { %2176 = vst [vmem:[%s2746_s20 + $0xdf0] sm:$0xff] %v1664_v49  ;;  %v1159_v59 = vmul.f32 %v2716_v7, %v646_v45  ;;  %2177 = vst [vmem:[%s2746_s20 + $0xdf8] sm:$0xff] %v1665_v51  ;;  %v1666_v63 = vadd.f32 %v2720_v10, %v1153_v52  ;;  %v1667_v0 = vadd.f32 %v2720_v10, %v1154_v53  ;;  %v667_v48 = vld [vmem:[%s2703_s24 + $0xed8] sm:$0xff]  ;;  %v668_v53 = vld [vmem:[%s2703_s24 + $0xee0] sm:$0xff] }
 0x17b   : > { %v1668_v1 = vadd.f32 %v2720_v10, %v1155_v54  ;;  %v1160_v2 = vmul.f32 %v2716_v7, %v647_v50  ;;  %v1669_v6 = vadd.f32 %v2720_v10, %v1156_v56  ;;  %v1670_v8 = vadd.f32 %v2720_v10, %v1157_v57  ;;  %v669_v54 = vld [vmem:[%s2703_s24 + $0xee8] sm:$0xff] }
 0x17c   : > { %v1671_v9 = vadd.f32 %v2720_v10, %v1158_v58  ;;  %v1672_v11 = vadd.f32 %v2720_v10, %v1159_v59  ;;  %2178 = vst [vmem:[%s2746_s20 + $0xe00] sm:$0xff] %v1666_v63  ;;  %2179 = vst [vmem:[%s2746_s20 + $0xe08] sm:$0xff] %v1667_v0  ;;  %v1161_v14 = vmul.f32 %v2716_v7, %v648_v55  ;;  %v670_v55 = vld [vmem:[%s2703_s24 + $0xef0] sm:$0xff] }
 0x17d   : > { %2180 = vst [vmem:[%s2746_s20 + $0xe10] sm:$0xff] %v1668_v1  ;;  %v1673_v13 = vadd.f32 %v2720_v10, %v1160_v2  ;;  %v1162_v15 = vmul.f32 %v2716_v7, %v649_v60  ;;  %v1163_v16 = vmul.f32 %v2716_v7, %v650_v61  ;;  %2181 = vst [vmem:[%s2746_s20 + $0xe18] sm:$0xff] %v1669_v6  ;;  %v671_v60 = vld [vmem:[%s2703_s24 + $0xef8] sm:$0xff]  ;;  %v672_v1 = vld [vmem:[%s2703_s24 + $0xf00] sm:$0xff] }
 0x17e   : > { %2182 = vst [vmem:[%s2746_s20 + $0xe20] sm:$0xff] %v1670_v8  ;;  %2183 = vst [vmem:[%s2746_s20 + $0xe28] sm:$0xff] %v1671_v9  ;;  %v1164_v18 = vmul.f32 %v2716_v7, %v651_v62  ;;  %v1165_v19 = vmul.f32 %v2716_v7, %v652_v3  ;;  %v1166_v20 = vmul.f32 %v2716_v7, %v653_v4  ;;  %v673_v6 = vld [vmem:[%s2703_s24 + $0xf08] sm:$0xff]  ;;  %v674_v8 = vld [vmem:[%s2703_s24 + $0xf10] sm:$0xff] }
 0x17f   : > { %2184 = vst [vmem:[%s2746_s20 + $0xe30] sm:$0xff] %v1672_v11  ;;  %v1167_v21 = vmul.f32 %v2716_v7, %v654_v5  ;;  %2185 = vst [vmem:[%s2746_s20 + $0xe38] sm:$0xff] %v1673_v13  ;;  %v1674_v25 = vadd.f32 %v2720_v10, %v1161_v14  ;;  %v1675_v26 = vadd.f32 %v2720_v10, %v1162_v15  ;;  %v675_v9 = vld [vmem:[%s2703_s24 + $0xf18] sm:$0xff]  ;;  %v676_v15 = vld [vmem:[%s2703_s24 + $0xf20] sm:$0xff] }
 0x180   : > { %v1676_v27 = vadd.f32 %v2720_v10, %v1163_v16  ;;  %v1168_v28 = vmul.f32 %v2716_v7, %v655_v12  ;;  %v1677_v32 = vadd.f32 %v2720_v10, %v1164_v18  ;;  %v1678_v33 = vadd.f32 %v2720_v10, %v1165_v19  ;;  %v677_v16 = vld [vmem:[%s2703_s24 + $0xf28] sm:$0xff] }
 0x181   : > { %v1679_v34 = vadd.f32 %v2720_v10, %v1166_v20  ;;  %v1680_v35 = vadd.f32 %v2720_v10, %v1167_v21  ;;  %2186 = vst [vmem:[%s2746_s20 + $0xe40] sm:$0xff] %v1674_v25  ;;  %2187 = vst [vmem:[%s2746_s20 + $0xe48] sm:$0xff] %v1675_v26  ;;  %v1169_v38 = vmul.f32 %v2716_v7, %v656_v17  ;;  %v678_v17 = vld [vmem:[%s2703_s24 + $0xf30] sm:$0xff] }
 0x182   : > { %2188 = vst [vmem:[%s2746_s20 + $0xe50] sm:$0xff] %v1676_v27  ;;  %v1681_v37 = vadd.f32 %v2720_v10, %v1168_v28  ;;  %v1170_v39 = vmul.f32 %v2716_v7, %v657_v22  ;;  %v1171_v40 = vmul.f32 %v2716_v7, %v658_v23  ;;  %2189 = vst [vmem:[%s2746_s20 + $0xe58] sm:$0xff] %v1677_v32  ;;  %v679_v22 = vld [vmem:[%s2703_s24 + $0xf38] sm:$0xff]  ;;  %v680_v27 = vld [vmem:[%s2703_s24 + $0xf40] sm:$0xff] }
 0x183   : > { %2190 = vst [vmem:[%s2746_s20 + $0xe60] sm:$0xff] %v1678_v33  ;;  %2191 = vst [vmem:[%s2746_s20 + $0xe68] sm:$0xff] %v1679_v34  ;;  %v1172_v42 = vmul.f32 %v2716_v7, %v659_v24  ;;  %v1173_v43 = vmul.f32 %v2716_v7, %v660_v29  ;;  %v1174_v44 = vmul.f32 %v2716_v7, %v661_v30  ;;  %v681_v32 = vld [vmem:[%s2703_s24 + $0xf48] sm:$0xff]  ;;  %v682_v33 = vld [vmem:[%s2703_s24 + $0xf50] sm:$0xff] }
 0x184   : > { %2192 = vst [vmem:[%s2746_s20 + $0xe70] sm:$0xff] %v1680_v35  ;;  %v1175_v45 = vmul.f32 %v2716_v7, %v662_v31  ;;  %2193 = vst [vmem:[%s2746_s20 + $0xe78] sm:$0xff] %v1681_v37  ;;  %v1682_v49 = vadd.f32 %v2720_v10, %v1169_v38  ;;  %v1683_v50 = vadd.f32 %v2720_v10, %v1170_v39  ;;  %v683_v34 = vld [vmem:[%s2703_s24 + $0xf58] sm:$0xff]  ;;  %v684_v39 = vld [vmem:[%s2703_s24 + $0xf60] sm:$0xff] }
 0x185   : > { %v1684_v51 = vadd.f32 %v2720_v10, %v1171_v40  ;;  %v1176_v52 = vmul.f32 %v2716_v7, %v663_v36  ;;  %v1685_v56 = vadd.f32 %v2720_v10, %v1172_v42  ;;  %v1686_v57 = vadd.f32 %v2720_v10, %v1173_v43  ;;  %v685_v40 = vld [vmem:[%s2703_s24 + $0xf68] sm:$0xff] }
 0x186   : > { %v1687_v58 = vadd.f32 %v2720_v10, %v1174_v44  ;;  %v1688_v59 = vadd.f32 %v2720_v10, %v1175_v45  ;;  %2194 = vst [vmem:[%s2746_s20 + $0xe80] sm:$0xff] %v1682_v49  ;;  %2195 = vst [vmem:[%s2746_s20 + $0xe88] sm:$0xff] %v1683_v50  ;;  %v1177_v62 = vmul.f32 %v2716_v7, %v664_v41  ;;  %v686_v41 = vld [vmem:[%s2703_s24 + $0xf70] sm:$0xff] }
 0x187   : > { %2196 = vst [vmem:[%s2746_s20 + $0xe90] sm:$0xff] %v1684_v51  ;;  %v1689_v61 = vadd.f32 %v2720_v10, %v1176_v52  ;;  %v1178_v63 = vmul.f32 %v2716_v7, %v665_v46  ;;  %v1179_v0 = vmul.f32 %v2716_v7, %v666_v47  ;;  %2197 = vst [vmem:[%s2746_s20 + $0xe98] sm:$0xff] %v1685_v56  ;;  %v687_v46 = vld [vmem:[%s2703_s24 + $0xf78] sm:$0xff]  ;;  %v688_v51 = vld [vmem:[%s2703_s24 + $0xf80] sm:$0xff] }
 0x188   : > { %2198 = vst [vmem:[%s2746_s20 + $0xea0] sm:$0xff] %v1686_v57  ;;  %2199 = vst [vmem:[%s2746_s20 + $0xea8] sm:$0xff] %v1687_v58  ;;  %v1180_v2 = vmul.f32 %v2716_v7, %v667_v48  ;;  %v1181_v3 = vmul.f32 %v2716_v7, %v668_v53  ;;  %v1182_v4 = vmul.f32 %v2716_v7, %v669_v54  ;;  %v689_v56 = vld [vmem:[%s2703_s24 + $0xf88] sm:$0xff]  ;;  %v690_v57 = vld [vmem:[%s2703_s24 + $0xf90] sm:$0xff] }
 0x189   : > { %2200 = vst [vmem:[%s2746_s20 + $0xeb0] sm:$0xff] %v1688_v59  ;;  %v1183_v5 = vmul.f32 %v2716_v7, %v670_v55  ;;  %2201 = vst [vmem:[%s2746_s20 + $0xeb8] sm:$0xff] %v1689_v61  ;;  %v1690_v11 = vadd.f32 %v2720_v10, %v1177_v62  ;;  %v1691_v12 = vadd.f32 %v2720_v10, %v1178_v63  ;;  %v691_v58 = vld [vmem:[%s2703_s24 + $0xf98] sm:$0xff]  ;;  %v692_v63 = vld [vmem:[%s2703_s24 + $0xfa0] sm:$0xff] }
 0x18a   : > { %v1692_v13 = vadd.f32 %v2720_v10, %v1179_v0  ;;  %v1184_v14 = vmul.f32 %v2716_v7, %v671_v60  ;;  %v1693_v18 = vadd.f32 %v2720_v10, %v1180_v2  ;;  %v1694_v19 = vadd.f32 %v2720_v10, %v1181_v3  ;;  %v693_v0 = vld [vmem:[%s2703_s24 + $0xfa8] sm:$0xff] }
 0x18b   : > { %v1695_v20 = vadd.f32 %v2720_v10, %v1182_v4  ;;  %v1696_v21 = vadd.f32 %v2720_v10, %v1183_v5  ;;  %2202 = vst [vmem:[%s2746_s20 + $0xec0] sm:$0xff] %v1690_v11  ;;  %2203 = vst [vmem:[%s2746_s20 + $0xec8] sm:$0xff] %v1691_v12  ;;  %v1185_v24 = vmul.f32 %v2716_v7, %v672_v1  ;;  %v694_v1 = vld [vmem:[%s2703_s24 + $0xfb0] sm:$0xff] }
 0x18c   : > { %2204 = vst [vmem:[%s2746_s20 + $0xed0] sm:$0xff] %v1692_v13  ;;  %v1697_v23 = vadd.f32 %v2720_v10, %v1184_v14  ;;  %v1186_v25 = vmul.f32 %v2716_v7, %v673_v6  ;;  %v1187_v26 = vmul.f32 %v2716_v7, %v674_v8  ;;  %2205 = vst [vmem:[%s2746_s20 + $0xed8] sm:$0xff] %v1693_v18  ;;  %v695_v6 = vld [vmem:[%s2703_s24 + $0xfb8] sm:$0xff]  ;;  %v696_v13 = vld [vmem:[%s2703_s24 + $0xfc0] sm:$0xff] }
 0x18d   : > { %2206 = vst [vmem:[%s2746_s20 + $0xee0] sm:$0xff] %v1694_v19  ;;  %2207 = vst [vmem:[%s2746_s20 + $0xee8] sm:$0xff] %v1695_v20  ;;  %v1188_v28 = vmul.f32 %v2716_v7, %v675_v9  ;;  %v1189_v29 = vmul.f32 %v2716_v7, %v676_v15  ;;  %v1190_v30 = vmul.f32 %v2716_v7, %v677_v16  ;;  %v697_v18 = vld [vmem:[%s2703_s24 + $0xfc8] sm:$0xff]  ;;  %v698_v19 = vld [vmem:[%s2703_s24 + $0xfd0] sm:$0xff] }
 0x18e   : > { %2208 = vst [vmem:[%s2746_s20 + $0xef0] sm:$0xff] %v1696_v21  ;;  %v1191_v31 = vmul.f32 %v2716_v7, %v678_v17  ;;  %2209 = vst [vmem:[%s2746_s20 + $0xef8] sm:$0xff] %v1697_v23  ;;  %v1698_v35 = vadd.f32 %v2720_v10, %v1185_v24  ;;  %v1699_v36 = vadd.f32 %v2720_v10, %v1186_v25  ;;  %v699_v20 = vld [vmem:[%s2703_s24 + $0xfd8] sm:$0xff]  ;;  %v700_v25 = vld [vmem:[%s2703_s24 + $0xfe0] sm:$0xff] }
 0x18f   : > { %v1700_v37 = vadd.f32 %v2720_v10, %v1187_v26  ;;  %v1192_v38 = vmul.f32 %v2716_v7, %v679_v22  ;;  %v1701_v42 = vadd.f32 %v2720_v10, %v1188_v28  ;;  %v1702_v43 = vadd.f32 %v2720_v10, %v1189_v29  ;;  %v701_v26 = vld [vmem:[%s2703_s24 + $0xfe8] sm:$0xff] }
 0x190   : > { %v1703_v44 = vadd.f32 %v2720_v10, %v1190_v30  ;;  %v1704_v45 = vadd.f32 %v2720_v10, %v1191_v31  ;;  %2210 = vst [vmem:[%s2746_s20 + $0xf00] sm:$0xff] %v1698_v35  ;;  %2211 = vst [vmem:[%s2746_s20 + $0xf08] sm:$0xff] %v1699_v36  ;;  %v1193_v48 = vmul.f32 %v2716_v7, %v680_v27  ;;  %v702_v27 = vld [vmem:[%s2703_s24 + $0xff0] sm:$0xff] }
 0x191   : > { %2212 = vst [vmem:[%s2746_s20 + $0xf10] sm:$0xff] %v1700_v37  ;;  %v1705_v47 = vadd.f32 %v2720_v10, %v1192_v38  ;;  %v1194_v49 = vmul.f32 %v2716_v7, %v681_v32  ;;  %v1195_v50 = vmul.f32 %v2716_v7, %v682_v33  ;;  %2213 = vst [vmem:[%s2746_s20 + $0xf18] sm:$0xff] %v1701_v42  ;;  %v703_v32 = vld [vmem:[%s2703_s24 + $0xff8] sm:$0xff] }
 0x192   : > { %2214 = vst [vmem:[%s2746_s20 + $0xf20] sm:$0xff] %v1702_v43  ;;  %2215 = vst [vmem:[%s2746_s20 + $0xf28] sm:$0xff] %v1703_v44  ;;  %v1196_v52 = vmul.f32 %v2716_v7, %v683_v34  ;;  %v1197_v53 = vmul.f32 %v2716_v7, %v684_v39  ;;  %v1198_v54 = vmul.f32 %v2716_v7, %v685_v40 }
 0x193   : > { %2216 = vst [vmem:[%s2746_s20 + $0xf30] sm:$0xff] %v1704_v45  ;;  %v1199_v55 = vmul.f32 %v2716_v7, %v686_v41  ;;  %2217 = vst [vmem:[%s2746_s20 + $0xf38] sm:$0xff] %v1705_v47  ;;  %v1706_v59 = vadd.f32 %v2720_v10, %v1193_v48  ;;  %v1707_v60 = vadd.f32 %v2720_v10, %v1194_v49 }
 0x194   : > { %v1708_v61 = vadd.f32 %v2720_v10, %v1195_v50  ;;  %v1200_v62 = vmul.f32 %v2716_v7, %v687_v46  ;;  %v1709_v2 = vadd.f32 %v2720_v10, %v1196_v52  ;;  %v1710_v3 = vadd.f32 %v2720_v10, %v1197_v53 }
 0x195   : > { %v1711_v4 = vadd.f32 %v2720_v10, %v1198_v54  ;;  %v1712_v5 = vadd.f32 %v2720_v10, %v1199_v55  ;;  %2218 = vst [vmem:[%s2746_s20 + $0xf40] sm:$0xff] %v1706_v59  ;;  %2219 = vst [vmem:[%s2746_s20 + $0xf48] sm:$0xff] %v1707_v60  ;;  %v1201_v9 = vmul.f32 %v2716_v7, %v688_v51 }
 0x196   : > { %2220 = vst [vmem:[%s2746_s20 + $0xf50] sm:$0xff] %v1708_v61  ;;  %v1713_v8 = vadd.f32 %v2720_v10, %v1200_v62  ;;  %v1202_v11 = vmul.f32 %v2716_v7, %v689_v56  ;;  %v1203_v12 = vmul.f32 %v2716_v7, %v690_v57  ;;  %2221 = vst [vmem:[%s2746_s20 + $0xf58] sm:$0xff] %v1709_v2 }
 0x197   : > { %2222 = vst [vmem:[%s2746_s20 + $0xf60] sm:$0xff] %v1710_v3  ;;  %2223 = vst [vmem:[%s2746_s20 + $0xf68] sm:$0xff] %v1711_v4  ;;  %v1204_v14 = vmul.f32 %v2716_v7, %v691_v58  ;;  %v1205_v15 = vmul.f32 %v2716_v7, %v692_v63  ;;  %v1206_v16 = vmul.f32 %v2716_v7, %v693_v0 }
 0x198   : > { %2224 = vst [vmem:[%s2746_s20 + $0xf70] sm:$0xff] %v1712_v5  ;;  %v1207_v17 = vmul.f32 %v2716_v7, %v694_v1  ;;  %2225 = vst [vmem:[%s2746_s20 + $0xf78] sm:$0xff] %v1713_v8  ;;  %v1714_v21 = vadd.f32 %v2720_v10, %v1201_v9  ;;  %v1715_v22 = vadd.f32 %v2720_v10, %v1202_v11 }
 0x199   : > { %v1716_v23 = vadd.f32 %v2720_v10, %v1203_v12  ;;  %v1208_v24 = vmul.f32 %v2716_v7, %v695_v6  ;;  %v1717_v28 = vadd.f32 %v2720_v10, %v1204_v14  ;;  %v1718_v29 = vadd.f32 %v2720_v10, %v1205_v15 }
 0x19a   : > { %v1719_v30 = vadd.f32 %v2720_v10, %v1206_v16  ;;  %v1720_v31 = vadd.f32 %v2720_v10, %v1207_v17  ;;  %2226 = vst [vmem:[%s2746_s20 + $0xf80] sm:$0xff] %v1714_v21  ;;  %2227 = vst [vmem:[%s2746_s20 + $0xf88] sm:$0xff] %v1715_v22  ;;  %v1209_v34 = vmul.f32 %v2716_v7, %v696_v13 }
 0x19b   : > { %2228 = vst [vmem:[%s2746_s20 + $0xf90] sm:$0xff] %v1716_v23  ;;  %v1721_v33 = vadd.f32 %v2720_v10, %v1208_v24  ;;  %v1210_v35 = vmul.f32 %v2716_v7, %v697_v18  ;;  %v1211_v36 = vmul.f32 %v2716_v7, %v698_v19  ;;  %2229 = vst [vmem:[%s2746_s20 + $0xf98] sm:$0xff] %v1717_v28 }
 0x19c   : > { %2230 = vst [vmem:[%s2746_s20 + $0xfa0] sm:$0xff] %v1718_v29  ;;  %2231 = vst [vmem:[%s2746_s20 + $0xfa8] sm:$0xff] %v1719_v30  ;;  %v1212_v37 = vmul.f32 %v2716_v7, %v699_v20  ;;  %v1213_v38 = vmul.f32 %v2716_v7, %v700_v25  ;;  %v1214_v39 = vmul.f32 %v2716_v7, %v701_v26  ;;  %2249 = sbr.rel (!%p4840_p6) target bundleno = 447 (0x1bf), region = 40 }
 0x19d   : > { %2232 = vst [vmem:[%s2746_s20 + $0xfb0] sm:$0xff] %v1720_v31  ;;  %v1215_v40 = vmul.f32 %v2716_v7, %v702_v27  ;;  %2233 = vst [vmem:[%s2746_s20 + $0xfb8] sm:$0xff] %v1721_v33  ;;  %v1722_v41 = vadd.f32 %v2720_v10, %v1209_v34  ;;  %v1723_v42 = vadd.f32 %v2720_v10, %v1210_v35 }
 0x19e   : > { %v1724_v43 = vadd.f32 %v2720_v10, %v1211_v36  ;;  %v1216_v44 = vmul.f32 %v2716_v7, %v703_v32  ;;  %v1725_v45 = vadd.f32 %v2720_v10, %v1212_v37  ;;  %v1726_v46 = vadd.f32 %v2720_v10, %v1213_v38 }
 0x19f   : > { %v1727_v47 = vadd.f32 %v2720_v10, %v1214_v39  ;;  %v1728_v48 = vadd.f32 %v2720_v10, %v1215_v40  ;;  %2234 = vst [vmem:[%s2746_s20 + $0xfc0] sm:$0xff] %v1722_v41  ;;  %2235 = vst [vmem:[%s2746_s20 + $0xfc8] sm:$0xff] %v1723_v42 }
 0x1a0   : > { %2236 = vst [vmem:[%s2746_s20 + $0xfd0] sm:$0xff] %v1724_v43  ;;  %v1729_v49 = vadd.f32 %v2720_v10, %v1216_v44  ;;  %2237 = vst [vmem:[%s2746_s20 + $0xfd8] sm:$0xff] %v1725_v45 }
 0x1a1   : > { %2238 = vst [vmem:[%s2746_s20 + $0xfe0] sm:$0xff] %v1726_v46  ;;  %2239 = vst [vmem:[%s2746_s20 + $0xfe8] sm:$0xff] %v1727_v47 }
 0x1a2   : > { %2240 = vst [vmem:[%s2746_s20 + $0xff0] sm:$0xff] %v1728_v48  ;;  %2241 = vst [vmem:[%s2746_s20 + $0xff8] sm:$0xff] %v1729_v49 }
 0x1a3   : > { %s4850_s4 = smov (!%p2252_p12, %s2251_s4), 512 }
 0x1a4   : > { %s4769_s5 = sshll.u32 %s4850_s4, 7 }
 0x1a5   : > { %s2256_s6 = ssub.s32 65536, %s4769_s5 }
 0x1a6   : > { %2257 = vsyncadd %s2243_s29, %s2256_s6  ;;  %p2366_p13 = scmp.ne.s32.totalorder %s4769_s5, 0  ;;  %s2373_s21 = sshll.u32 %s2584_s13, 16 }
 0x1a7   : > { %s4779_s14 = scalar_lea.hbm %s4830_s2, %s2373_s21  ;;  %s2262_s17 = sshll.u32 %s2746_s20, 4  ;;  %s4782_s17 = int_to_ptr.vmem [resolvable:$true] %s2262_s17 }
 0x1a8   : > { %s2469_s25 = scalar_lea.vmem %s4782_s17, %s4769_s5  ;;  %s2545_s19 = smov [#allocation7]  }
 0x1a9   : > { %p2470_p1 = scmp.ne.s32.totalorder %s4782_s17, %s2469_s25  ;;  %s2473_s26 = sshll.u32 %s2545_s19, 4  ;;  %s2474_s26 = int_to_ptr.vmem [resolvable:$false] %s2473_s26 }
 0x1aa   : > { %s2475_s13 = scalar_lea.vmem %s2474_s26, 131072  ;;  %p2476_p0 = scmp.lt.s32.totalorder %s4782_s17, %s2474_s26 }
 0x1ab   : > { %p2471_p5 = pnand %p2470_p1, %p2366_p13  ;;  %p2477_p2 = scmp.lt.s32.totalorder %s2475_s13, %s2469_s25 }
 0x1ad   : > { %p2472_p7 = pneg %p2471_p5  ;;  %p2478_p3 = por %p2477_p2, %p2476_p0 }
 0x1af   : > { %p2479_p8 = pnand %p2478_p3, %p2472_p7 }
 0x1b1   : > { %2482 = shalt.err (!%p2479_p8)
}
 0x1b2   : > { %s2483_s30 = scalar_lea.hbm %s4779_s14, %s4769_s5  ;;  %s2487_s23 = scalar_lea.hbm %s4830_s2, 65664 }
 0x1b3   : > { %p2484_p9 = scmp.ne.s32.totalorder %s4779_s14, %s2483_s30  ;;  %p2488_p11 = scmp.lt.u32.totalorder %s4779_s14, %s4830_s2 }
 0x1b4   : > { %p2489_p6 = scmp.lt.u32.totalorder %s2487_s23, %s2483_s30  ;;  %p2491_p1 = scmp.lt.u32.totalorder %s2483_s30, %s4779_s14 }
 0x1b5   : > { %p2485_p10 = pnand %p2484_p9, %p2366_p13 }
 0x1b6   : > { %p2490_p12 = por %p2489_p6, %p2488_p11 }
 0x1b7   : > { %p2486_p4 = pneg %p2485_p10 }
 0x1b8   : > { %p2492_p5 = por %p2491_p1, %p2490_p12 }
 0x1ba   : > { %p2493_p7 = pnand %p2492_p5, %p2486_p4 }
 0x1bc   : > { %2496 = shalt.err (!%p2493_p7)
}
 0x1bd   : > { %s2546_s3 = smov 128   ;;  %s2547_s4 = smov 8  }
 0x1be   : > { %2268 = dma.vmem_to_hbm [thread:$0]  (%p2366_p13), %s4782_s17, %s4769_s5, %s4779_s14, %s2243_s29, %s2546_s3, %s2546_s3, %s2547_s4  }
 0x1bf PF: > { %s2277_s6 = sand.u32 1, %s2527_s9   ;;  %p4841_p0 = scmp.ne.s32.totalorder %s4836_s22, 0 }
 0x1c0   : > { %p4842_p2 = scmp.ge.s32.totalorder %s2539_s12, 2  ;;  %s2278_s21 = scalar_lea.sflag [#allocation4], %s2277_s6 }
 0x1c2   : > { %p2385_p3 = pnand %p4842_p2, %p4841_p0 }
 0x1c4   : > { %2522 = dma.done.wait (!%p2385_p3), %s2278_s21, 65536  }
 0x1c5   : > { %2524 = vsyncadd (!%p2385_p3), %s2278_s21, 4294901760  ;;  %p16_p8 = scmp.ge.s32.totalorder %s2588_s15, 4   ;;  %s4843_s9 = smov %s2531_s10 }
 0x1c6   : > { %s4844_s10 = smov %s2535_s11  ;;  %s4845_s11 = smov %s2600_s18 }
 0x1c7   : > { %s4846_s12 = smov %s2588_s15  ;;  %18 = sbr.rel (!%p16_p8) target bundleno = 6 (0x6), region = 78 }
 0x1ce   :  { %2283 = vsyncpa [#allocation3], 1 }
 0x1cf   :  { %2285 = vsyncpa [#allocation3 + $0x1], 1 }
 0x1d0   :  { %2286 = vsyncpa [#allocation4], 1 }
 0x1d1   :  { %2288 = vsyncpa [#allocation4 + $0x1], 1 }
 0x1d2   :  { %2289 = vsyncpa [#allocation5], 1 }
 0x1d3   :  { %2291 = vsyncpa [#allocation5 + $0x1], 1 }

</bundles_post_ra>
